<compile_context>
chip_gen: v6e
topology: v6e:2x2x1
jax: 0.10.0
libtpu: 0.0.40
codegen_flags: <defaults>
</compile_context>

<pallas_src>
import jax
import jax.numpy as jnp
from jax import lax
from jax.experimental import pallas as pl
from jax.experimental.pallas import tpu as pltpu


def spectral_lstm_kernel(
    xh_ref, cx_ref,
    Li_ref, Ri_ref, bi_ref,
    Lf_ref, Rf_ref, bf_ref,
    Lg_ref, Rg_ref, bg_ref,
    Wo_ref, bo_ref,
    Vtinv_ref, UinvT_ref,
    hx_out_ref, cx_out_ref,
):
    xh = xh_ref[...]             # (Bt, K), K = I + H, rows are [x_b | h_b]
    c = cx_ref[...]              # (Bt, H, H)
    Bt, K = xh.shape
    H = c.shape[1]

    def nt(a, b):
        # a @ b.T without materializing a transpose (contract last dims).
        return lax.dot_general(a, b, (((1,), (1,)), ((), ())),
                               preferred_element_type=jnp.float32)

    def gate_pre(L, R, bias):
        # Per batch row b:  (L * xh_b) @ R^T
        #   == W_x @ diag(x_b) @ W_x^T + W_h @ diag(h_b) @ W_h'^T
        # Stacked over the batch block so the MXU sees M = Bt*H.
        lhs = (L[None, :, :] * xh[:, None, :]).reshape(Bt * H, K)
        out = nt(lhs, R).reshape(Bt, H, H)
        return out + bias[None, :, :]

    i = jax.nn.sigmoid(gate_pre(Li_ref[...], Ri_ref[...], bi_ref[...]))
    f = jax.nn.sigmoid(gate_pre(Lf_ref[...], Rf_ref[...], bf_ref[...]))
    g = jnp.tanh(gate_pre(Lg_ref[...], Rg_ref[...], bg_ref[...]))

    # Output gate for the whole batch block at once: sigmoid(xh @ [Wio|Who]^T + bo).
    o = jax.nn.sigmoid(nt(xh, Wo_ref[...]) + bo_ref[...])        # (Bt, H)

    # Cell-state matrix update.
    c_new = f * c + i * g                                        # (Bt, H, H)

    # diag(Uinv @ C @ Vtinv)[i] == sum_j (C @ Vtinv)[j, i] * Uinv^T[j, i]
    # -> one stacked (Bt*H, H) x (H, H) matmul + a cheap sublane reduce.
    d = jnp.dot(c_new.reshape(Bt * H, H), Vtinv_ref[...],
                preferred_element_type=jnp.float32).reshape(Bt, H, H)
    proj = jnp.sum(d * UinvT_ref[...][None, :, :], axis=1)        # (Bt, H)

    hx_out_ref[...] = o * jax.nn.sigmoid(proj)
    cx_out_ref[...] = c_new


def spectral_lstm_forward(x, hx, cx, params, block_b=8):
    B, I = x.shape
    H = hx.shape[1]
    (Wii, Whi, Whit, bi, Wif, Whf, Whft, bf,
     Wig, Whc, Whct, bg, Wio, Who, bo, Uinv, Vtinv) = params

    # Host-side glue: fuse the x-term and h-term of every gate into a single
    # matmul operand pair, and pre-transpose the small pieces the kernel needs.
    Li = jnp.concatenate([Wii, Whi], axis=1)     # (H, I+H)
    Ri = jnp.concatenate([Wii, Whit], axis=1)
    Lf = jnp.concatenate([Wif, Whf], axis=1)
    Rf = jnp.concatenate([Wif, Whft], axis=1)
    Lg = jnp.concatenate([Wig, Whc], axis=1)
    Rg = jnp.concatenate([Wig, Whct], axis=1)
    Wo = jnp.concatenate([Wio, Who], axis=1)     # (H, I+H)
    bo_row = bo.T                                # (1, H)
    UinvT = Uinv.T                               # (H, H)

    xh = jnp.concatenate([x, hx], axis=1)        # (B, I+H)
    K = I + H

    # Batch blocking: Bt rows per grid step (pad B up to a multiple of Bt).
    Bt = B if B <= block_b else block_b
    nb = pl.cdiv(B, Bt)
    Bp = nb * Bt
    if Bp != B:
        xh = jnp.pad(xh, ((0, Bp - B), (0, 0)))
        cx = jnp.pad(cx, ((0, Bp - B), (0, 0), (0, 0)))

    # Advisory cost estimate (gates + o-gate + diag-projection matmul).
    flops = int(B * (6 * H * H * K + 2 * H * K + 2 * H * H * H + 10 * H * H))
    transcendentals = int(B * (3 * H * H + 2 * H))
    weight_bytes = 4 * (7 * H * K + 3 * H * H + 2 * H * H + H)
    bytes_accessed = int(4 * Bp * (K + 2 * H * H + 2 * H) + nb * weight_bytes)
    cost = pl.CostEstimate(flops=flops, transcendentals=transcendentals,
                           bytes_accessed=bytes_accessed)

    def run(single_buffer_weights):
        def const_spec(shape):
            ndim = len(shape)
            index_map = lambda b: (0,) * ndim
            if single_buffer_weights:
                # Constant index map across the grid: double-buffering these
                # operands buys nothing and doubles their VMEM footprint.
                return pl.BlockSpec(shape, index_map,
                                    pipeline_mode=pl.Buffered(1))
            return pl.BlockSpec(shape, index_map)

        in_specs = [
            pl.BlockSpec((Bt, K), lambda b: (b, 0)),           # xh
            pl.BlockSpec((Bt, H, H), lambda b: (b, 0, 0)),     # cx
            const_spec((H, K)), const_spec((H, K)), const_spec((H, H)),  # i gate
            const_spec((H, K)), const_spec((H, K)), const_spec((H, H)),  # f gate
            const_spec((H, K)), const_spec((H, K)), const_spec((H, H)),  # g gate
            const_spec((H, K)), const_spec((1, H)),                      # o gate
            const_spec((H, H)), const_spec((H, H)),                      # Vtinv, Uinv^T
        ]
        out_specs = (
            pl.BlockSpec((Bt, H), lambda b: (b, 0)),
            pl.BlockSpec((Bt, H, H), lambda b: (b, 0, 0)),
        )
        return pl.pallas_call(
            spectral_lstm_kernel,
            out_shape=(jax.ShapeDtypeStruct((Bp, H), jnp.float32),
                       jax.ShapeDtypeStruct((Bp, H, H), jnp.float32)),
            grid=(nb,),
            in_specs=in_specs,
            out_specs=out_specs,
            compiler_params=pltpu.CompilerParams(
                dimension_semantics=("parallel",)),
            cost_estimate=cost,
        )(xh, cx, Li, Ri, bi, Lf, Rf, bf, Lg, Rg, bg, Wo, bo_row, Vtinv, UinvT)

    try:
        hx_new, cx_new = run(single_buffer_weights=True)
    except Exception:
        # Fallback for JAX versions where pipeline_mode=pl.Buffered(1) is not
        # accepted on a top-level pallas_call BlockSpec.
        hx_new, cx_new = run(single_buffer_weights=False)

    return hx_new[:B], cx_new[:B]


# ---------------- deterministic parameter init (synthetic) ----------------

def xavier_normal(key, shape):
    fan_out, fan_in = shape
    std = (2.0 / (fan_in + fan_out)) ** 0.5
    return std * jax.random.normal(key, shape, dtype=jnp.float32)


def orthogonal(key, n):
    a = jax.random.normal(key, (n, n), dtype=jnp.float32)
    q, r = jnp.linalg.qr(a)
    return q * jnp.sign(jnp.diagonal(r))[None, :]


def init_params(key, input_size, hidden_size):
    ks = jax.random.split(key, 16)
    H, I = hidden_size, input_size
    Wii = xavier_normal(ks[0], (H, I))
    Whi = orthogonal(ks[1], H)
    Whit = orthogonal(ks[2], H)
    bi = jnp.zeros((H, H), jnp.float32)
    Wif = xavier_normal(ks[3], (H, I))
    Whf = orthogonal(ks[4], H)
    Whft = orthogonal(ks[5], H)
    bf = jnp.zeros((H, H), jnp.float32)
    Wig = xavier_normal(ks[6], (H, I))
    Whc = orthogonal(ks[7], H)
    Whct = orthogonal(ks[8], H)
    bg = jnp.zeros((H, H), jnp.float32)
    Wio = xavier_normal(ks[9], (H, I))
    Who = orthogonal(ks[10], H)
    bo = jnp.zeros((H, 1), jnp.float32)
    Uinv = orthogonal(ks[11], H)
    Vtinv = orthogonal(ks[12], H)
    return (Wii, Whi, Whit, bi, Wif, Whf, Whft, bf,
            Wig, Whc, Whct, bg, Wio, Who, bo, Uinv, Vtinv)


# ---------------- pure-JAX reference (matches PyTorch forward) ----------------

def ref_forward(params, x, hx, cx):
    (Wii, Whi, Whit, bi, Wif, Whf, Whft, bf,
     Wig, Whc, Whct, bg, Wio, Who, bo, Uinv, Vtinv) = params

    def per(xb, hb, cb):
        xd = jnp.diag(xb)
        hd = jnp.diag(hb)
        i = jax.nn.sigmoid(Wii @ xd @ Wii.T + Whi @ hd @ Whit.T + bi)
        f = jax.nn.sigmoid(Wif @ xd @ Wif.T + Whf @ hd @ Whft.T + bf)
        g = jnp.tanh(Wig @ xd @ Wig.T + Whc @ hd @ Whct.T + bg)
        o = jax.nn.sigmoid(Wio @ xb[:, None] + Who @ hb[:, None] + bo)[:, 0]
        c_new = f * cb + i * g
        inv_mul = Uinv @ c_new @ Vtinv
        proj = jnp.diagonal(inv_mul)
        h_new = o * jax.nn.sigmoid(proj)
        return h_new, c_new

    return jax.vmap(per)(x, hx, cx)


if __name__ == "__main__":
    B, I, H = 2, 4, 64  # batch, input_size, hidden_size

    key = jax.random.PRNGKey(0)
    kp, kx, kh, kc = jax.random.split(key, 4)
    params = init_params(kp, I, H)

    x = jax.random.normal(kx, (B, I), dtype=jnp.float32)
    # reset() would give zeros; use small random states to exercise all paths.
    hx = 0.1 * jax.random.normal(kh, (B, H), dtype=jnp.float32)
    cx = 0.1 * jax.random.normal(kc, (B, H, H), dtype=jnp.float32)

    hx_new, cx_new = spectral_lstm_forward(x, hx, cx, params)
    jax.block_until_ready((hx_new, cx_new))

    with jax.default_matmul_precision("highest"):
        hx_ref, cx_ref = ref_forward(params, x, hx, cx)

    assert hx_new.shape == (B, H) and cx_new.shape == (B, H, H)
    # Tolerance reflects the reassociated f32 accumulation order of the fused
    # kernel (single concatenated contraction, diag-as-rowsum) vs. the reference.
    assert jnp.allclose(hx_new, hx_ref, atol=1e-4, rtol=1e-4)
    assert jnp.allclose(cx_new, cx_ref, atol=1e-4, rtol=1e-4)

    print("KERNEL_OK")
</pallas_src>

<mosaic_0001>
module attributes {stable_mosaic.version = 11 : i64} {
  func.func @spectral_lstm_kernel(%arg0: i32, %arg1: memref<2x68xf32, #tpu.memory_space<vmem>>, %arg2: memref<2x64x64xf32, #tpu.memory_space<vmem>>, %arg3: memref<64x68xf32, #tpu.memory_space<vmem>>, %arg4: memref<64x68xf32, #tpu.memory_space<vmem>>, %arg5: memref<64x64xf32, #tpu.memory_space<vmem>>, %arg6: memref<64x68xf32, #tpu.memory_space<vmem>>, %arg7: memref<64x68xf32, #tpu.memory_space<vmem>>, %arg8: memref<64x64xf32, #tpu.memory_space<vmem>>, %arg9: memref<64x68xf32, #tpu.memory_space<vmem>>, %arg10: memref<64x68xf32, #tpu.memory_space<vmem>>, %arg11: memref<64x64xf32, #tpu.memory_space<vmem>>, %arg12: memref<64x68xf32, #tpu.memory_space<vmem>>, %arg13: memref<1x64xf32, #tpu.memory_space<vmem>>, %arg14: memref<64x64xf32, #tpu.memory_space<vmem>>, %arg15: memref<64x64xf32, #tpu.memory_space<vmem>>, %arg16: memref<2x64xf32, #tpu.memory_space<vmem>>, %arg17: memref<2x64x64xf32, #tpu.memory_space<vmem>>) attributes {dimension_semantics = [#tpu.dimension_semantics<parallel>], iteration_bounds = array<i64: 1>, scalar_prefetch = 0 : i64, scratch_operands = 0 : i64, tpu.core_type = #tpu.core_type<tc>, window_params = [{transform_indices = @transform_0, window_bounds = array<i64: 2, 68>}, {transform_indices = @transform_1, window_bounds = array<i64: 2, 64, 64>}, {pipeline_mode = #tpu.pipeline_mode<synchronous>, transform_indices = @transform_2, window_bounds = array<i64: 64, 68>}, {pipeline_mode = #tpu.pipeline_mode<synchronous>, transform_indices = @transform_3, window_bounds = array<i64: 64, 68>}, {pipeline_mode = #tpu.pipeline_mode<synchronous>, transform_indices = @transform_4, window_bounds = array<i64: 64, 64>}, {pipeline_mode = #tpu.pipeline_mode<synchronous>, transform_indices = @transform_5, window_bounds = array<i64: 64, 68>}, {pipeline_mode = #tpu.pipeline_mode<synchronous>, transform_indices = @transform_6, window_bounds = array<i64: 64, 68>}, {pipeline_mode = #tpu.pipeline_mode<synchronous>, transform_indices = @transform_7, window_bounds = array<i64: 64, 64>}, {pipeline_mode = #tpu.pipeline_mode<synchronous>, transform_indices = @transform_8, window_bounds = array<i64: 64, 68>}, {pipeline_mode = #tpu.pipeline_mode<synchronous>, transform_indices = @transform_9, window_bounds = array<i64: 64, 68>}, {pipeline_mode = #tpu.pipeline_mode<synchronous>, transform_indices = @transform_10, window_bounds = array<i64: 64, 64>}, {pipeline_mode = #tpu.pipeline_mode<synchronous>, transform_indices = @transform_11, window_bounds = array<i64: 64, 68>}, {pipeline_mode = #tpu.pipeline_mode<synchronous>, transform_indices = @transform_12, window_bounds = array<i64: 1, 64>}, {pipeline_mode = #tpu.pipeline_mode<synchronous>, transform_indices = @transform_13, window_bounds = array<i64: 64, 64>}, {pipeline_mode = #tpu.pipeline_mode<synchronous>, transform_indices = @transform_14, window_bounds = array<i64: 64, 64>}, {transform_indices = @transform_15, window_bounds = array<i64: 2, 64>}, {transform_indices = @transform_16, window_bounds = array<i64: 2, 64, 64>}]} {
    %c0 = arith.constant 0 : index
    %c0_0 = arith.constant 0 : index
    %0 = vector.load %arg1[%c0, %c0_0] : memref<2x68xf32, #tpu.memory_space<vmem>>, vector<2x68xf32>
    %c0_1 = arith.constant 0 : index
    %c0_2 = arith.constant 0 : index
    %c0_3 = arith.constant 0 : index
    %1 = vector.load %arg2[%c0_1, %c0_2, %c0_3] : memref<2x64x64xf32, #tpu.memory_space<vmem>>, vector<2x64x64xf32>
    %c0_4 = arith.constant 0 : index
    %c0_5 = arith.constant 0 : index
    %2 = vector.load %arg3[%c0_4, %c0_5] : memref<64x68xf32, #tpu.memory_space<vmem>>, vector<64x68xf32>
    %c0_6 = arith.constant 0 : index
    %c0_7 = arith.constant 0 : index
    %3 = vector.load %arg4[%c0_6, %c0_7] : memref<64x68xf32, #tpu.memory_space<vmem>>, vector<64x68xf32>
    %c0_8 = arith.constant 0 : index
    %c0_9 = arith.constant 0 : index
    %4 = vector.load %arg5[%c0_8, %c0_9] : memref<64x64xf32, #tpu.memory_space<vmem>>, vector<64x64xf32>
    %5 = vector.shape_cast %2 : vector<64x68xf32> to vector<1x64x68xf32>
    %6 = vector.shape_cast %0 : vector<2x68xf32> to vector<2x1x68xf32>
    %7 = vector.broadcast %5 : vector<1x64x68xf32> to vector<2x64x68xf32>
    %8 = vector.broadcast %6 : vector<2x1x68xf32> to vector<2x64x68xf32>
    %9 = arith.mulf %7, %8 : vector<2x64x68xf32>
    %10 = vector.shape_cast %9 : vector<2x64x68xf32> to vector<128x68xf32>
    %cst = arith.constant dense<0.000000e+00> : vector<128x64xf32>
    %11 = tpu.matmul %10, %3, %cst {dimension_numbers = #tpu.dot_dimension_numbers<[1], [1], [0], [0], [0, 0, 1, 0], [], []>} : vector<128x68xf32>, vector<64x68xf32>, vector<128x64xf32> -> vector<128x64xf32>
    %12 = vector.shape_cast %11 : vector<128x64xf32> to vector<2x64x64xf32>
    %13 = vector.shape_cast %4 : vector<64x64xf32> to vector<1x64x64xf32>
    %14 = vector.broadcast %13 : vector<1x64x64xf32> to vector<2x64x64xf32>
    %15 = arith.addf %12, %14 : vector<2x64x64xf32>
    %16 = arith.negf %15 : vector<2x64x64xf32>
    %17 = math.exp %16 : vector<2x64x64xf32>
    %cst_10 = arith.constant 1.000000e+00 : f32
    %18 = vector.broadcast %cst_10 : f32 to vector<2x64x64xf32>
    %19 = arith.addf %18, %17 : vector<2x64x64xf32>
    %20 = arith.divf %18, %19 : vector<2x64x64xf32>
    %c0_11 = arith.constant 0 : index
    %c0_12 = arith.constant 0 : index
    %21 = vector.load %arg6[%c0_11, %c0_12] : memref<64x68xf32, #tpu.memory_space<vmem>>, vector<64x68xf32>
    %c0_13 = arith.constant 0 : index
    %c0_14 = arith.constant 0 : index
    %22 = vector.load %arg7[%c0_13, %c0_14] : memref<64x68xf32, #tpu.memory_space<vmem>>, vector<64x68xf32>
    %c0_15 = arith.constant 0 : index
    %c0_16 = arith.constant 0 : index
    %23 = vector.load %arg8[%c0_15, %c0_16] : memref<64x64xf32, #tpu.memory_space<vmem>>, vector<64x64xf32>
    %24 = vector.shape_cast %21 : vector<64x68xf32> to vector<1x64x68xf32>
    %25 = vector.shape_cast %0 : vector<2x68xf32> to vector<2x1x68xf32>
    %26 = vector.broadcast %24 : vector<1x64x68xf32> to vector<2x64x68xf32>
    %27 = vector.broadcast %25 : vector<2x1x68xf32> to vector<2x64x68xf32>
    %28 = arith.mulf %26, %27 : vector<2x64x68xf32>
    %29 = vector.shape_cast %28 : vector<2x64x68xf32> to vector<128x68xf32>
    %cst_17 = arith.constant dense<0.000000e+00> : vector<128x64xf32>
    %30 = tpu.matmul %29, %22, %cst_17 {dimension_numbers = #tpu.dot_dimension_numbers<[1], [1], [0], [0], [0, 0, 1, 0], [], []>} : vector<128x68xf32>, vector<64x68xf32>, vector<128x64xf32> -> vector<128x64xf32>
    %31 = vector.shape_cast %30 : vector<128x64xf32> to vector<2x64x64xf32>
    %32 = vector.shape_cast %23 : vector<64x64xf32> to vector<1x64x64xf32>
    %33 = vector.broadcast %32 : vector<1x64x64xf32> to vector<2x64x64xf32>
    %34 = arith.addf %31, %33 : vector<2x64x64xf32>
    %35 = arith.negf %34 : vector<2x64x64xf32>
    %36 = math.exp %35 : vector<2x64x64xf32>
    %cst_18 = arith.constant 1.000000e+00 : f32
    %37 = vector.broadcast %cst_18 : f32 to vector<2x64x64xf32>
    %38 = arith.addf %37, %36 : vector<2x64x64xf32>
    %39 = arith.divf %37, %38 : vector<2x64x64xf32>
    %c0_19 = arith.constant 0 : index
    %c0_20 = arith.constant 0 : index
    %40 = vector.load %arg9[%c0_19, %c0_20] : memref<64x68xf32, #tpu.memory_space<vmem>>, vector<64x68xf32>
    %c0_21 = arith.constant 0 : index
    %c0_22 = arith.constant 0 : index
    %41 = vector.load %arg10[%c0_21, %c0_22] : memref<64x68xf32, #tpu.memory_space<vmem>>, vector<64x68xf32>
    %c0_23 = arith.constant 0 : index
    %c0_24 = arith.constant 0 : index
    %42 = vector.load %arg11[%c0_23, %c0_24] : memref<64x64xf32, #tpu.memory_space<vmem>>, vector<64x64xf32>
    %43 = vector.shape_cast %40 : vector<64x68xf32> to vector<1x64x68xf32>
    %44 = vector.shape_cast %0 : vector<2x68xf32> to vector<2x1x68xf32>
    %45 = vector.broadcast %43 : vector<1x64x68xf32> to vector<2x64x68xf32>
    %46 = vector.broadcast %44 : vector<2x1x68xf32> to vector<2x64x68xf32>
    %47 = arith.mulf %45, %46 : vector<2x64x68xf32>
    %48 = vector.shape_cast %47 : vector<2x64x68xf32> to vector<128x68xf32>
    %cst_25 = arith.constant dense<0.000000e+00> : vector<128x64xf32>
    %49 = tpu.matmul %48, %41, %cst_25 {dimension_numbers = #tpu.dot_dimension_numbers<[1], [1], [0], [0], [0, 0, 1, 0], [], []>} : vector<128x68xf32>, vector<64x68xf32>, vector<128x64xf32> -> vector<128x64xf32>
    %50 = vector.shape_cast %49 : vector<128x64xf32> to vector<2x64x64xf32>
    %51 = vector.shape_cast %42 : vector<64x64xf32> to vector<1x64x64xf32>
    %52 = vector.broadcast %51 : vector<1x64x64xf32> to vector<2x64x64xf32>
    %53 = arith.addf %50, %52 : vector<2x64x64xf32>
    %54 = math.tanh %53 : vector<2x64x64xf32>
    %c0_26 = arith.constant 0 : index
    %c0_27 = arith.constant 0 : index
    %55 = vector.load %arg12[%c0_26, %c0_27] : memref<64x68xf32, #tpu.memory_space<vmem>>, vector<64x68xf32>
    %cst_28 = arith.constant dense<0.000000e+00> : vector<2x64xf32>
    %56 = tpu.matmul %0, %55, %cst_28 {dimension_numbers = #tpu.dot_dimension_numbers<[1], [1], [0], [0], [0, 0, 1, 0], [], []>} : vector<2x68xf32>, vector<64x68xf32>, vector<2x64xf32> -> vector<2x64xf32>
    %c0_29 = arith.constant 0 : index
    %c0_30 = arith.constant 0 : index
    %57 = vector.load %arg13[%c0_29, %c0_30] : memref<1x64xf32, #tpu.memory_space<vmem>>, vector<1x64xf32>
    %58 = vector.broadcast %57 : vector<1x64xf32> to vector<2x64xf32>
    %59 = arith.addf %56, %58 : vector<2x64xf32>
    %60 = arith.negf %59 : vector<2x64xf32>
    %61 = math.exp %60 : vector<2x64xf32>
    %cst_31 = arith.constant 1.000000e+00 : f32
    %62 = vector.broadcast %cst_31 : f32 to vector<2x64xf32>
    %63 = arith.addf %62, %61 : vector<2x64xf32>
    %64 = arith.divf %62, %63 : vector<2x64xf32>
    %65 = arith.mulf %39, %1 : vector<2x64x64xf32>
    %66 = arith.mulf %20, %54 : vector<2x64x64xf32>
    %67 = arith.addf %65, %66 : vector<2x64x64xf32>
    %68 = vector.shape_cast %67 : vector<2x64x64xf32> to vector<128x64xf32>
    %c0_32 = arith.constant 0 : index
    %c0_33 = arith.constant 0 : index
    %69 = vector.load %arg14[%c0_32, %c0_33] : memref<64x64xf32, #tpu.memory_space<vmem>>, vector<64x64xf32>
    %cst_34 = arith.constant dense<0.000000e+00> : vector<128x64xf32>
    %70 = tpu.matmul %68, %69, %cst_34 {dimension_numbers = #tpu.dot_dimension_numbers<[1], [0], [0], [1], [0, 0, 1, 1], [], []>} : vector<128x64xf32>, vector<64x64xf32>, vector<128x64xf32> -> vector<128x64xf32>
    %71 = vector.shape_cast %70 : vector<128x64xf32> to vector<2x64x64xf32>
    %c0_35 = arith.constant 0 : index
    %c0_36 = arith.constant 0 : index
    %72 = vector.load %arg15[%c0_35, %c0_36] : memref<64x64xf32, #tpu.memory_space<vmem>>, vector<64x64xf32>
    %73 = vector.shape_cast %72 : vector<64x64xf32> to vector<1x64x64xf32>
    %74 = vector.broadcast %73 : vector<1x64x64xf32> to vector<2x64x64xf32>
    %75 = arith.mulf %71, %74 : vector<2x64x64xf32>
    %cst_37 = arith.constant dense<0.000000e+00> : vector<2x64xf32>
    %76 = vector.multi_reduction <add>, %75, %cst_37 [1] : vector<2x64x64xf32> to vector<2x64xf32>
    %77 = arith.negf %76 : vector<2x64xf32>
    %78 = math.exp %77 : vector<2x64xf32>
    %cst_38 = arith.constant 1.000000e+00 : f32
    %79 = vector.broadcast %cst_38 : f32 to vector<2x64xf32>
    %80 = arith.addf %79, %78 : vector<2x64xf32>
    %81 = arith.divf %79, %80 : vector<2x64xf32>
    %82 = arith.mulf %64, %81 : vector<2x64xf32>
    %c0_39 = arith.constant 0 : index
    %c0_40 = arith.constant 0 : index
    %83 = vector.load %arg16[%c0_39, %c0_40] : memref<2x64xf32, #tpu.memory_space<vmem>>, vector<2x64xf32>
    tpu.vector_store %arg16[%c0_39, %c0_40], %82 {strides = array<i32>} : memref<2x64xf32, #tpu.memory_space<vmem>>, vector<2x64xf32>,
    %c0_41 = arith.constant 0 : index
    %c0_42 = arith.constant 0 : index
    %c0_43 = arith.constant 0 : index
    %84 = vector.load %arg17[%c0_41, %c0_42, %c0_43] : memref<2x64x64xf32, #tpu.memory_space<vmem>>, vector<2x64x64xf32>
    tpu.vector_store %arg17[%c0_41, %c0_42, %c0_43], %67 {strides = array<i32>} : memref<2x64x64xf32, #tpu.memory_space<vmem>>, vector<2x64x64xf32>,
    return
  }
  func.func @transform_0(%arg0: i32) -> (i32, i32) {
    %c0_i32 = arith.constant 0 : i32
    %c0_i32_0 = arith.constant 0 : i32
    return %arg0, %c0_i32 : i32, i32
  }
  func.func @transform_1(%arg0: i32) -> (i32, i32, i32) {
    %c0_i32 = arith.constant 0 : i32
    %c0_i32_0 = arith.constant 0 : i32
    %c0_i32_1 = arith.constant 0 : i32
    return %arg0, %c0_i32, %c0_i32_0 : i32, i32, i32
  }
  func.func @transform_2(%arg0: i32) -> (i32, i32) {
    %c0_i32 = arith.constant 0 : i32
    %c0_i32_0 = arith.constant 0 : i32
    %c0_i32_1 = arith.constant 0 : i32
    return %c0_i32, %c0_i32_0 : i32, i32
  }
  func.func @transform_3(%arg0: i32) -> (i32, i32) {
    %c0_i32 = arith.constant 0 : i32
    %c0_i32_0 = arith.constant 0 : i32
    %c0_i32_1 = arith.constant 0 : i32
    return %c0_i32, %c0_i32_0 : i32, i32
  }
  func.func @transform_4(%arg0: i32) -> (i32, i32) {
    %c0_i32 = arith.constant 0 : i32
    %c0_i32_0 = arith.constant 0 : i32
    %c0_i32_1 = arith.constant 0 : i32
    return %c0_i32, %c0_i32_0 : i32, i32
  }
  func.func @transform_5(%arg0: i32) -> (i32, i32) {
    %c0_i32 = arith.constant 0 : i32
    %c0_i32_0 = arith.constant 0 : i32
    %c0_i32_1 = arith.constant 0 : i32
    return %c0_i32, %c0_i32_0 : i32, i32
  }
  func.func @transform_6(%arg0: i32) -> (i32, i32) {
    %c0_i32 = arith.constant 0 : i32
    %c0_i32_0 = arith.constant 0 : i32
    %c0_i32_1 = arith.constant 0 : i32
    return %c0_i32, %c0_i32_0 : i32, i32
  }
  func.func @transform_7(%arg0: i32) -> (i32, i32) {
    %c0_i32 = arith.constant 0 : i32
    %c0_i32_0 = arith.constant 0 : i32
    %c0_i32_1 = arith.constant 0 : i32
    return %c0_i32, %c0_i32_0 : i32, i32
  }
  func.func @transform_8(%arg0: i32) -> (i32, i32) {
    %c0_i32 = arith.constant 0 : i32
    %c0_i32_0 = arith.constant 0 : i32
    %c0_i32_1 = arith.constant 0 : i32
    return %c0_i32, %c0_i32_0 : i32, i32
  }
  func.func @transform_9(%arg0: i32) -> (i32, i32) {
    %c0_i32 = arith.constant 0 : i32
    %c0_i32_0 = arith.constant 0 : i32
    %c0_i32_1 = arith.constant 0 : i32
    return %c0_i32, %c0_i32_0 : i32, i32
  }
  func.func @transform_10(%arg0: i32) -> (i32, i32) {
    %c0_i32 = arith.constant 0 : i32
    %c0_i32_0 = arith.constant 0 : i32
    %c0_i32_1 = arith.constant 0 : i32
    return %c0_i32, %c0_i32_0 : i32, i32
  }
  func.func @transform_11(%arg0: i32) -> (i32, i32) {
    %c0_i32 = arith.constant 0 : i32
    %c0_i32_0 = arith.constant 0 : i32
    %c0_i32_1 = arith.constant 0 : i32
    return %c0_i32, %c0_i32_0 : i32, i32
  }
  func.func @transform_12(%arg0: i32) -> (i32, i32) {
    %c0_i32 = arith.constant 0 : i32
    %c0_i32_0 = arith.constant 0 : i32
    %c0_i32_1 = arith.constant 0 : i32
    return %c0_i32, %c0_i32_0 : i32, i32
  }
  func.func @transform_13(%arg0: i32) -> (i32, i32) {
    %c0_i32 = arith.constant 0 : i32
    %c0_i32_0 = arith.constant 0 : i32
    %c0_i32_1 = arith.constant 0 : i32
    return %c0_i32, %c0_i32_0 : i32, i32
  }
  func.func @transform_14(%arg0: i32) -> (i32, i32) {
    %c0_i32 = arith.constant 0 : i32
    %c0_i32_0 = arith.constant 0 : i32
    %c0_i32_1 = arith.constant 0 : i32
    return %c0_i32, %c0_i32_0 : i32, i32
  }
  func.func @transform_15(%arg0: i32) -> (i32, i32) {
    %c0_i32 = arith.constant 0 : i32
    %c0_i32_0 = arith.constant 0 : i32
    return %arg0, %c0_i32 : i32, i32
  }
  func.func @transform_16(%arg0: i32) -> (i32, i32, i32) {
    %c0_i32 = arith.constant 0 : i32
    %c0_i32_0 = arith.constant 0 : i32
    %c0_i32_1 = arith.constant 0 : i32
    return %arg0, %c0_i32, %c0_i32_0 : i32, i32, i32
  }
}

module attributes {stable_mosaic.version = 11 : i64} {
  func.func @spectral_lstm_kernel(%arg0: i32, %arg1: memref<2x68xf32, #tpu.memory_space<vmem>>, %arg2: memref<2x64x64xf32, #tpu.memory_space<vmem>>, %arg3: memref<64x68xf32, #tpu.memory_space<vmem>>, %arg4: memref<64x68xf32, #tpu.memory_space<vmem>>, %arg5: memref<64x64xf32, #tpu.memory_space<vmem>>, %arg6: memref<64x68xf32, #tpu.memory_space<vmem>>, %arg7: memref<64x68xf32, #tpu.memory_space<vmem>>, %arg8: memref<64x64xf32, #tpu.memory_space<vmem>>, %arg9: memref<64x68xf32, #tpu.memory_space<vmem>>, %arg10: memref<64x68xf32, #tpu.memory_space<vmem>>, %arg11: memref<64x64xf32, #tpu.memory_space<vmem>>, %arg12: memref<64x68xf32, #tpu.memory_space<vmem>>, %arg13: memref<1x64xf32, #tpu.memory_space<vmem>>, %arg14: memref<64x64xf32, #tpu.memory_space<vmem>>, %arg15: memref<64x64xf32, #tpu.memory_space<vmem>>, %arg16: memref<2x64xf32, #tpu.memory_space<vmem>>, %arg17: memref<2x64x64xf32, #tpu.memory_space<vmem>>) attributes {dimension_semantics = [#tpu.dimension_semantics<parallel>], iteration_bounds = array<i64: 1>, scalar_prefetch = 0 : i64, scratch_operands = 0 : i64, tpu.core_type = #tpu.core_type<tc>, window_params = [{transform_indices = @transform_0, window_bounds = array<i64: 2, 68>}, {transform_indices = @transform_1, window_bounds = array<i64: 2, 64, 64>}, {pipeline_mode = #tpu.pipeline_mode<synchronous>, transform_indices = @transform_2, window_bounds = array<i64: 64, 68>}, {pipeline_mode = #tpu.pipeline_mode<synchronous>, transform_indices = @transform_3, window_bounds = array<i64: 64, 68>}, {pipeline_mode = #tpu.pipeline_mode<synchronous>, transform_indices = @transform_4, window_bounds = array<i64: 64, 64>}, {pipeline_mode = #tpu.pipeline_mode<synchronous>, transform_indices = @transform_5, window_bounds = array<i64: 64, 68>}, {pipeline_mode = #tpu.pipeline_mode<synchronous>, transform_indices = @transform_6, window_bounds = array<i64: 64, 68>}, {pipeline_mode = #tpu.pipeline_mode<synchronous>, transform_indices = @transform_7, window_bounds = array<i64: 64, 64>}, {pipeline_mode = #tpu.pipeline_mode<synchronous>, transform_indices = @transform_8, window_bounds = array<i64: 64, 68>}, {pipeline_mode = #tpu.pipeline_mode<synchronous>, transform_indices = @transform_9, window_bounds = array<i64: 64, 68>}, {pipeline_mode = #tpu.pipeline_mode<synchronous>, transform_indices = @transform_10, window_bounds = array<i64: 64, 64>}, {pipeline_mode = #tpu.pipeline_mode<synchronous>, transform_indices = @transform_11, window_bounds = array<i64: 64, 68>}, {pipeline_mode = #tpu.pipeline_mode<synchronous>, transform_indices = @transform_12, window_bounds = array<i64: 1, 64>}, {pipeline_mode = #tpu.pipeline_mode<synchronous>, transform_indices = @transform_13, window_bounds = array<i64: 64, 64>}, {pipeline_mode = #tpu.pipeline_mode<synchronous>, transform_indices = @transform_14, window_bounds = array<i64: 64, 64>}, {transform_indices = @transform_15, window_bounds = array<i64: 2, 64>}, {transform_indices = @transform_16, window_bounds = array<i64: 2, 64, 64>}]} {
    %c0 = arith.constant 0 : index
    %c0_0 = arith.constant 0 : index
    %0 = vector.load %arg1[%c0, %c0_0] : memref<2x68xf32, #tpu.memory_space<vmem>>, vector<2x68xf32>
    %c0_1 = arith.constant 0 : index
    %c0_2 = arith.constant 0 : index
    %c0_3 = arith.constant 0 : index
    %1 = vector.load %arg2[%c0_1, %c0_2, %c0_3] : memref<2x64x64xf32, #tpu.memory_space<vmem>>, vector<2x64x64xf32>
    %c0_4 = arith.constant 0 : index
    %c0_5 = arith.constant 0 : index
    %2 = vector.load %arg3[%c0_4, %c0_5] : memref<64x68xf32, #tpu.memory_space<vmem>>, vector<64x68xf32>
    %c0_6 = arith.constant 0 : index
    %c0_7 = arith.constant 0 : index
    %3 = vector.load %arg4[%c0_6, %c0_7] : memref<64x68xf32, #tpu.memory_space<vmem>>, vector<64x68xf32>
    %c0_8 = arith.constant 0 : index
    %c0_9 = arith.constant 0 : index
    %4 = vector.load %arg5[%c0_8, %c0_9] : memref<64x64xf32, #tpu.memory_space<vmem>>, vector<64x64xf32>
    %5 = vector.shape_cast %2 : vector<64x68xf32> to vector<1x64x68xf32>
    %6 = vector.shape_cast %0 : vector<2x68xf32> to vector<2x1x68xf32>
    %7 = vector.broadcast %5 : vector<1x64x68xf32> to vector<2x64x68xf32>
    %8 = vector.broadcast %6 : vector<2x1x68xf32> to vector<2x64x68xf32>
    %9 = arith.mulf %7, %8 : vector<2x64x68xf32>
    %10 = vector.shape_cast %9 : vector<2x64x68xf32> to vector<128x68xf32>
    %cst = arith.constant dense<0.000000e+00> : vector<128x64xf32>
    %11 = tpu.matmul %10, %3, %cst {dimension_numbers = #tpu.dot_dimension_numbers<[1], [1], [0], [0], [0, 0, 1, 0], [], []>} : vector<128x68xf32>, vector<64x68xf32>, vector<128x64xf32> -> vector<128x64xf32>
    %12 = vector.shape_cast %11 : vector<128x64xf32> to vector<2x64x64xf32>
    %13 = vector.shape_cast %4 : vector<64x64xf32> to vector<1x64x64xf32>
    %14 = vector.broadcast %13 : vector<1x64x64xf32> to vector<2x64x64xf32>
    %15 = arith.addf %12, %14 : vector<2x64x64xf32>
    %16 = arith.negf %15 : vector<2x64x64xf32>
    %17 = math.exp %16 : vector<2x64x64xf32>
    %cst_10 = arith.constant 1.000000e+00 : f32
    %18 = vector.broadcast %cst_10 : f32 to vector<2x64x64xf32>
    %19 = arith.addf %18, %17 : vector<2x64x64xf32>
    %20 = arith.divf %18, %19 : vector<2x64x64xf32>
    %c0_11 = arith.constant 0 : index
    %c0_12 = arith.constant 0 : index
    %21 = vector.load %arg6[%c0_11, %c0_12] : memref<64x68xf32, #tpu.memory_space<vmem>>, vector<64x68xf32>
    %c0_13 = arith.constant 0 : index
    %c0_14 = arith.constant 0 : index
    %22 = vector.load %arg7[%c0_13, %c0_14] : memref<64x68xf32, #tpu.memory_space<vmem>>, vector<64x68xf32>
    %c0_15 = arith.constant 0 : index
    %c0_16 = arith.constant 0 : index
    %23 = vector.load %arg8[%c0_15, %c0_16] : memref<64x64xf32, #tpu.memory_space<vmem>>, vector<64x64xf32>
    %24 = vector.shape_cast %21 : vector<64x68xf32> to vector<1x64x68xf32>
    %25 = vector.shape_cast %0 : vector<2x68xf32> to vector<2x1x68xf32>
    %26 = vector.broadcast %24 : vector<1x64x68xf32> to vector<2x64x68xf32>
    %27 = vector.broadcast %25 : vector<2x1x68xf32> to vector<2x64x68xf32>
    %28 = arith.mulf %26, %27 : vector<2x64x68xf32>
    %29 = vector.shape_cast %28 : vector<2x64x68xf32> to vector<128x68xf32>
    %cst_17 = arith.constant dense<0.000000e+00> : vector<128x64xf32>
    %30 = tpu.matmul %29, %22, %cst_17 {dimension_numbers = #tpu.dot_dimension_numbers<[1], [1], [0], [0], [0, 0, 1, 0], [], []>} : vector<128x68xf32>, vector<64x68xf32>, vector<128x64xf32> -> vector<128x64xf32>
    %31 = vector.shape_cast %30 : vector<128x64xf32> to vector<2x64x64xf32>
    %32 = vector.shape_cast %23 : vector<64x64xf32> to vector<1x64x64xf32>
    %33 = vector.broadcast %32 : vector<1x64x64xf32> to vector<2x64x64xf32>
    %34 = arith.addf %31, %33 : vector<2x64x64xf32>
    %35 = arith.negf %34 : vector<2x64x64xf32>
    %36 = math.exp %35 : vector<2x64x64xf32>
    %cst_18 = arith.constant 1.000000e+00 : f32
    %37 = vector.broadcast %cst_18 : f32 to vector<2x64x64xf32>
    %38 = arith.addf %37, %36 : vector<2x64x64xf32>
    %39 = arith.divf %37, %38 : vector<2x64x64xf32>
    %c0_19 = arith.constant 0 : index
    %c0_20 = arith.constant 0 : index
    %40 = vector.load %arg9[%c0_19, %c0_20] : memref<64x68xf32, #tpu.memory_space<vmem>>, vector<64x68xf32>
    %c0_21 = arith.constant 0 : index
    %c0_22 = arith.constant 0 : index
    %41 = vector.load %arg10[%c0_21, %c0_22] : memref<64x68xf32, #tpu.memory_space<vmem>>, vector<64x68xf32>
    %c0_23 = arith.constant 0 : index
    %c0_24 = arith.constant 0 : index
    %42 = vector.load %arg11[%c0_23, %c0_24] : memref<64x64xf32, #tpu.memory_space<vmem>>, vector<64x64xf32>
    %43 = vector.shape_cast %40 : vector<64x68xf32> to vector<1x64x68xf32>
    %44 = vector.shape_cast %0 : vector<2x68xf32> to vector<2x1x68xf32>
    %45 = vector.broadcast %43 : vector<1x64x68xf32> to vector<2x64x68xf32>
    %46 = vector.broadcast %44 : vector<2x1x68xf32> to vector<2x64x68xf32>
    %47 = arith.mulf %45, %46 : vector<2x64x68xf32>
    %48 = vector.shape_cast %47 : vector<2x64x68xf32> to vector<128x68xf32>
    %cst_25 = arith.constant dense<0.000000e+00> : vector<128x64xf32>
    %49 = tpu.matmul %48, %41, %cst_25 {dimension_numbers = #tpu.dot_dimension_numbers<[1], [1], [0], [0], [0, 0, 1, 0], [], []>} : vector<128x68xf32>, vector<64x68xf32>, vector<128x64xf32> -> vector<128x64xf32>
    %50 = vector.shape_cast %49 : vector<128x64xf32> to vector<2x64x64xf32>
    %51 = vector.shape_cast %42 : vector<64x64xf32> to vector<1x64x64xf32>
    %52 = vector.broadcast %51 : vector<1x64x64xf32> to vector<2x64x64xf32>
    %53 = arith.addf %50, %52 : vector<2x64x64xf32>
    %54 = math.tanh %53 : vector<2x64x64xf32>
    %c0_26 = arith.constant 0 : index
    %c0_27 = arith.constant 0 : index
    %55 = vector.load %arg12[%c0_26, %c0_27] : memref<64x68xf32, #tpu.memory_space<vmem>>, vector<64x68xf32>
    %cst_28 = arith.constant dense<0.000000e+00> : vector<2x64xf32>
    %56 = tpu.matmul %0, %55, %cst_28 {dimension_numbers = #tpu.dot_dimension_numbers<[1], [1], [0], [0], [0, 0, 1, 0], [], []>} : vector<2x68xf32>, vector<64x68xf32>, vector<2x64xf32> -> vector<2x64xf32>
    %c0_29 = arith.constant 0 : index
    %c0_30 = arith.constant 0 : index
    %57 = vector.load %arg13[%c0_29, %c0_30] : memref<1x64xf32, #tpu.memory_space<vmem>>, vector<1x64xf32>
    %58 = vector.broadcast %57 : vector<1x64xf32> to vector<2x64xf32>
    %59 = arith.addf %56, %58 : vector<2x64xf32>
    %60 = arith.negf %59 : vector<2x64xf32>
    %61 = math.exp %60 : vector<2x64xf32>
    %cst_31 = arith.constant 1.000000e+00 : f32
    %62 = vector.broadcast %cst_31 : f32 to vector<2x64xf32>
    %63 = arith.addf %62, %61 : vector<2x64xf32>
    %64 = arith.divf %62, %63 : vector<2x64xf32>
    %65 = arith.mulf %39, %1 : vector<2x64x64xf32>
    %66 = arith.mulf %20, %54 : vector<2x64x64xf32>
    %67 = arith.addf %65, %66 : vector<2x64x64xf32>
    %68 = vector.shape_cast %67 : vector<2x64x64xf32> to vector<128x64xf32>
    %c0_32 = arith.constant 0 : index
    %c0_33 = arith.constant 0 : index
    %69 = vector.load %arg14[%c0_32, %c0_33] : memref<64x64xf32, #tpu.memory_space<vmem>>, vector<64x64xf32>
    %cst_34 = arith.constant dense<0.000000e+00> : vector<128x64xf32>
    %70 = tpu.matmul %68, %69, %cst_34 {dimension_numbers = #tpu.dot_dimension_numbers<[1], [0], [0], [1], [0, 0, 1, 1], [], []>} : vector<128x64xf32>, vector<64x64xf32>, vector<128x64xf32> -> vector<128x64xf32>
    %71 = vector.shape_cast %70 : vector<128x64xf32> to vector<2x64x64xf32>
    %c0_35 = arith.constant 0 : index
    %c0_36 = arith.constant 0 : index
    %72 = vector.load %arg15[%c0_35, %c0_36] : memref<64x64xf32, #tpu.memory_space<vmem>>, vector<64x64xf32>
    %73 = vector.shape_cast %72 : vector<64x64xf32> to vector<1x64x64xf32>
    %74 = vector.broadcast %73 : vector<1x64x64xf32> to vector<2x64x64xf32>
    %75 = arith.mulf %71, %74 : vector<2x64x64xf32>
    %cst_37 = arith.constant dense<0.000000e+00> : vector<2x64xf32>
    %76 = vector.multi_reduction <add>, %75, %cst_37 [1] : vector<2x64x64xf32> to vector<2x64xf32>
    %77 = arith.negf %76 : vector<2x64xf32>
    %78 = math.exp %77 : vector<2x64xf32>
    %cst_38 = arith.constant 1.000000e+00 : f32
    %79 = vector.broadcast %cst_38 : f32 to vector<2x64xf32>
    %80 = arith.addf %79, %78 : vector<2x64xf32>
    %81 = arith.divf %79, %80 : vector<2x64xf32>
    %82 = arith.mulf %64, %81 : vector<2x64xf32>
    %c0_39 = arith.constant 0 : index
    %c0_40 = arith.constant 0 : index
    %83 = vector.load %arg16[%c0_39, %c0_40] : memref<2x64xf32, #tpu.memory_space<vmem>>, vector<2x64xf32>
    tpu.vector_store %arg16[%c0_39, %c0_40], %82 {strides = array<i32>} : memref<2x64xf32, #tpu.memory_space<vmem>>, vector<2x64xf32>,
    %c0_41 = arith.constant 0 : index
    %c0_42 = arith.constant 0 : index
    %c0_43 = arith.constant 0 : index
    %84 = vector.load %arg17[%c0_41, %c0_42, %c0_43] : memref<2x64x64xf32, #tpu.memory_space<vmem>>, vector<2x64x64xf32>
    tpu.vector_store %arg17[%c0_41, %c0_42, %c0_43], %67 {strides = array<i32>} : memref<2x64x64xf32, #tpu.memory_space<vmem>>, vector<2x64x64xf32>,
    return
  }
  func.func @transform_0(%arg0: i32) -> (i32, i32) {
    %c0_i32 = arith.constant 0 : i32
    %c0_i32_0 = arith.constant 0 : i32
    return %arg0, %c0_i32 : i32, i32
  }
  func.func @transform_1(%arg0: i32) -> (i32, i32, i32) {
    %c0_i32 = arith.constant 0 : i32
    %c0_i32_0 = arith.constant 0 : i32
    %c0_i32_1 = arith.constant 0 : i32
    return %arg0, %c0_i32, %c0_i32_0 : i32, i32, i32
  }
  func.func @transform_2(%arg0: i32) -> (i32, i32) {
    %c0_i32 = arith.constant 0 : i32
    %c0_i32_0 = arith.constant 0 : i32
    %c0_i32_1 = arith.constant 0 : i32
    return %c0_i32, %c0_i32_0 : i32, i32
  }
  func.func @transform_3(%arg0: i32) -> (i32, i32) {
    %c0_i32 = arith.constant 0 : i32
    %c0_i32_0 = arith.constant 0 : i32
    %c0_i32_1 = arith.constant 0 : i32
    return %c0_i32, %c0_i32_0 : i32, i32
  }
  func.func @transform_4(%arg0: i32) -> (i32, i32) {
    %c0_i32 = arith.constant 0 : i32
    %c0_i32_0 = arith.constant 0 : i32
    %c0_i32_1 = arith.constant 0 : i32
    return %c0_i32, %c0_i32_0 : i32, i32
  }
  func.func @transform_5(%arg0: i32) -> (i32, i32) {
    %c0_i32 = arith.constant 0 : i32
    %c0_i32_0 = arith.constant 0 : i32
    %c0_i32_1 = arith.constant 0 : i32
    return %c0_i32, %c0_i32_0 : i32, i32
  }
  func.func @transform_6(%arg0: i32) -> (i32, i32) {
    %c0_i32 = arith.constant 0 : i32
    %c0_i32_0 = arith.constant 0 : i32
    %c0_i32_1 = arith.constant 0 : i32
    return %c0_i32, %c0_i32_0 : i32, i32
  }
  func.func @transform_7(%arg0: i32) -> (i32, i32) {
    %c0_i32 = arith.constant 0 : i32
    %c0_i32_0 = arith.constant 0 : i32
    %c0_i32_1 = arith.constant 0 : i32
    return %c0_i32, %c0_i32_0 : i32, i32
  }
  func.func @transform_8(%arg0: i32) -> (i32, i32) {
    %c0_i32 = arith.constant 0 : i32
    %c0_i32_0 = arith.constant 0 : i32
    %c0_i32_1 = arith.constant 0 : i32
    return %c0_i32, %c0_i32_0 : i32, i32
  }
  func.func @transform_9(%arg0: i32) -> (i32, i32) {
    %c0_i32 = arith.constant 0 : i32
    %c0_i32_0 = arith.constant 0 : i32
    %c0_i32_1 = arith.constant 0 : i32
    return %c0_i32, %c0_i32_0 : i32, i32
  }
  func.func @transform_10(%arg0: i32) -> (i32, i32) {
    %c0_i32 = arith.constant 0 : i32
    %c0_i32_0 = arith.constant 0 : i32
    %c0_i32_1 = arith.constant 0 : i32
    return %c0_i32, %c0_i32_0 : i32, i32
  }
  func.func @transform_11(%arg0: i32) -> (i32, i32) {
    %c0_i32 = arith.constant 0 : i32
    %c0_i32_0 = arith.constant 0 : i32
    %c0_i32_1 = arith.constant 0 : i32
    return %c0_i32, %c0_i32_0 : i32, i32
  }
  func.func @transform_12(%arg0: i32) -> (i32, i32) {
    %c0_i32 = arith.constant 0 : i32
    %c0_i32_0 = arith.constant 0 : i32
    %c0_i32_1 = arith.constant 0 : i32
    return %c0_i32, %c0_i32_0 : i32, i32
  }
  func.func @transform_13(%arg0: i32) -> (i32, i32) {
    %c0_i32 = arith.constant 0 : i32
    %c0_i32_0 = arith.constant 0 : i32
    %c0_i32_1 = arith.constant 0 : i32
    return %c0_i32, %c0_i32_0 : i32, i32
  }
  func.func @transform_14(%arg0: i32) -> (i32, i32) {
    %c0_i32 = arith.constant 0 : i32
    %c0_i32_0 = arith.constant 0 : i32
    %c0_i32_1 = arith.constant 0 : i32
    return %c0_i32, %c0_i32_0 : i32, i32
  }
  func.func @transform_15(%arg0: i32) -> (i32, i32) {
    %c0_i32 = arith.constant 0 : i32
    %c0_i32_0 = arith.constant 0 : i32
    return %arg0, %c0_i32 : i32, i32
  }
  func.func @transform_16(%arg0: i32) -> (i32, i32, i32) {
    %c0_i32 = arith.constant 0 : i32
    %c0_i32_0 = arith.constant 0 : i32
    %c0_i32_1 = arith.constant 0 : i32
    return %arg0, %c0_i32, %c0_i32_0 : i32, i32, i32
  }
}

</mosaic_0001>

<bundles_post_ra>
// kernel: tpu_custom_call.1
= control target key start
LH: loop header
LB: loop body
LE: loop exit
PB: predicated region body
PF: predicated region fallthrough
CT: control target
= control target key end

     0   :  { %s3424_s0 = inlined_call_operand.hbm [shape: f32[2,68], index: 0, kind: input, shape index: {}]   ;;  %s3425_s1 = inlined_call_operand.hbm [shape: f32[2,64,64], index: 1, kind: input, shape index: {}]   ;;  %s3426_s2 = inlined_call_operand.hbm [shape: f32[64,68], index: 2, kind: input, shape index: {}]   ;;  %s3427_s3 = inlined_call_operand.hbm [shape: f32[64,68], index: 3, kind: input, shape index: {}]   ;;  %s3428_s4 = inlined_call_operand.hbm [shape: f32[64,64], index: 4, kind: input, shape index: {}]   ;;  %s3429_s5 = inlined_call_operand.hbm [shape: f32[64,68], index: 5, kind: input, shape index: {}]   ;;  %s3430_s6 = inlined_call_operand.hbm [shape: f32[64,68], index: 6, kind: input, shape index: {}]   ;;  %s3431_s7 = inlined_call_operand.hbm [shape: f32[64,64], index: 7, kind: input, shape index: {}]   ;;  %s3432_s8 = inlined_call_operand.hbm [shape: f32[64,68], index: 8, kind: input, shape index: {}]   ;;  %s3433_s9 = inlined_call_operand.hbm [shape: f32[64,68], index: 9, kind: input, shape index: {}]   ;;  %s3434_s10 = inlined_call_operand.hbm [shape: f32[64,64], index: 10, kind: input, shape index: {}]   ;;  %s3435_s11 = inlined_call_operand.hbm [shape: f32[64,68], index: 11, kind: input, shape index: {}]   ;;  %s3436_s12 = inlined_call_operand.vmem [shape: f32[1,64], index: 12, kind: input, shape index: {}]   ;;  %s3437_s13 = inlined_call_operand.hbm [shape: f32[64,64], index: 13, kind: input, shape index: {}]   ;;  %s3438_s14 = inlined_call_operand.hbm [shape: f32[64,64], index: 14, kind: input, shape index: {}]   ;;  %s3439_s15 = inlined_call_operand.hbm [shape: f32[2,64], index: 15, kind: output, shape index: {0}]   ;;  %s3440_s16 = inlined_call_operand.hbm [shape: f32[2,64,64], index: 16, kind: output, shape index: {1}]  }
   0x1   :  { %3441 = sst [smem:[#allocation38_spill]] %s3424_s0 }
   0x2   :  { %22 = vsyncpa [#allocation3], 0 }
   0x3   :  { %23 = vsyncpa [#allocation6], 0 }
   0x4   :  { %24 = vsyncpa [#allocation9], 0 }
   0x5   :  { %25 = vsyncpa [#allocation12], 0 }
   0x6   :  { %26 = vsyncpa [#allocation15], 0 }
   0x7   :  { %27 = vsyncpa [#allocation18], 0 }
   0x8   :  { %28 = vsyncpa [#allocation21], 0 }
   0x9   :  { %29 = vsyncpa [#allocation24], 0 }
   0xa   :  { %30 = vsyncpa [#allocation4], 0 }
   0xb   :  { %31 = vsyncpa [#allocation27], 0  ;;  %s2777_s21 = smov [#allocation5]  }
   0xc   :  { %s47_s22 = sshll.u32 %s2777_s21, 4  ;;  %s48_s22 = int_to_ptr.vmem [resolvable:$true] %s47_s22 }
   0xd   :  { %s2445_s23 = scalar_lea.vmem %s48_s22, 2048  ;;  %p2450_p1 = scmp.lt.s32.totalorder %s48_s22, %s48_s22 }
   0xe   :  { %p2446_p0 = scmp.ne.s32.totalorder %s48_s22, %s2445_s23  ;;  %p2451_p2 = scmp.lt.s32.totalorder %s2445_s23, %s2445_s23 }
  0x10   :  { %p2452_p3 = por %p2451_p2, %p2450_p1 }
  0x12   :  { %p2453_p4 = pnand %p2452_p3, %p2446_p0 }
  0x14   :  { %2456 = shalt.err (!%p2453_p4)
}
  0x15   :  { %s2778_s24 = smov 128   ;;  %s2779_s25 = smov 8  }
  0x16   :  { %53 = dma.hbm_to_vmem [thread:$0]  %s3425_s1, 2048, %s48_s22, [#allocation6], %s2778_s24, %s2778_s24, %s2779_s25  }
  0x17   :  { %s2780_s28 = smov [#allocation8]   ;;  %s2781_s30 = smov [#allocation11]  }
  0x18   :  { %s71_s29 = sshll.u32 %s2780_s28, 4  ;;  %s95_s0 = sshll.u32 %s2781_s30, 4  ;;  %s72_s29 = int_to_ptr.vmem [resolvable:$true] %s71_s29  ;;  %s96_s0 = int_to_ptr.vmem [resolvable:$true] %s95_s0 }
  0x19   :  { %s2465_s17 = scalar_lea.vmem %s72_s29, 1024  ;;  %p2470_p6 = scmp.lt.s32.totalorder %s72_s29, %s72_s29 }
  0x1a   :  { %p2466_p5 = scmp.ne.s32.totalorder %s72_s29, %s2465_s17  ;;  %p2471_p7 = scmp.lt.s32.totalorder %s2465_s17, %s2465_s17 }
  0x1c   :  { %p2472_p8 = por %p2471_p7, %p2470_p6 }
  0x1e   :  { %p2473_p9 = pnand %p2472_p8, %p2466_p5 }
  0x20   :  { %2476 = shalt.err (!%p2473_p9)
}
  0x21   :  { %77 = dma.hbm_to_vmem [thread:$0]  %s3427_s3, 1024, %s72_s29, [#allocation9], %s2778_s24, %s2778_s24, %s2779_s25  }
  0x22   :  { %s2485_s1 = scalar_lea.vmem %s96_s0, 1024  ;;  %p2490_p11 = scmp.lt.s32.totalorder %s96_s0, %s96_s0 }
  0x23   :  { %p2486_p10 = scmp.ne.s32.totalorder %s96_s0, %s2485_s1  ;;  %p2491_p12 = scmp.lt.s32.totalorder %s2485_s1, %s2485_s1 }
  0x25   :  { %p2492_p13 = por %p2491_p12, %p2490_p11 }
  0x27   :  { %p2493_p0 = pnand %p2492_p13, %p2486_p10 }
  0x29   :  { %2496 = shalt.err (!%p2493_p0)
}
  0x2a   :  { %101 = dma.hbm_to_vmem [thread:$0]  %s3429_s5, 1024, %s96_s0, [#allocation12], %s2778_s24, %s2778_s24, %s2779_s25  }
  0x2b   :  { %s2782_s22 = smov [#allocation14]   ;;  %s2783_s26 = smov [#allocation17]  }
  0x2c   :  { %s119_s23 = sshll.u32 %s2782_s22, 4  ;;  %s143_s3 = sshll.u32 %s2783_s26, 4  ;;  %s120_s23 = int_to_ptr.vmem [resolvable:$true] %s119_s23  ;;  %s144_s3 = int_to_ptr.vmem [resolvable:$true] %s143_s3 }
  0x2d   :  { %s2505_s27 = scalar_lea.vmem %s120_s23, 1024  ;;  %p2510_p2 = scmp.lt.s32.totalorder %s120_s23, %s120_s23 }
  0x2e   :  { %p2506_p1 = scmp.ne.s32.totalorder %s120_s23, %s2505_s27  ;;  %p2511_p3 = scmp.lt.s32.totalorder %s2505_s27, %s2505_s27 }
  0x30   :  { %p2512_p4 = por %p2511_p3, %p2510_p2 }
  0x32   :  { %p2513_p5 = pnand %p2512_p4, %p2506_p1 }
  0x34   :  { %2516 = shalt.err (!%p2513_p5)
}
  0x35   :  { %125 = dma.hbm_to_vmem [thread:$0]  %s3431_s7, 1024, %s120_s23, [#allocation15], %s2778_s24, %s2778_s24, %s2779_s25  }
  0x36   :  { %s2525_s5 = scalar_lea.vmem %s144_s3, 1024  ;;  %p2530_p7 = scmp.lt.s32.totalorder %s144_s3, %s144_s3 }
  0x37   :  { %p2526_p6 = scmp.ne.s32.totalorder %s144_s3, %s2525_s5  ;;  %p2531_p8 = scmp.lt.s32.totalorder %s2525_s5, %s2525_s5 }
  0x39   :  { %p2532_p9 = por %p2531_p8, %p2530_p7 }
  0x3b   :  { %p2533_p10 = pnand %p2532_p9, %p2526_p6 }
  0x3d   :  { %2536 = shalt.err (!%p2533_p10)
}
  0x3e   :  { %149 = dma.hbm_to_vmem [thread:$0]  %s3433_s9, 1024, %s144_s3, [#allocation18], %s2778_s24, %s2778_s24, %s2779_s25  }
  0x3f   :  { %s2784_s17 = smov [#allocation20]   ;;  %s2785_s19 = smov [#allocation2]  }
  0x40   :  { %s167_s18 = sshll.u32 %s2784_s17, 4  ;;  %s38_s7 = sshll.u32 %s2785_s19, 4  ;;  %s168_s18 = int_to_ptr.vmem [resolvable:$true] %s167_s18  ;;  %s39_s7 = int_to_ptr.vmem [resolvable:$true] %s38_s7 }
  0x41   :  { %s2545_s1 = scalar_lea.vmem %s168_s18, 1024  ;;  %p2550_p12 = scmp.lt.s32.totalorder %s168_s18, %s168_s18 }
  0x42   :  { %p2546_p11 = scmp.ne.s32.totalorder %s168_s18, %s2545_s1  ;;  %p2551_p13 = scmp.lt.s32.totalorder %s2545_s1, %s2545_s1 }
  0x44   :  { %p2552_p0 = por %p2551_p13, %p2550_p12 }
  0x46   :  { %p2553_p1 = pnand %p2552_p0, %p2546_p11 }
  0x48   :  { %2556 = shalt.err (!%p2553_p1)
}
  0x49   :  { %173 = dma.hbm_to_vmem [thread:$0]  %s3435_s11, 1024, %s168_s18, [#allocation21], %s2778_s24, %s2778_s24, %s2779_s25  }
  0x4a   :  { %s2565_s9 = scalar_lea.vmem %s39_s7, 32  ;;  %p2570_p3 = scmp.lt.s32.totalorder %s39_s7, %s39_s7 }
  0x4b   :  { %p2566_p2 = scmp.ne.s32.totalorder %s39_s7, %s2565_s9  ;;  %p2571_p4 = scmp.lt.s32.totalorder %s2565_s9, %s2565_s9 }
  0x4d   :  { %p2572_p5 = por %p2571_p4, %p2570_p3 }
  0x4f   :  { %p2573_p6 = pnand %p2572_p5, %p2566_p2 }
  0x51   :  { %2576 = shalt.err (!%p2573_p6)
}
  0x52   :  { %s3442_s26 = sld [smem:[#allocation38_spill]]  ;;  %s2786_s3 = smov [#allocation7]  }
  0x53   :  { %s59_s27 = sshll.u32 %s2786_s3, 4  ;;  %s2787_s28 = smov [#allocation10]   ;;  %s60_s27 = int_to_ptr.vmem [resolvable:$true] %s59_s27 }
  0x54   :  { %s83_s29 = sshll.u32 %s2787_s28, 4  ;;  %s2585_s5 = scalar_lea.vmem %s60_s27, 1024  ;;  %s84_s29 = int_to_ptr.vmem [resolvable:$true] %s83_s29 }
  0x55   :  { %p2586_p7 = scmp.ne.s32.totalorder %s60_s27, %s2585_s5  ;;  %p2590_p8 = scmp.lt.s32.totalorder %s60_s27, %s60_s27 }
  0x56   :  { %p2591_p9 = scmp.lt.s32.totalorder %s2585_s5, %s2585_s5 }
  0x58   :  { %41 = dma.hbm_to_vmem [thread:$0]  %s3442_s26, 32, %s39_s7, [#allocation3]  }
  0x59   :  { %p2592_p10 = por %p2591_p9, %p2590_p8 }
  0x5b   :  { %p2593_p11 = pnand %p2592_p10, %p2586_p7 }
  0x5d   :  { %2596 = shalt.err (!%p2593_p11)
}
  0x5e   :  { %65 = dma.hbm_to_vmem [thread:$0]  %s3426_s2, 1024, %s60_s27, [#allocation6], %s2778_s24, %s2778_s24, %s2779_s25  }
  0x5f   :  { %s2605_s0 = scalar_lea.vmem %s84_s29, 1024  ;;  %p2610_p13 = scmp.lt.s32.totalorder %s84_s29, %s84_s29 }
  0x60   :  { %p2606_p12 = scmp.ne.s32.totalorder %s84_s29, %s2605_s0  ;;  %p2611_p0 = scmp.lt.s32.totalorder %s2605_s0, %s2605_s0 }
  0x62   :  { %p2612_p1 = por %p2611_p0, %p2610_p13 }
  0x64   :  { %p2613_p2 = pnand %p2612_p1, %p2606_p12 }
  0x66   :  { %2616 = shalt.err (!%p2613_p2)
}
  0x67   :  { %89 = dma.hbm_to_vmem [thread:$0]  %s3428_s4, 1024, %s84_s29, [#allocation9], %s2778_s24, %s2778_s24, %s2779_s25  }
  0x68   :  { %s2788_s19 = smov [#allocation13]   ;;  %s2789_s1 = smov [#allocation16]  }
  0x69   :  { %s107_s7 = sshll.u32 %s2788_s19, 4  ;;  %s131_s2 = sshll.u32 %s2789_s1, 4  ;;  %s108_s7 = int_to_ptr.vmem [resolvable:$true] %s107_s7  ;;  %s132_s2 = int_to_ptr.vmem [resolvable:$true] %s131_s2 }
  0x6a   :  { %s2625_s20 = scalar_lea.vmem %s108_s7, 1024  ;;  %p2630_p4 = scmp.lt.s32.totalorder %s108_s7, %s108_s7 }
  0x6b   :  { %p2626_p3 = scmp.ne.s32.totalorder %s108_s7, %s2625_s20  ;;  %p2631_p5 = scmp.lt.s32.totalorder %s2625_s20, %s2625_s20 }
  0x6d   :  { %p2632_p6 = por %p2631_p5, %p2630_p4 }
  0x6f   :  { %p2633_p7 = pnand %p2632_p6, %p2626_p3 }
  0x71   :  { %2636 = shalt.err (!%p2633_p7)
}
  0x72   :  { %113 = dma.hbm_to_vmem [thread:$0]  %s3430_s6, 1024, %s108_s7, [#allocation12], %s2778_s24, %s2778_s24, %s2779_s25  }
  0x73   :  { %s2645_s4 = scalar_lea.vmem %s132_s2, 1024  ;;  %p2650_p9 = scmp.lt.s32.totalorder %s132_s2, %s132_s2 }
  0x74   :  { %p2646_p8 = scmp.ne.s32.totalorder %s132_s2, %s2645_s4  ;;  %p2651_p10 = scmp.lt.s32.totalorder %s2645_s4, %s2645_s4 }
  0x76   :  { %p2652_p11 = por %p2651_p10, %p2650_p9 }
  0x78   :  { %p2653_p12 = pnand %p2652_p11, %p2646_p8 }
  0x7a   :  { %2656 = shalt.err (!%p2653_p12)
}
  0x7b   :  { %137 = dma.hbm_to_vmem [thread:$0]  %s3432_s8, 1024, %s132_s2, [#allocation15], %s2778_s24, %s2778_s24, %s2779_s25  }
  0x7c   :  { %s2790_s26 = smov [#allocation19]   ;;  %s2791_s27 = smov [#allocation22]  }
  0x7d   :  { %s155_s3 = sshll.u32 %s2790_s26, 4  ;;  %s181_s6 = sshll.u32 %s2791_s27, 4  ;;  %s156_s3 = int_to_ptr.vmem [resolvable:$true] %s155_s3  ;;  %s182_s6 = int_to_ptr.vmem [resolvable:$true] %s181_s6 }
  0x7e   :  { %s2665_s28 = scalar_lea.vmem %s156_s3, 1024  ;;  %p2670_p0 = scmp.lt.s32.totalorder %s156_s3, %s156_s3 }
  0x7f   :  { %p2666_p13 = scmp.ne.s32.totalorder %s156_s3, %s2665_s28  ;;  %p2671_p1 = scmp.lt.s32.totalorder %s2665_s28, %s2665_s28 }
  0x81   :  { %p2672_p2 = por %p2671_p1, %p2670_p0 }
  0x83   :  { %p2673_p3 = pnand %p2672_p2, %p2666_p13 }
  0x85   :  { %2676 = shalt.err (!%p2673_p3)
}
  0x86   :  { %161 = dma.hbm_to_vmem [thread:$0]  %s3434_s10, 1024, %s156_s3, [#allocation18], %s2778_s24, %s2778_s24, %s2779_s25  }
  0x87   :  { %s2685_s8 = scalar_lea.vmem %s182_s6, 1024  ;;  %p2690_p5 = scmp.lt.s32.totalorder %s182_s6, %s182_s6 }
  0x88   :  { %p2686_p4 = scmp.ne.s32.totalorder %s182_s6, %s2685_s8  ;;  %p2691_p6 = scmp.lt.s32.totalorder %s2685_s8, %s2685_s8 }
  0x8a   :  { %p2692_p7 = por %p2691_p6, %p2690_p5 }
  0x8c   :  { %p2693_p8 = pnand %p2692_p7, %p2686_p4 }
  0x8e   :  { %2696 = shalt.err (!%p2693_p8)
}
  0x8f   :  { %187 = dma.hbm_to_vmem [thread:$0]  %s3437_s13, 1024, %s182_s6, [#allocation21], %s2778_s24, %s2778_s24, %s2779_s25  }
  0x90   :  { %s2792_s0 = smov [#allocation23]  }
  0x91   :  { %s193_s17 = sshll.u32 %s2792_s0, 4  ;;  %s194_s17 = int_to_ptr.vmem [resolvable:$true] %s193_s17 }
  0x92   :  { %s2705_s18 = scalar_lea.vmem %s194_s17, 1024  ;;  %p2710_p10 = scmp.lt.s32.totalorder %s194_s17, %s194_s17 }
  0x93   :  { %p2706_p9 = scmp.ne.s32.totalorder %s194_s17, %s2705_s18  ;;  %p2711_p11 = scmp.lt.s32.totalorder %s2705_s18, %s2705_s18 }
  0x95   :  { %p2712_p12 = por %p2711_p11, %p2710_p10 }
  0x97   :  { %p2713_p13 = pnand %p2712_p12, %p2706_p9 }
  0x99   :  { %2716 = shalt.err (!%p2713_p13)
}
  0x9a   :  { %199 = dma.hbm_to_vmem [thread:$0]  %s3438_s14, 1024, %s194_s17, [#allocation24], %s2778_s24, %s2778_s24, %s2779_s25  }
  0x9b   :  { %2757 = dma.done.wait [#allocation3], 32  }
  0x9c   :  { %2758 = vsyncadd [#allocation3], 4294967264 }
  0x9d   :  { %2759 = dma.done.wait [#allocation6], 3072  }
  0x9e   :  { %2760 = vsyncadd [#allocation6], 4294964224 }
  0x9f   :  { %2761 = dma.done.wait [#allocation9], 2048  }
  0xa0   :  { %2762 = vsyncadd [#allocation9], 4294965248 }
  0xa1   :  { %2763 = dma.done.wait [#allocation12], 2048  }
  0xa2   :  { %2764 = vsyncadd [#allocation12], 4294965248 }
  0xa3   :  { %2765 = dma.done.wait [#allocation15], 2048  }
  0xa4   :  { %2766 = vsyncadd [#allocation15], 4294965248 }
  0xa5   :  { %2767 = dma.done.wait [#allocation18], 2048  }
  0xa6   :  { %2768 = vsyncadd [#allocation18], 4294965248 }
  0xa7   :  { %2769 = dma.done.wait [#allocation21], 2048  }
  0xa8   :  { %2770 = vsyncadd [#allocation21], 4294965248 }
  0xa9   :  { %2771 = dma.done.wait [#allocation24], 1024  }
  0xaa   :  { %2772 = vsyncadd [#allocation24], 4294966272  ;;  %v287_v0 = vlaneseq  ;;  %v2793_v1 = vmov 1966171168   ;;  %vm332_vm0 = vcmask 556032   ;;  %v274_v5 = vld [vmem:[#allocation8 + $0x38] sm:$0xff] }
  0xab   :  { %v285_v2 = vunpack.c.l.s4 %v2793_v1  ;;  %v273_v6 = vld [vmem:[#allocation8 + $0x30] sm:$0xff]  ;;  %2065 = vmatprep.subr.msk.mxu0 %vm332_vm0, %v274_v5  ;;  %v677_v7 = vld [vmem:[#allocation13 + $0x38] sm:$0xff]  ;;  %v272_v10 = vld [vmem:[#allocation8 + $0x28] sm:$0xff]  ;;  %vm2795_vm1 = vmmov 0   ;;  %vm1493_vm2 = vcmask 523264   ;;  %s2796_s13 = smov [#allocation26]  }
  0xac   :  { %v2964_v4 = vshrl.u32 %v287_v0, 7  ;;  %2066 = vmatpush3.xpose.msk.msra.mxu0 %vm332_vm0, %v274_v5  ;;  %2105 = vmatprep.subr.msk.mxu1 %vm332_vm0, %v677_v7  ;;  %v676_v9 = vld [vmem:[#allocation13 + $0x30] sm:$0xff]  ;;  %v2975_v11 = vld [vmem:[#allocation2] sm:$0x3]  ;;  %v675_v12 = vld [vmem:[#allocation13 + $0x28] sm:$0xff]  ;;  %s1804_s14 = sshll.u32 %s2796_s13, 4  ;;  %s1805_s14 = int_to_ptr.vmem [resolvable:$true] %s1804_s14 }
  0xad   :  { %v286_v3 = vunpack.c.0.s8 %v285_v2  ;;  %2067 = vmatprep.subr.msk.mxu0 %vm332_vm0, %v273_v6  ;;  %2106 = vmatpush3.xpose.msk.msra.mxu1 %vm332_vm0, %v677_v7  ;;  %v271_v16 = vld [vmem:[#allocation8 + $0x20] sm:$0xff]  ;;  %v270_v22 = vld [vmem:[#allocation8 + $0x18] sm:$0xff]  ;;  %v269_v25 = vld [vmem:[#allocation8 + $0x10] sm:$0xff]  ;;  %s2717_s7 = scalar_lea.vmem %s1805_s14, 2048  ;;  %p2722_p1 = scmp.lt.s32.totalorder %s1805_s14, %s1805_s14 }
  0xae   :  { %2107 = vmatprep.subr.msk.mxu1 %vm332_vm0, %v676_v9  ;;  %v308_v14 = vsub.s32 0, %v2964_v4  ;;  %v2988_v17 = vld [vmem:[#allocation7] sm:$0xff]  ;;  %v673_v23 = vld [vmem:[#allocation13 + $0x18] sm:$0xff]  ;;  %v672_v26 = vld [vmem:[#allocation13 + $0x10] sm:$0xff]  ;;  %p2718_p0 = scmp.ne.s32.totalorder %s1805_s14, %s2717_s7  ;;  %p2723_p2 = scmp.lt.s32.totalorder %s2717_s7, %s2717_s7 }
  0xaf   :  { %v2968_v8 = vsub.s32 %v286_v3, %v2964_v4  ;;  %v674_v18 = vld [vmem:[#allocation13 + $0x20] sm:$0xff]  ;;  %v268_v27 = vld [vmem:[#allocation8 + $0x8] sm:$0xff]  ;;  %v3022_v32 = vld [vmem:[#allocation7 + $0x10] sm:$0xff] }
  0xb0   :  { %2068 = vmatpush3.xpose.msk.msra.mxu0 %vm332_vm0, %v273_v6  ;;  %v2995_v20 = vld [vmem:[#allocation11] sm:$0xff]  ;;  %v671_v28 = vld [vmem:[#allocation13 + $0x8] sm:$0xff]  ;;  %v1046_v33 = vld [vmem:[#allocation17 + $0x38] sm:$0xff]  ;;  %p2724_p3 = por %p2723_p2, %p2722_p1 }
  0xb1   :  { %v2979_v13 = vrot.slane %v2975_v11, %v2968_v8  ;;  %2069 = vmatprep.subr.msk.mxu0 %vm332_vm0, %v272_v10  ;;  %2108 = vmatpush3.xpose.msk.msra.mxu1 %vm332_vm0, %v676_v9  ;;  %v267_v29 = vld [vmem:[#allocation8] sm:$0xff]  ;;  %v3019_v31 = vld [vmem:[#allocation7 + $0x8] sm:$0xff]  ;;  %v3030_v36 = vld [vmem:[#allocation11 + $0x10] sm:$0xff] }
  0xb2   :  { %2109 = vmatprep.subr.msk.mxu1 %vm332_vm0, %v675_v12  ;;  %v670_v30 = vld [vmem:[#allocation13] sm:$0xff]  ;;  %v3026_v34 = vld [vmem:[#allocation11 + $0x8] sm:$0xff]  ;;  %v262_v39 = vld [vmem:[#allocation7 + $0x18] sm:$0xff]  ;;  %p2725_p4 = pnand %p2724_p3, %p2718_p0 }
  0xb3   :  { %v298_v15 = vrot.slane %v2979_v13, %v2968_v8  ;;  %v291_v37 = vcombine.high %v2979_v13, %v2979_v13  ;;  %v3038_v40 = vld [vmem:[#allocation7 + $0x20] sm:$0xff]  ;;  %v1045_v42 = vld [vmem:[#allocation17 + $0x30] sm:$0xff]  ;;  %v665_v44 = vld [vmem:[#allocation11 + $0x18] sm:$0xff] }
  0xb4   :  { %2070 = vmatpush3.xpose.msk.msra.mxu0 %vm332_vm0, %v272_v10  ;;  %v666_v46 = vld [vmem:[#allocation11 + $0x20] sm:$0xff]  ;;  %v264_v49 = vld [vmem:[#allocation7 + $0x28] sm:$0xff]  ;;  %v265_v50 = vld [vmem:[#allocation7 + $0x30] sm:$0xff] }
  0xb5   :  { %v2992_v19 = vrot.slane %v298_v15, %v308_v14  ;;  %2071 = vmatprep.subr.msk.mxu0 %vm332_vm0, %v271_v16  ;;  %2110 = vmatpush3.xpose.msk.msra.mxu1 %vm332_vm0, %v675_v12  ;;  %v305_v47 = vrot.slane %v291_v37, %v2968_v8  ;;  %v1044_v52 = vld [vmem:[#allocation17 + $0x28] sm:$0xff]  ;;  %v668_v56 = vld [vmem:[#allocation11 + $0x30] sm:$0xff]  ;;  %v266_v59 = vld [vmem:[#allocation7 + $0x38] sm:$0xff] }
  0xb6   :  { %2111 = vmatprep.subr.msk.mxu1 %vm332_vm0, %v674_v18  ;;  %v667_v54 = vld [vmem:[#allocation11 + $0x28] sm:$0xff]  ;;  %v1043_v61 = vld [vmem:[#allocation17 + $0x20] sm:$0xff]  ;;  %v669_v63 = vld [vmem:[#allocation11 + $0x38] sm:$0xff] }
  0xb7   :  { %v316_v21 = vmul.f32 %v2992_v19, %v2988_v17  ;;  %v686_v24 = vmul.f32 %v2995_v20, %v2992_v19  ;;  %v317_v35 = vmul.f32 %v2992_v19, %v3019_v31  ;;  %v318_v38 = vmul.f32 %v2992_v19, %v3022_v32  ;;  %v1042_v4 = vld [vmem:[#allocation17 + $0x18] sm:$0xff]  ;;  %v1041_v8 = vld [vmem:[#allocation17 + $0x10] sm:$0xff] }
  0xb8   :  { %2072 = vmatpush3.xpose.msk.msra.mxu0 %vm332_vm0, %v271_v16  ;;  %v687_v41 = vmul.f32 %v3026_v34, %v2992_v19  ;;  %v688_v43 = vmul.f32 %v3030_v36, %v2992_v19  ;;  %v319_v45 = vmul.f32 %v2992_v19, %v262_v39  ;;  %v320_v48 = vmul.f32 %v2992_v19, %v3038_v40 }
  0xb9   :  { %2081 = vmatprep.mubr.msk.f32.mxu0 %vm332_vm0, %v316_v21  ;;  %2073 = vmatprep.subr.msk.mxu0 %vm332_vm0, %v270_v22  ;;  %v689_v51 = vmul.f32 %v665_v44, %v2992_v19  ;;  %v690_v53 = vmul.f32 %v666_v46, %v2992_v19  ;;  %v321_v55 = vmul.f32 %v2992_v19, %v264_v49  ;;  %v1039_v21 = vld [vmem:[#allocation17] sm:$0xff] }
  0xba   :  { %2112 = vmatpush3.xpose.msk.msra.mxu1 %vm332_vm0, %v674_v18  ;;  %2121 = vmatprep.mubr.msk.f32.mxu1 %vm332_vm0, %v686_v24  ;;  %v3061_v57 = vrot.slane %v305_v47, %v308_v14  ;;  %v322_v58 = vmul.f32 %v2992_v19, %v265_v50  ;;  %v691_v60 = vmul.f32 %v667_v54, %v2992_v19  ;;  %v1040_v14 = vld [vmem:[#allocation17 + $0x8] sm:$0xff]  ;;  %v1031_v18 = vld [vmem:[#allocation16] sm:$0xff]  ;;  %v1492_v47 = vld [vmem:[#allocation22 + $0x38] sm:$0xff] }
  0xbb   :  { %2113 = vmatprep.subr.msk.mxu1 %vm332_vm0, %v673_v23  ;;  %v692_v62 = vmul.f32 %v668_v56, %v2992_v19  ;;  %v323_v0 = vmul.f32 %v2992_v19, %v266_v59  ;;  %v693_v2 = vmul.f32 %v669_v63, %v2992_v19  ;;  %v1055_v24 = vmul.f32 %v1031_v18, %v2992_v19 }
  0xbc   :  { %2074 = vmatpush3.xpose.msk.msra.mxu0 %vm332_vm0, %v270_v22  ;;  %v324_v1 = vmul.f32 %v3061_v57, %v2988_v17  ;;  %v694_v3 = vmul.f32 %v2995_v20, %v3061_v57  ;;  %v325_v5 = vmul.f32 %v3061_v57, %v3019_v31  ;;  %v326_v6 = vmul.f32 %v3061_v57, %v3022_v32  ;;  %v1035_v31 = vld [vmem:[#allocation16 + $0x20] sm:$0xff] }
  0xbd   :  { %2075 = vmatprep.subr.msk.mxu0 %vm332_vm0, %v269_v25  ;;  %v695_v7 = vmul.f32 %v3026_v34, %v3061_v57  ;;  %v696_v9 = vmul.f32 %v3030_v36, %v3061_v57  ;;  %v327_v10 = vmul.f32 %v3061_v57, %v262_v39  ;;  %v328_v12 = vmul.f32 %v3061_v57, %v3038_v40  ;;  %v1036_v34 = vld [vmem:[#allocation16 + $0x28] sm:$0xff] }
  0xbe   :  { %2114 = vmatpush3.xpose.msk.msra.mxu1 %vm332_vm0, %v673_v23  ;;  %v697_v13 = vmul.f32 %v665_v44, %v3061_v57  ;;  %v698_v15 = vmul.f32 %v666_v46, %v3061_v57  ;;  %v329_v16 = vmul.f32 %v3061_v57, %v264_v49  ;;  %v330_v17 = vmul.f32 %v3061_v57, %v265_v50  ;;  %v1490_v49 = vld [vmem:[#allocation22 + $0x28] sm:$0xff]  ;;  %v1489_v50 = vld [vmem:[#allocation22 + $0x20] sm:$0xff] }
  0xbf   :  { %2115 = vmatprep.subr.msk.mxu1 %vm332_vm0, %v672_v26  ;;  %v699_v20 = vmul.f32 %v667_v54, %v3061_v57  ;;  %v700_v22 = vmul.f32 %v668_v56, %v3061_v57  ;;  %v331_v23 = vmul.f32 %v3061_v57, %v266_v59  ;;  %v1060_v36 = vmul.f32 %v1036_v34, %v2992_v19  ;;  %v1485_v54 = vld [vmem:[#allocation22] sm:$0xff]  ;;  %v1327_v56 = vld [vmem:[#allocation20 + $0x38] sm:$0xff] }
  0xc0   :  { %2076 = vmatpush3.xpose.msk.msra.mxu0 %vm332_vm0, %v269_v25  ;;  %v1032_v25 = vld [vmem:[#allocation16 + $0x8] sm:$0xff]  ;;  %v1063_v40 = vmul.f32 %v1031_v18, %v3061_v57  ;;  %v1068_v44 = vmul.f32 %v1036_v34, %v3061_v57  ;;  %v1324_v59 = vld [vmem:[#allocation20 + $0x20] sm:$0xff] }
  0xc1   :  { %2077 = vmatprep.subr.msk.mxu0 %vm332_vm0, %v268_v27 }
  0xc2   :  { %2116 = vmatpush3.xpose.msk.msra.mxu1 %vm332_vm0, %v672_v26  ;;  %v1033_v26 = vld [vmem:[#allocation16 + $0x10] sm:$0xff] }
  0xc3   :  { %2117 = vmatprep.subr.msk.mxu1 %vm332_vm0, %v671_v28 }
  0xc4   :  { %2078 = vmatpush3.xpose.msk.msra.mxu0 %vm332_vm0, %v268_v27  ;;  %v701_v27 = vmul.f32 %v669_v63, %v3061_v57  ;;  %v1320_v63 = vld [vmem:[#allocation20] sm:$0xff] }
  0xc5   :  { %2079 = vmatprep.subr.msk.mxu0 %vm332_vm0, %v267_v29 }
  0xc6   :  { %2118 = vmatpush3.xpose.msk.msra.mxu1 %vm332_vm0, %v671_v28  ;;  %v1056_v28 = vmul.f32 %v1032_v25, %v2992_v19 }
  0xc7   :  { %2119 = vmatprep.subr.msk.mxu1 %vm332_vm0, %v670_v30 }
  0xc8   :  { %2080 = vmatpush3.xpose.msk.msra.mxu0 %vm332_vm0, %v267_v29  ;;  %v1057_v29 = vmul.f32 %v1033_v26, %v2992_v19 }
  0xc9   :  { %2145 = vmatprep.subr.msk.mxu0 %vm332_vm0, %v1046_v33 }
  0xca   :  { %2120 = vmatpush3.xpose.msk.msra.mxu1 %vm332_vm0, %v670_v30  ;;  %v1034_v30 = vld [vmem:[#allocation16 + $0x18] sm:$0xff] }
  0xcb   :  { %2082 = vmatmul.mubr.msk.f32.vlgmr.msra.gmra.mxu0 %vm332_vm0, %v317_v35  ;;  %v1058_v32 = vmul.f32 %v1034_v30, %v2992_v19  ;;  %v1037_v35 = vld [vmem:[#allocation16 + $0x30] sm:$0xff]  ;;  %2204 = vmatprep.subr.mxu1 %v1492_v47 }
  0xcc   :  { %2146 = vmatpush3.xpose.msk.msra.mxu0 %vm332_vm0, %v1046_v33  ;;  %2084 = vmatprep.mubr.msk.f32.mxu0 %vm332_vm0, %v318_v38  ;;  %v1059_v33 = vmul.f32 %v1035_v31, %v2992_v19  ;;  %v1061_v37 = vmul.f32 %v1037_v35, %v2992_v19  ;;  %v1038_v38 = vld [vmem:[#allocation16 + $0x38] sm:$0xff] }
  0xcd   :  { %2147 = vmatprep.subr.msk.mxu0 %vm332_vm0, %v1045_v42  ;;  %2122 = vmatmul.mubr.msk.f32.vlgmr.msra.gmra.mxu1 %vm332_vm0, %v687_v41  ;;  %v1062_v39 = vmul.f32 %v1038_v38, %v2992_v19  ;;  %v1064_v41 = vmul.f32 %v1032_v25, %v3061_v57  ;;  %v1067_v19 = vmul.f32 %v1035_v31, %v3061_v57 }
  0xce   :  { %2124 = vmatprep.mubr.msk.f32.mxu1 %vm332_vm0, %v688_v43  ;;  %v1066_v43 = vmul.f32 %v1034_v30, %v3061_v57  ;;  %v1070_v46 = vmul.f32 %v1038_v38, %v3061_v57  ;;  %2205 = vmatpush3.msra.mxu1 %v1492_v47  ;;  %v3210_v47 = vld [vmem:[#allocation14 + $0x38] sm:$0xff] }
  0xcf   :  { %2085 = vmatmul.mubr.msk.f32.gmra.mxu0 %vm332_vm0, %v319_v45  ;;  %v1069_v45 = vmul.f32 %v1037_v35, %v3061_v57 }
  0xd0   :  { %2148 = vmatpush3.xpose.msk.msra.mxu0 %vm332_vm0, %v1045_v42  ;;  %2087 = vmatprep.mubr.msk.f32.mxu0 %vm332_vm0, %v320_v48  ;;  %v1065_v42 = vmul.f32 %v1033_v26, %v3061_v57  ;;  %v1491_v48 = vld [vmem:[#allocation22 + $0x30] sm:$0xff] }
  0xd1   :  { %2149 = vmatprep.subr.msk.mxu0 %vm332_vm0, %v1044_v52  ;;  %2125 = vmatmul.mubr.msk.f32.gmra.mxu1 %vm332_vm0, %v689_v51  ;;  %v1488_v51 = vld [vmem:[#allocation22 + $0x18] sm:$0xff]  ;;  %v1326_v57 = vld [vmem:[#allocation20 + $0x30] sm:$0xff] }
  0xd2   :  { %2127 = vmatprep.mubr.msk.f32.mxu1 %vm332_vm0, %v690_v53  ;;  %2206 = vmatprep.subr.mxu1 %v1491_v48  ;;  %v1486_v53 = vld [vmem:[#allocation22 + $0x8] sm:$0xff] }
  0xd3   :  { %2088 = vmatmul.mubr.msk.f32.gmra.mxu0 %vm332_vm0, %v321_v55  ;;  %2207 = vmatpush3.msra.mxu1 %v1491_v48  ;;  %v2794_v55 = vmov 0.0  }
  0xd4   :  { %2150 = vmatpush3.xpose.msk.msra.mxu0 %vm332_vm0, %v1044_v52  ;;  %2090 = vmatprep.mubr.msk.f32.mxu0 %vm332_vm0, %v322_v58  ;;  %v1487_v52 = vld [vmem:[#allocation22 + $0x10] sm:$0xff]  ;;  %v1325_v58 = vld [vmem:[#allocation20 + $0x28] sm:$0xff] }
  0xd5   :  { %2151 = vmatprep.subr.msk.mxu0 %vm332_vm0, %v1043_v61  ;;  %2128 = vmatmul.mubr.msk.f32.gmra.mxu1 %vm332_vm0, %v691_v60  ;;  %v1323_v60 = vld [vmem:[#allocation20 + $0x18] sm:$0xff] }
  0xd6   :  { %2130 = vmatprep.mubr.msk.f32.mxu1 %vm332_vm0, %v692_v62  ;;  %2208 = vmatprep.subr.mxu1 %v1490_v49  ;;  %v1321_v62 = vld [vmem:[#allocation20 + $0x8] sm:$0xff] }
  0xd7   :  { %2091 = vmatmul.mubr.msk.f32.gmra.mxu0 %vm332_vm0, %v323_v0  ;;  %2209 = vmatpush3.msra.mxu1 %v1490_v49  ;;  %v3169_v0 = vld [vmem:[#allocation10 + $0x8] sm:$0xff] }
  0xd8   :  { %2152 = vmatpush3.xpose.msk.msra.mxu0 %vm332_vm0, %v1043_v61  ;;  %2093 = vmatprep.mubr.msk.f32.mxu0 %vm332_vm0, %v324_v1  ;;  %v1322_v61 = vld [vmem:[#allocation20 + $0x10] sm:$0xff] }
  0xd9   :  { %2153 = vmatprep.subr.msk.mxu0 %vm332_vm0, %v1042_v4  ;;  %2131 = vmatmul.mubr.msk.f32.gmra.mxu1 %vm332_vm0, %v693_v2  ;;  %v3173_v2 = vld [vmem:[#allocation10] sm:$0xff] }
  0xda   :  { %2133 = vmatprep.mubr.msk.f32.mxu1 %vm332_vm0, %v694_v3  ;;  %2210 = vmatprep.subr.mxu1 %v1489_v50  ;;  %v3175_v3 = vld [vmem:[#allocation14 + $0x8] sm:$0xff] }
  0xdb   :  { %2094 = vmatmul.mubr.msk.f32.gmra.mxu0 %vm332_vm0, %v325_v5  ;;  %2211 = vmatpush3.msra.mxu1 %v1489_v50 }
  0xdc   :  { %2154 = vmatpush3.xpose.msk.msra.mxu0 %vm332_vm0, %v1042_v4  ;;  %2096 = vmatprep.mubr.msk.f32.mxu0 %vm332_vm0, %v326_v6  ;;  %v3178_v6 = vld [vmem:[#allocation10 + $0x18] sm:$0xff] }
  0xdd   :  { %2155 = vmatprep.subr.msk.mxu0 %vm332_vm0, %v1041_v8  ;;  %2134 = vmatmul.mubr.msk.f32.gmra.mxu1 %vm332_vm0, %v695_v7 }
  0xde   :  { %2136 = vmatprep.mubr.msk.f32.mxu1 %vm332_vm0, %v696_v9  ;;  %2212 = vmatprep.subr.mxu1 %v1488_v51 }
  0xdf   :  { %2097 = vmatmul.mubr.msk.f32.gmra.mxu0 %vm332_vm0, %v327_v10  ;;  %2213 = vmatpush3.msra.mxu1 %v1488_v51 }
  0xe0   :  { %2156 = vmatpush3.xpose.msk.msra.mxu0 %vm332_vm0, %v1041_v8  ;;  %2099 = vmatprep.mubr.msk.f32.mxu0 %vm332_vm0, %v328_v12  ;;  %v3182_v12 = vld [vmem:[#allocation14] sm:$0xff] }
  0xe1   :  { %2157 = vmatprep.subr.msk.mxu0 %vm332_vm0, %v1040_v14  ;;  %2137 = vmatmul.mubr.msk.f32.gmra.mxu1 %vm332_vm0, %v697_v13 }
  0xe2   :  { %2139 = vmatprep.mubr.msk.f32.mxu1 %vm332_vm0, %v698_v15  ;;  %2214 = vmatprep.subr.mxu1 %v1487_v52  ;;  %v3186_v15 = vld [vmem:[#allocation14 + $0x18] sm:$0xff] }
  0xe3   :  { %2100 = vmatmul.mubr.msk.f32.gmra.mxu0 %vm332_vm0, %v329_v16  ;;  %2215 = vmatpush3.msra.mxu1 %v1487_v52 }
  0xe4   :  { %2158 = vmatpush3.xpose.msk.msra.mxu0 %vm332_vm0, %v1040_v14  ;;  %2102 = vmatprep.mubr.msk.f32.mxu0 %vm332_vm0, %v330_v17 }
  0xe5   :  { %2159 = vmatprep.subr.msk.mxu0 %vm332_vm0, %v1039_v21  ;;  %2140 = vmatmul.mubr.msk.f32.gmra.mxu1 %vm332_vm0, %v699_v20 }
  0xe6   :  { %2142 = vmatprep.mubr.msk.f32.mxu1 %vm332_vm0, %v700_v22  ;;  %2216 = vmatprep.subr.mxu1 %v1486_v53 }
  0xe7   :  { %2103 = vmatmul.mubr.msk.f32.gmra.mxu0 %vm332_vm0, %v331_v23  ;;  %2217 = vmatpush3.msra.mxu1 %v1486_v53 }
  0xe8   :  { %2160 = vmatpush3.xpose.msk.msra.mxu0 %vm332_vm0, %v1039_v21  ;;  %2161 = vmatprep.mubr.msk.f32.mxu0 %vm332_vm0, %v1055_v24  ;;  %v3189_v21 = vld [vmem:[#allocation10 + $0x28] sm:$0xff] }
  0xe9   :  { %2143 = vmatmul.mubr.msk.f32.gmra.mxu1 %vm332_vm0, %v701_v27  ;;  %2218 = vmatprep.subr.mxu1 %v1485_v54  ;;  %v3194_v27 = vld [vmem:[#allocation14 + $0x10] sm:$0xff] }
  0xea   :  { %2219 = vmatpush3.msra.mxu1 %v1485_v54  ;;  %2185 = vmatprep.subr.mxu0 %v2794_v55 }
  0xeb   :  { %2162 = vmatmul.mubr.msk.f32.vlgmr.msra.gmra.mxu0 %vm332_vm0, %v1056_v28 }
  0xec   :  { %2164 = vmatprep.mubr.msk.f32.mxu0 %vm332_vm0, %v1057_v29  ;;  %2186 = vmatpush3.xpose.msk.msra.mxu0 %vm332_vm0, %v1327_v56  ;;  %v3196_v29 = vld [vmem:[#allocation10 + $0x20] sm:$0xff] }
  0xed   :  { %2187 = vmatprep.subr.mxu0 %v2794_v55 }
  0xef   :  { %2165 = vmatmul.mubr.msk.f32.gmra.mxu0 %vm332_vm0, %v1058_v32  ;;  %v3198_v32 = vld [vmem:[#allocation14 + $0x28] sm:$0xff] }
  0xf0   :  { %2167 = vmatprep.mubr.msk.f32.mxu0 %vm332_vm0, %v1059_v33  ;;  %2188 = vmatpush3.xpose.msk.msra.mxu0 %vm332_vm0, %v1326_v57 }
  0xf1   :  { %2189 = vmatprep.subr.mxu0 %v2794_v55 }
  0xf3   :  { %2168 = vmatmul.mubr.msk.f32.gmra.mxu0 %vm332_vm0, %v1060_v36 }
  0xf4   :  { %2170 = vmatprep.mubr.msk.f32.mxu0 %vm332_vm0, %v1061_v37  ;;  %2190 = vmatpush3.xpose.msk.msra.mxu0 %vm332_vm0, %v1325_v58  ;;  %v3201_v37 = vld [vmem:[#allocation10 + $0x38] sm:$0xff] }
  0xf5   :  { %2191 = vmatprep.subr.mxu0 %v2794_v55 }
  0xf7   :  { %2171 = vmatmul.mubr.msk.f32.gmra.mxu0 %vm332_vm0, %v1062_v39 }
  0xf8   :  { %2173 = vmatprep.mubr.msk.f32.mxu0 %vm332_vm0, %v1063_v40  ;;  %2192 = vmatpush3.xpose.msk.msra.mxu0 %vm332_vm0, %v1324_v59 }
  0xf9   :  { %2193 = vmatprep.subr.mxu0 %v2794_v55 }
  0xfb   :  { %2174 = vmatmul.mubr.msk.f32.gmra.mxu0 %vm332_vm0, %v1064_v41 }
  0xfc   :  { %2176 = vmatprep.mubr.msk.f32.mxu0 %vm332_vm0, %v1065_v42  ;;  %2194 = vmatpush3.xpose.msk.msra.mxu0 %vm332_vm0, %v1323_v60 }
  0xfd   :  { %2195 = vmatprep.subr.mxu0 %v2794_v55 }
  0xff   :  { %2177 = vmatmul.mubr.msk.f32.gmra.mxu0 %vm332_vm0, %v1066_v43  ;;  %v3206_v43 = vld [vmem:[#allocation14 + $0x20] sm:$0xff] }
 0x100   :  { %2179 = vmatprep.mubr.msk.f32.mxu0 %vm332_vm0, %v1067_v19  ;;  %2196 = vmatpush3.xpose.msk.msra.mxu0 %vm332_vm0, %v1322_v61 }
 0x101   :  { %2197 = vmatprep.subr.mxu0 %v2794_v55 }
 0x103   :  { %2180 = vmatmul.mubr.msk.f32.gmra.mxu0 %vm332_vm0, %v1068_v44  ;;  %v3208_v44 = vld [vmem:[#allocation10 + $0x30] sm:$0xff] }
 0x104   :  { %2182 = vmatprep.mubr.msk.f32.mxu0 %vm332_vm0, %v1069_v45  ;;  %2198 = vmatpush3.xpose.msk.msra.mxu0 %vm332_vm0, %v1321_v62 }
 0x105   :  { %2199 = vmatprep.subr.mxu0 %v2794_v55 }
 0x107   :  { %2183 = vmatmul.mubr.msk.f32.gmra.mxu0 %vm332_vm0, %v1070_v46 }
 0x108   :  { %2201 = vmatprep.mubr.msk.f32.mxu0 %vm2795_vm1, %v2794_v55  ;;  %2200 = vmatpush3.xpose.msk.msra.mxu0 %vm332_vm0, %v1320_v63 }
 0x10b   :  { %2202 = vmatmul.mubr.msk.f32.vlgmr.msra.gmra.mxu0 %vm332_vm0, %v2975_v11  ;;  %v3184_v11 = vld [vmem:[#allocation10 + $0x10] sm:$0xff] }
 0x18b   :  { %v2083_v1 = vpop.f32.mrf.mxu0 }
 0x18c   :  { %v551_v4 = vadd.f32 %v2083_v1, %v3169_v0 }
 0x18d   :  { %v471_v5 = vpop.f32.mrf.mxu0  ;;  %v2123_v7 = vpop.f32.mrf.mxu1 }
 0x18e   :  { %v1852_v8 = vmul.f32 -1.442695, %v551_v4  ;;  %v550_v9 = vadd.f32 %v471_v5, %v3173_v2  ;;  %v920_v10 = vadd.f32 %v2123_v7, %v3175_v3 }
 0x18f   :  { %v2086_v13 = vpop.f32.mrf.mxu0  ;;  %v840_v14 = vpop.f32.mrf.mxu1 }
 0x190   :  { %2265 = vpow2.f32 %v1852_v8  ;;  %v1851_v16 = vmul.f32 -1.442695, %v550_v9  ;;  %v553_v17 = vadd.f32 %v2086_v13, %v3178_v6  ;;  %v1892_v18 = vmul.f32 -1.442695, %v920_v10 }
 0x191   :  { %v481_v20 = vpop.f32.mrf.mxu0  ;;  %v919_v22 = vadd.f32 %v840_v14, %v3182_v12  ;;  %v2126_v23 = vpop.f32.mrf.mxu1 }
 0x192   :  { %2267 = vpow2.f32 %v1851_v16  ;;  %v1854_v24 = vmul.f32 -1.442695, %v553_v17  ;;  %v552_v25 = vadd.f32 %v481_v20, %v3184_v11  ;;  %v922_v26 = vadd.f32 %v2126_v23, %v3186_v15 }
 0x193   :  { %v2089_v28 = vpop.f32.mrf.mxu0  ;;  %2269 = vpow2.f32 %v1892_v18  ;;  %v1891_v30 = vmul.f32 -1.442695, %v919_v22  ;;  %v850_v31 = vpop.f32.mrf.mxu1 }
 0x194   :  { %2271 = vpow2.f32 %v1854_v24  ;;  %v1853_v33 = vmul.f32 -1.442695, %v552_v25  ;;  %v555_v34 = vadd.f32 %v2089_v28, %v3189_v21  ;;  %v1894_v35 = vmul.f32 -1.442695, %v922_v26 }
 0x195   :  { %v491_v36 = vpop.f32.mrf.mxu0  ;;  %2273 = vpow2.f32 %v1891_v30  ;;  %v921_v38 = vadd.f32 %v850_v31, %v3194_v27  ;;  %v2129_v39 = vpop.f32.mrf.mxu1 }
 0x196   :  { %2275 = vpow2.f32 %v1853_v33  ;;  %v1856_v40 = vmul.f32 -1.442695, %v555_v34  ;;  %v554_v41 = vadd.f32 %v491_v36, %v3196_v29  ;;  %v924_v42 = vadd.f32 %v2129_v39, %v3198_v32 }
 0x197   :  { %v2092_v19 = vpop.f32.mrf.mxu0  ;;  %2277 = vpow2.f32 %v1894_v35  ;;  %v1893_v45 = vmul.f32 -1.442695, %v921_v38  ;;  %v860_v46 = vpop.f32.mrf.mxu1 }
 0x198   :  { %2279 = vpow2.f32 %v1856_v40  ;;  %v1855_v48 = vmul.f32 -1.442695, %v554_v41  ;;  %v557_v49 = vadd.f32 %v2092_v19, %v3201_v37  ;;  %v1896_v51 = vmul.f32 -1.442695, %v924_v42 }
 0x199   :  { %v501_v50 = vpop.f32.mrf.mxu0  ;;  %2281 = vpow2.f32 %v1893_v45  ;;  %v923_v52 = vadd.f32 %v860_v46, %v3206_v43  ;;  %v2132_v53 = vpop.f32.mrf.mxu1 }
 0x19a   :  { %2283 = vpow2.f32 %v1855_v48  ;;  %v1858_v54 = vmul.f32 -1.442695, %v557_v49  ;;  %v556_v55 = vadd.f32 %v501_v50, %v3208_v44  ;;  %v926_v56 = vadd.f32 %v2132_v53, %v3210_v47  ;;  %v3221_v50 = vld [vmem:[#allocation14 + $0x30] sm:$0xff] }
 0x19b   :  { %v2095_v57 = vpop.f32.mrf.mxu0  ;;  %v1895_v58 = vmul.f32 -1.442695, %v923_v52  ;;  %v870_v34 = vpop.f32.mrf.mxu1 }
 0x19c   :  { %2285 = vpow2.f32 %v1858_v54  ;;  %v1857_v59 = vmul.f32 -1.442695, %v556_v55  ;;  %v559_v60 = vadd.f32 %v2095_v57, %v3169_v0  ;;  %v1898_v61 = vmul.f32 -1.442695, %v926_v56 }
 0x19d   :  { %v2266_v62 = vpop.eup %2265  ;;  %v511_v63 = vpop.f32.mrf.mxu0  ;;  %2287 = vpow2.f32 %v1896_v51 }
 0x19e   :  { %v615_v1 = vadd.f32 1.0, %v2266_v62  ;;  %2289 = vpow2.f32 %v1857_v59  ;;  %v1860_v4 = vmul.f32 -1.442695, %v559_v60  ;;  %v558_v14 = vadd.f32 %v511_v63, %v3173_v2  ;;  %v2135_v46 = vpop.f32.mrf.mxu1 }
 0x19f   :  { %v2268_v5 = vpop.eup %2267  ;;  %v2098_v7 = vpop.f32.mrf.mxu0  ;;  %2291 = vpow2.f32 %v1895_v58  ;;  %v925_v59 = vadd.f32 %v870_v34, %v3221_v50 }
 0x1a0   :  { %v2270_v8 = vpop.eup %2269  ;;  %v614_v9 = vadd.f32 1.0, %v2268_v5  ;;  %2293 = vpow2.f32 %v1898_v61  ;;  %v1859_v28 = vmul.f32 -1.442695, %v558_v14  ;;  %v561_v30 = vadd.f32 %v2098_v7, %v3178_v6  ;;  %v880_v60 = vpop.f32.mrf.mxu1 }
 0x1a1   :  { %v2272_v10 = vpop.eup %2271  ;;  %v984_v13 = vadd.f32 1.0, %v2270_v8  ;;  %2295 = vpow2.f32 %v1860_v4  ;;  %v521_v16 = vpop.f32.mrf.mxu0 }
 0x1a2   :  { %v2274_v0 = vpop.eup %2273  ;;  %2297 = vrcp.f32 %v615_v1  ;;  %v617_v17 = vadd.f32 1.0, %v2272_v10  ;;  %v560_v40 = vadd.f32 %v521_v16, %v3184_v11  ;;  %v1862_v42 = vmul.f32 -1.442695, %v561_v30  ;;  %v2138_v14 = vpop.f32.mrf.mxu1 }
 0x1a3   :  { %v2276_v18 = vpop.eup %2275  ;;  %2299 = vrcp.f32 %v614_v9  ;;  %v983_v20 = vadd.f32 1.0, %v2274_v0  ;;  %v2101_v22 = vpop.f32.mrf.mxu0  ;;  %v927_v0 = vadd.f32 %v880_v60, %v3182_v12  ;;  %v930_v12 = vadd.f32 %v2138_v14, %v3186_v15 }
 0x1a4   :  { %v2278_v23 = vpop.eup %2277  ;;  %v616_v24 = vadd.f32 1.0, %v2276_v18  ;;  %2301 = vrcp.f32 %v984_v13  ;;  %v563_v49 = vadd.f32 %v2101_v22, %v3189_v21  ;;  %v1861_v54 = vmul.f32 -1.442695, %v560_v40 }
 0x1a5   :  { %v2280_v25 = vpop.eup %2279  ;;  %2303 = vrcp.f32 %v617_v17  ;;  %v986_v26 = vadd.f32 1.0, %v2278_v23  ;;  %v531_v31 = vpop.f32.mrf.mxu0  ;;  %v1897_v13 = vmul.f32 -1.442695, %v925_v59 }
 0x1a6   :  { %v2282_v33 = vpop.eup %2281  ;;  %v619_v2 = vadd.f32 1.0, %v2280_v25  ;;  %2305 = vrcp.f32 %v983_v20  ;;  %v562_v56 = vadd.f32 %v531_v31, %v3196_v29  ;;  %v1864_v62 = vmul.f32 -1.442695, %v563_v49 }
 0x1a7   :  { %v2284_v35 = vpop.eup %2283  ;;  %2307 = vrcp.f32 %v616_v24  ;;  %v2104_v36 = vpop.f32.mrf.mxu0  ;;  %v985_v39 = vadd.f32 1.0, %v2282_v33  ;;  %v928_v29 = vadd.f32 %v2135_v46, %v3175_v3  ;;  %v3249_v24 = vld [vmem:[#allocation19 + $0x8] sm:$0xff]  ;;  %v1899_v33 = vmul.f32 -1.442695, %v927_v0 }
 0x1a8   :  { %v618_v38 = vadd.f32 1.0, %v2284_v35  ;;  %2309 = vrcp.f32 %v986_v26  ;;  %v565_v63 = vadd.f32 %v2104_v36, %v3201_v37  ;;  %v1863_v8 = vmul.f32 -1.442695, %v562_v56  ;;  %v3261_v35 = vld [vmem:[#allocation19] sm:$0xff] }
 0x1a9   :  { %v2286_v41 = vpop.eup %2285  ;;  %2311 = vpow2.f32 %v1859_v28  ;;  %v541_v19 = vpop.f32.mrf.mxu0  ;;  %v1900_v18 = vmul.f32 -1.442695, %v928_v29 }
 0x1aa   :  { %v2288_v45 = vpop.eup %2287  ;;  %2313 = vrcp.f32 %v619_v2  ;;  %v621_v6 = vadd.f32 1.0, %v2286_v41  ;;  %v1866_v16 = vmul.f32 -1.442695, %v565_v63  ;;  %v564_v23 = vadd.f32 %v541_v19, %v3208_v44  ;;  %v890_v28 = vpop.f32.mrf.mxu1 }
 0x1ab   :  { %v2290_v48 = vpop.eup %2289  ;;  %2315 = vrcp.f32 %v618_v38  ;;  %v2163_v51 = vpop.f32.mrf.mxu0  ;;  %v988_v55 = vadd.f32 1.0, %v2288_v45  ;;  %v929_v15 = vadd.f32 %v890_v28, %v3194_v27  ;;  %v1902_v41 = vmul.f32 -1.442695, %v930_v12  ;;  %v3271_v45 = vld [vmem:[#allocation19 + $0x18] sm:$0xff]  ;;  %v3297_v12 = vld [vmem:[#allocation19 + $0x28] sm:$0xff] }
 0x1ac   :  { %v2292_v52 = vpop.eup %2291  ;;  %v620_v53 = vadd.f32 1.0, %v2290_v48  ;;  %2317 = vrcp.f32 %v985_v39  ;;  %v1289_v44 = vadd.f32 %v2163_v51, %v3249_v24  ;;  %v1865_v38 = vmul.f32 -1.442695, %v564_v23 }
 0x1ad   :  { %v2294_v11 = vpop.eup %2293  ;;  %2319 = vpow2.f32 %v1862_v42  ;;  %v1209_v57 = vpop.f32.mrf.mxu0  ;;  %v987_v5 = vadd.f32 1.0, %v2292_v52  ;;  %v1901_v52 = vmul.f32 -1.442695, %v929_v15 }
 0x1ae   :  { %v2296_v58 = vpop.eup %2295  ;;  %2321 = vrcp.f32 %v621_v6  ;;  %v990_v22 = vadd.f32 1.0, %v2294_v11  ;;  %v1288_v19 = vadd.f32 %v1209_v57, %v3261_v35  ;;  %v2141_v6 = vpop.f32.mrf.mxu1 }
 0x1af   :  { %v3225_v61 = vpop.eup %2297  ;;  %2323 = vrcp.f32 %v620_v53  ;;  %v623_v21 = vadd.f32 1.0, %v2296_v58  ;;  %v3228_v1 = vpop.f32.mrf.mxu0  ;;  %v932_v27 = vadd.f32 %v2141_v6, %v3198_v32 }
 0x1b0   :  { %v3230_v4 = vpop.eup %2299  ;;  %2325 = vpow2.f32 %v1861_v54  ;;  %v1291_v54 = vadd.f32 %v3228_v1, %v3271_v45  ;;  %v900_v56 = vpop.f32.mrf.mxu1 }
 0x1b1   :  { %v3233_v7 = vpop.eup %2301  ;;  %2327 = vrcp.f32 %v988_v55  ;;  %v3235_v9 = vpop.f32.mrf.mxu0  ;;  %v1904_v59 = vmul.f32 -1.442695, %v932_v27  ;;  %v931_v14 = vadd.f32 %v900_v56, %v3206_v43  ;;  %v243_v27 = vld [vmem:[#allocation5] sm:$0xff] }
 0x1b2   :  { %v3237_v10 = vpop.eup %2303  ;;  %2329 = vrcp.f32 %v623_v21 }
 0x1b3   :  { %v3239_v37 = vpop.eup %2305  ;;  %2331 = vpow2.f32 %v1864_v62  ;;  %v3242_v17 = vpop.f32.mrf.mxu0  ;;  %v3288_v62 = vld [vmem:[#allocation19 + $0x10] sm:$0xff]  ;;  %v1903_v15 = vmul.f32 -1.442695, %v931_v14 }
 0x1b4   :  { %v3244_v3 = vpop.eup %2307  ;;  %2333 = vrcp.f32 %v987_v5  ;;  %v2144_v5 = vpop.f32.mrf.mxu1 }
 0x1b5   :  { %v3246_v20 = vpop.eup %2309  ;;  %2335 = vpow2.f32 %v1863_v8  ;;  %v3251_v25 = vpop.f32.mrf.mxu0 }
 0x1b6   :  { %v2312_v26 = vpop.eup %2311  ;;  %2337 = vpow2.f32 %v1897_v13 }
 0x1b7   :  { %v3254_v30 = vpop.eup %2313  ;;  %v622_v31 = vadd.f32 1.0, %v2312_v26  ;;  %2339 = vpow2.f32 %v1866_v16  ;;  %v3256_v2 = vpop.f32.mrf.mxu0 }
 0x1b8   :  { %v3258_v34 = vpop.eup %2315  ;;  %2341 = vpow2.f32 %v1900_v18  ;;  %v244_v18 = vld [vmem:[#allocation5 + $0x8] sm:$0xff] }
 0x1b9   :  { %v3263_v36 = vpop.eup %2317  ;;  %2343 = vrcp.f32 %v990_v22  ;;  %v3266_v39 = vpop.f32.mrf.mxu0  ;;  %v1290_v22 = vadd.f32 %v3235_v9, %v3288_v62 }
 0x1ba   :  { %v2320_v40 = vpop.eup %2319  ;;  %2345 = vrcp.f32 %v622_v31  ;;  %v934_v31 = vadd.f32 %v2144_v5, %v3210_v47 }
 0x1bb   :  { %v3268_v42 = vpop.eup %2321  ;;  %2347 = vpow2.f32 %v1899_v33  ;;  %v3273_v46 = vpop.f32.mrf.mxu0  ;;  %v625_v49 = vadd.f32 1.0, %v2320_v40 }
 0x1bc   :  { %v3275_v48 = vpop.eup %2323  ;;  %2349 = vtanh.f32 %v1289_v44  ;;  %v910_v33 = vpop.f32.mrf.mxu1 }
 0x1bd   :  { %v2326_v51 = vpop.eup %2325  ;;  %2351 = vpow2.f32 %v1865_v38  ;;  %v3284_v57 = vpop.f32.mrf.mxu0  ;;  %v1438_v38 = vmul.f32 %v3233_v7, %v244_v18  ;;  %v1906_v7 = vmul.f32 -1.442695, %v934_v31 }
 0x1be   :  { %v3278_v53 = vpop.eup %2327  ;;  %2353 = vpow2.f32 %v1902_v41  ;;  %v624_v55 = vadd.f32 1.0, %v2326_v51  ;;  %v1293_v41 = vadd.f32 %v3242_v17, %v3297_v12 }
 0x1bf   :  { %v3282_v11 = vpop.eup %2329  ;;  %2355 = vtanh.f32 %v1288_v19  ;;  %v3290_v29 = vpop.f32.mrf.mxu0  ;;  %v3307_v19 = vld [vmem:[#allocation19 + $0x20] sm:$0xff] }
 0x1c0   :  { %v2332_v58 = vpop.eup %2331  ;;  %2357 = vrcp.f32 %v625_v49  ;;  %v933_v49 = vadd.f32 %v910_v33, %v3221_v50  ;;  %v1292_v17 = vadd.f32 %v3251_v25, %v3307_v19  ;;  %v1437_v50 = vmul.f32 %v3239_v37, %v243_v27 }
 0x1c1   :  { %v3286_v32 = vpop.eup %2333  ;;  %v627_v60 = vadd.f32 1.0, %v2332_v58  ;;  %2359 = vpow2.f32 %v1901_v52  ;;  %v3302_v43 = vpop.f32.mrf.mxu0 }
 0x1c2   :  { %v2336_v21 = vpop.eup %2335  ;;  %2361 = vtanh.f32 %v1291_v54  ;;  %v246_v54 = vld [vmem:[#allocation5 + $0x18] sm:$0xff] }
 0x1c3   :  { %v2338_v63 = vpop.eup %2337  ;;  %2363 = vrcp.f32 %v624_v55  ;;  %v626_v1 = vadd.f32 1.0, %v2336_v21  ;;  %v2181_v52 = vpop.f32.mrf.mxu0  ;;  %v1440_v5 = vmul.f32 %v3246_v20, %v246_v54 }
 0x1c4   :  { %v2340_v8 = vpop.eup %2339  ;;  %v989_v13 = vadd.f32 1.0, %v2338_v63  ;;  %2365 = vpow2.f32 %v1904_v59  ;;  %v1054_v59 = vld [vmem:[#allocation19 + $0x38] sm:$0xff]  ;;  %v1905_v63 = vmul.f32 -1.442695, %v933_v49 }
 0x1c5   :  { %v2342_v16 = vpop.eup %2341  ;;  %2367 = vrcp.f32 %v627_v60  ;;  %v629_v0 = vadd.f32 1.0, %v2340_v8  ;;  %v1295_v25 = vadd.f32 %v3256_v2, %v1054_v59  ;;  %v1297_v2 = vadd.f32 %v3273_v46, %v3249_v24 }
 0x1c6   :  { %v3295_v23 = vpop.eup %2343  ;;  %2369 = vrcp.f32 %v626_v1  ;;  %v992_v26 = vadd.f32 1.0, %v2342_v16  ;;  %v1053_v1 = vld [vmem:[#allocation19 + $0x30] sm:$0xff]  ;;  %v1269_v16 = vpop.f32.mrf.mxu0  ;;  %v1298_v46 = vadd.f32 %v3302_v43, %v3288_v62 }
 0x1c7   :  { %v3299_v28 = vpop.eup %2345  ;;  %2371 = vrcp.f32 %v989_v13  ;;  %v1294_v18 = vadd.f32 %v3266_v39, %v1053_v1 }
 0x1c8   :  { %v2348_v44 = vpop.eup %2347  ;;  %2373 = vrcp.f32 %v629_v0  ;;  %v2184_v39 = vpop.f32.mrf.mxu0 }
 0x1c9   :  { %v2350_v9 = vpop.eup %2349  ;;  %v991_v40 = vadd.f32 1.0, %v2348_v44  ;;  %2375 = vtanh.f32 %v1290_v22  ;;  %v1299_v44 = vadd.f32 %v3290_v29, %v3271_v45  ;;  %v1303_v62 = vadd.f32 %v2184_v39, %v1054_v59 }
 0x1ca   :  { %v3309_v6 = vpop.eup %2351  ;;  %2377 = vrcp.f32 %v992_v26  ;;  %v1454_v47 = vmul.f32 %v2350_v9, %v3225_v61 }
 0x1cb   :  { %v2354_v51 = vpop.eup %2353  ;;  %2379 = vrcp.f32 %v991_v40  ;;  %v1300_v40 = vadd.f32 %v1269_v16, %v3307_v19  ;;  %v628_v54 = vadd.f32 1.0, %v3309_v6  ;;  %v252_v6 = vld [vmem:[#allocation5 + $0x48] sm:$0xff] }
 0x1cc   :  { %v2356_v55 = vpop.eup %2355  ;;  %v1470_v56 = vadd.f32 %v1454_v47, %v1438_v38  ;;  %v994_v58 = vadd.f32 1.0, %v2354_v51  ;;  %2381 = vpow2.f32 %v1903_v15  ;;  %v245_v38 = vld [vmem:[#allocation5 + $0x10] sm:$0xff] }
 0x1cd   :  { %v3315_v60 = vpop.eup %2357  ;;  %2383 = vtanh.f32 %v1293_v41  ;;  %v1453_v61 = vmul.f32 %v2356_v55, %v3230_v4  ;;  %v1439_v45 = vmul.f32 %v3263_v36, %v245_v38  ;;  %v1279_v41 = vpop.f32.mrf.mxu0 }
 0x1ce   :  { %v2360_v21 = vpop.eup %2359  ;;  %1774 = vst.msk [vmem:[#allocation26 + $0x8] sm:$0xff] %vm1493_vm2, %v1470_v56  ;;  %2385 = vrcp.f32 %v994_v58 }
 0x1cf   :  { %v2362_v8 = vpop.eup %2361  ;;  %v993_v13 = vadd.f32 1.0, %v2360_v21  ;;  %2387 = vpow2.f32 %v1906_v7  ;;  %v1469_v14 = vadd.f32 %v1453_v61, %v1437_v50  ;;  %v1302_v7 = vadd.f32 %v1279_v41, %v1053_v1 }
 0x1d0   :  { %v3322_v0 = vpop.eup %2363  ;;  %2389 = vtanh.f32 %v1292_v17  ;;  %v1456_v4 = vmul.f32 %v2362_v8, %v3237_v10  ;;  %v1296_v10 = vadd.f32 %v3284_v57, %v3261_v35  ;;  %v1301_v35 = vadd.f32 %v2181_v52, %v3297_v12  ;;  %v248_v57 = vld [vmem:[#allocation5 + $0x28] sm:$0xff] }
 0x1d1   :  { %v2366_v37 = vpop.eup %2365  ;;  %2391 = vrcp.f32 %v993_v13  ;;  %2220 = vmatprep.mubr.msk.f32.mxu1 %vm1493_vm2, %v1469_v14  ;;  %1773 = vst.msk [vmem:[#allocation26] sm:$0xff] %vm1493_vm2, %v1469_v14  ;;  %v1442_v43 = vmul.f32 %v3278_v53, %v248_v57  ;;  %v250_v53 = vld [vmem:[#allocation5 + $0x38] sm:$0xff] }
 0x1d2   :  { %v3328_v20 = vpop.eup %2367  ;;  %v996_v22 = vadd.f32 1.0, %v2366_v37  ;;  %2393 = vpow2.f32 %v1905_v63  ;;  %2221 = vmatmul.mubr.msk.f32.vlgmr.msra.gmra.mxu1 %vm1493_vm2, %v1470_v56  ;;  %v1472_v26 = vadd.f32 %v1456_v4, %v1440_v5  ;;  %v249_v5 = vld [vmem:[#allocation5 + $0x30] sm:$0xff] }
 0x1d3   :  { %v3333_v31 = vpop.eup %2369  ;;  %2395 = vtanh.f32 %v1295_v25  ;;  %v254_v25 = vld [vmem:[#allocation5 + $0x58] sm:$0xff] }
 0x1d4   :  { %v3337_v33 = vpop.eup %2371  ;;  %2397 = vrcp.f32 %v996_v22  ;;  %1776 = vst.msk [vmem:[#allocation26 + $0x18] sm:$0xff] %vm1493_vm2, %v1472_v26 }
 0x1d5   :  { %v3342_v24 = vpop.eup %2373  ;;  %2399 = vtanh.f32 %v1294_v18  ;;  %v256_v18 = vld [vmem:[#allocation5 + $0x68] sm:$0xff] }
 0x1d6   :  { %v2376_v15 = vpop.eup %2375  ;;  %2401 = vtanh.f32 %v1297_v2  ;;  %v253_v2 = vld [vmem:[#allocation5 + $0x50] sm:$0xff] }
 0x1d7   :  { %v2378_v9 = vpop.eup %2377  ;;  %2403 = vtanh.f32 %v1296_v10  ;;  %v1455_v29 = vmul.f32 %v2376_v15, %v3244_v3  ;;  %v247_v3 = vld [vmem:[#allocation5 + $0x20] sm:$0xff] }
 0x1d8   :  { %v2380_v47 = vpop.eup %2379  ;;  %2405 = vtanh.f32 %v1299_v44  ;;  %v1441_v59 = vmul.f32 %v3286_v32, %v247_v3  ;;  %v1446_v32 = vmul.f32 %v2378_v9, %v252_v6 }
 0x1d9   :  { %v2382_v49 = vpop.eup %2381  ;;  %2407 = vtanh.f32 %v1298_v46  ;;  %v1471_v27 = vadd.f32 %v1455_v29, %v1439_v45 }
 0x1da   :  { %v2384_v51 = vpop.eup %2383  ;;  %v995_v12 = vadd.f32 1.0, %v2382_v49  ;;  %2409 = vtanh.f32 %v1301_v35 }
 0x1db   :  { %v2386_v52 = vpop.eup %2385  ;;  %2411 = vtanh.f32 %v1300_v40  ;;  %2223 = vmatprep.mubr.msk.f32.mxu1 %vm1493_vm2, %v1471_v27  ;;  %1775 = vst.msk [vmem:[#allocation26 + $0x10] sm:$0xff] %vm1493_vm2, %v1471_v27  ;;  %v1458_v36 = vmul.f32 %v2384_v51, %v3254_v30  ;;  %v1444_v30 = vmul.f32 %v3295_v23, %v250_v53  ;;  %v1443_v23 = vmul.f32 %v3337_v33, %v249_v5  ;;  %v255_v40 = vld [vmem:[#allocation5 + $0x60] sm:$0xff]  ;;  %v3393_v53 = vpop.f32.mrf.mxu0 }
 0x1dc   :  { %v2388_v19 = vpop.eup %2387  ;;  %2413 = vrcp.f32 %v995_v12  ;;  %2224 = vmatmul.mubr.msk.f32.gmra.mxu1 %vm1493_vm2, %v1472_v26  ;;  %v1448_v26 = vmul.f32 %v2386_v52, %v254_v25 }
 0x1dd   :  { %v2390_v55 = vpop.eup %2389  ;;  %v998_v56 = vadd.f32 1.0, %v2388_v19  ;;  %2415 = vtanh.f32 %v1303_v62  ;;  %v1474_v58 = vadd.f32 %v1458_v36, %v1442_v43  ;;  %v258_v62 = vld [vmem:[#allocation5 + $0x78] sm:$0xff] }
 0x1de   :  { %v2392_v17 = vpop.eup %2391  ;;  %2417 = vtanh.f32 %v1302_v7  ;;  %v1457_v50 = vmul.f32 %v2390_v55, %v3258_v34  ;;  %v251_v34 = vld [vmem:[#allocation5 + $0x40] sm:$0xff]  ;;  %v2203_v55 = vpop.f32.mrf.mxu0 }
 0x1df   :  { %v2394_v61 = vpop.eup %2393  ;;  %2419 = vrcp.f32 %v998_v56  ;;  %1778 = vst.msk [vmem:[#allocation26 + $0x28] sm:$0xff] %vm1493_vm2, %v1474_v58  ;;  %v1445_v44 = vmul.f32 %v2380_v47, %v251_v34  ;;  %v1447_v57 = vmul.f32 %v2392_v17, %v253_v2 }
 0x1e0   :  { %v2396_v21 = vpop.eup %2395  ;;  %2421 = vrcp.f32 %v628_v54  ;;  %v997_v63 = vadd.f32 1.0, %v2394_v61  ;;  %v1473_v1 = vadd.f32 %v1457_v50, %v1441_v59 }
 0x1e1   :  { %v2398_v8 = vpop.eup %2397  ;;  %v1460_v13 = vmul.f32 %v2396_v21, %v3268_v42 }
 0x1e2   :  { %v2400_v14 = vpop.eup %2399  ;;  %2423 = vrcp.f32 %v997_v63  ;;  %2226 = vmatprep.mubr.msk.f32.mxu1 %vm1493_vm2, %v1473_v1  ;;  %1777 = vst.msk [vmem:[#allocation26 + $0x20] sm:$0xff] %vm1493_vm2, %v1473_v1  ;;  %v1450_v35 = vmul.f32 %v2398_v8, %v256_v18 }
 0x1e3   :  { %v2402_v16 = vpop.eup %2401  ;;  %2227 = vmatmul.mubr.msk.f32.gmra.mxu1 %vm1493_vm2, %v1474_v58  ;;  %v1459_v4 = vmul.f32 %v2400_v14, %v3275_v48  ;;  %v1476_v37 = vadd.f32 %v1460_v13, %v1444_v30 }
 0x1e4   :  { %v2404_v22 = vpop.eup %2403  ;;  %v1462_v42 = vmul.f32 %v2402_v16, %v3282_v11 }
 0x1e5   :  { %v2406_v10 = vpop.eup %2405  ;;  %v1475_v39 = vadd.f32 %v1459_v4, %v1443_v23  ;;  %1780 = vst.msk [vmem:[#allocation26 + $0x38] sm:$0xff] %vm1493_vm2, %v1476_v37  ;;  %v1461_v38 = vmul.f32 %v2404_v22, %v3299_v28 }
 0x1e6   :  { %v2408_v46 = vpop.eup %2407  ;;  %v1478_v15 = vadd.f32 %v1462_v42, %v1446_v32  ;;  %v1464_v33 = vmul.f32 %v2406_v10, %v3315_v60 }
 0x1e7   :  { %v2410_v48 = vpop.eup %2409  ;;  %2229 = vmatprep.mubr.msk.f32.mxu1 %vm1493_vm2, %v1475_v39  ;;  %1779 = vst.msk [vmem:[#allocation26 + $0x30] sm:$0xff] %vm1493_vm2, %v1475_v39  ;;  %v1477_v11 = vadd.f32 %v1461_v38, %v1445_v44  ;;  %v1463_v9 = vmul.f32 %v2408_v46, %v3322_v0 }
 0x1e8   :  { %v2412_v45 = vpop.eup %2411  ;;  %2230 = vmatmul.mubr.msk.f32.gmra.mxu1 %vm1493_vm2, %v1476_v37  ;;  %1782 = vst.msk [vmem:[#allocation26 + $0x48] sm:$0xff] %vm1493_vm2, %v1478_v15  ;;  %v1480_v28 = vadd.f32 %v1464_v33, %v1448_v26  ;;  %v1466_v29 = vmul.f32 %v2410_v48, %v3328_v20 }
 0x1e9   :  { %v2414_v60 = vpop.eup %2413  ;;  %2232 = vmatprep.mubr.msk.f32.mxu1 %vm1493_vm2, %v1477_v11  ;;  %1781 = vst.msk [vmem:[#allocation26 + $0x40] sm:$0xff] %vm1493_vm2, %v1477_v11  ;;  %v1479_v41 = vadd.f32 %v1463_v9, %v1447_v57  ;;  %v1465_v47 = vmul.f32 %v2412_v45, %v3333_v31  ;;  %v257_v31 = vld [vmem:[#allocation5 + $0x70] sm:$0xff] }
 0x1ea   :  { %v2416_v49 = vpop.eup %2415  ;;  %1784 = vst.msk [vmem:[#allocation26 + $0x58] sm:$0xff] %vm1493_vm2, %v1480_v28  ;;  %v1449_v0 = vmul.f32 %v2414_v60, %v255_v40  ;;  %v1482_v27 = vadd.f32 %v1466_v29, %v1450_v35 }
 0x1eb   :  { %v2418_v43 = vpop.eup %2417  ;;  %1783 = vst.msk [vmem:[#allocation26 + $0x50] sm:$0xff] %vm1493_vm2, %v1479_v41  ;;  %v1468_v51 = vmul.f32 %v2416_v49, %v3342_v24 }
 0x1ec   :  { %v2420_v20 = vpop.eup %2419  ;;  %2233 = vmatmul.mubr.msk.f32.gmra.mxu1 %vm1493_vm2, %v1478_v15  ;;  %v1481_v12 = vadd.f32 %v1465_v47, %v1449_v0  ;;  %1786 = vst.msk [vmem:[#allocation26 + $0x68] sm:$0xff] %vm1493_vm2, %v1482_v27 }
 0x1ed   :  { %v2422_v7 = vpop.eup %2421  ;;  %2235 = vmatprep.mubr.msk.f32.mxu1 %vm1493_vm2, %v1479_v41  ;;  %v1452_v52 = vmul.f32 %v2420_v20, %v258_v62 }
 0x1ee   :  { %1785 = vst.msk [vmem:[#allocation26 + $0x60] sm:$0xff] %vm1493_vm2, %v1481_v12  ;;  %v1467_v3 = vmul.f32 %v2422_v7, %v2418_v43 }
 0x1ef   :  { %v2424_v36 = vpop.eup %2423  ;;  %v1484_v19 = vadd.f32 %v1468_v51, %v1452_v52 }
 0x1f0   :  { %2236 = vmatmul.mubr.msk.f32.gmra.mxu1 %vm1493_vm2, %v1480_v28  ;;  %v1451_v54 = vmul.f32 %v2424_v36, %v257_v31 }
 0x1f1   :  { %2238 = vmatprep.mubr.msk.f32.mxu1 %vm1493_vm2, %v1481_v12  ;;  %1788 = vst.msk [vmem:[#allocation26 + $0x78] sm:$0xff] %vm1493_vm2, %v1484_v19 }
 0x1f2   :  { %v1483_v24 = vadd.f32 %v1467_v3, %v1451_v54 }
 0x1f4   :  { %2239 = vmatmul.mubr.msk.f32.gmra.mxu1 %vm1493_vm2, %v1482_v27  ;;  %1787 = vst.msk [vmem:[#allocation26 + $0x70] sm:$0xff] %vm1493_vm2, %v1483_v24 }
 0x1f5   :  { %2241 = vmatprep.mubr.msk.f32.mxu1 %vm1493_vm2, %v1483_v24 }
 0x1f8   :  { %2242 = vmatmul.mubr.msk.f32.gmra.mxu1 %vm1493_vm2, %v1484_v19 }
 0x1f9   :  { %2728 = shalt.err (!%p2725_p4)
}
 0x1fa   :  { %1810 = dma.vmem_to_hbm [thread:$0]  %s1805_s14, 2048, %s3440_s16, [#allocation27], %s2778_s24, %s2778_s24, %s2779_s25   ;;  %v1687_v17 = vld [vmem:[#allocation23] sm:$0xff]  ;;  %v1688_v59 = vld [vmem:[#allocation23 + $0x8] sm:$0xff]  ;;  %v1689_v6 = vld [vmem:[#allocation23 + $0x10] sm:$0xff]  ;;  %vm1767_vm3 = vcmask 1041409  }
 0x1fb   :  { %v1690_v63 = vld [vmem:[#allocation23 + $0x18] sm:$0xff]  ;;  %v1692_v16 = vld [vmem:[#allocation23 + $0x28] sm:$0xff]  ;;  %v1691_v23 = vld [vmem:[#allocation23 + $0x20] sm:$0xff]  ;;  %vm1771_vm4 = vcmask 517120  }
 0x1fc   :  { %v1694_v10 = vld [vmem:[#allocation23 + $0x38] sm:$0xff]  ;;  %v1693_v39 = vld [vmem:[#allocation23 + $0x30] sm:$0xff] }
 0x292   :  { %v2222_v56 = vpop.f32.mrf.mxu1 }
 0x293   :  { %v1696_v61 = vmul.f32 %v2222_v56, %v1688_v59 }
 0x294   :  { %v1608_v58 = vpop.f32.mrf.mxu1 }
 0x295   :  { %v1695_v50 = vmul.f32 %v1687_v17, %v1608_v58  ;;  %v1712_v5 = vsel %vm1493_vm2, %v1696_v61, 0.0 }
 0x297   :  { %v1711_v21 = vsel %vm1493_vm2, %v1695_v50, 0.0 }
 0x298   :  { %v1713_v13 = vadd.f32 %v1712_v5, %v1711_v21 }
 0x29c   :  { %v2225_v30 = vpop.f32.mrf.mxu1 }
 0x29d   :  { %v1698_v25 = vmul.f32 %v2225_v30, %v1690_v63 }
 0x29e   :  { %v1618_v1 = vpop.f32.mrf.mxu1 }
 0x29f   :  { %v1697_v8 = vmul.f32 %v1689_v6, %v1618_v1  ;;  %v1716_v4 = vsel %vm1493_vm2, %v1698_v25, 0.0 }
 0x2a1   :  { %v1714_v14 = vsel %vm1493_vm2, %v1697_v8, 0.0  ;;  %v1931_v8 = vld [vmem:[%s3436_s12] ss:$0 sm:$0xff]  ;;  %s2797_s12 = smov [#allocation25]  }
 0x2a2   :  { %v1715_v34 = vadd.f32 %v1714_v14, %v1713_v13  ;;  %v1428_v25 = vadd.f32 %v1931_v8, %v3393_v53  ;;  %s1795_s25 = sshll.u32 %s2797_s12, 4  ;;  %s1796_s25 = int_to_ptr.vmem [resolvable:$true] %s1795_s25 }
 0x2a3   :  { %v2228_v32 = vpop.f32.mrf.mxu1  ;;  %s2737_s20 = scalar_lea.vmem %s1796_s25, 32  ;;  %p2742_p6 = scmp.lt.s32.totalorder %s1796_s25, %s1796_s25 }
 0x2a4   :  { %v1717_v18 = vadd.f32 %v1716_v4, %v1715_v34  ;;  %v1700_v22 = vmul.f32 %v2228_v32, %v1692_v16  ;;  %p2738_p5 = scmp.ne.s32.totalorder %s1796_s25, %s2737_s20  ;;  %p2743_p7 = scmp.lt.s32.totalorder %s2737_s20, %s2737_s20 }
 0x2a5   :  { %v1628_v37 = vpop.f32.mrf.mxu1 }
 0x2a6   :  { %v1699_v42 = vmul.f32 %v1691_v23, %v1628_v37  ;;  %v1720_v38 = vsel %vm1493_vm2, %v1700_v22, 0.0  ;;  %p2744_p8 = por %p2743_p7, %p2742_p6 }
 0x2a8   :  { %v1718_v2 = vsel %vm1493_vm2, %v1699_v42, 0.0  ;;  %v2231_v26 = vpop.f32.mrf.mxu1  ;;  %p2745_p9 = pnand %p2744_p8, %p2738_p5 }
 0x2a9   :  { %v1719_v44 = vadd.f32 %v1718_v2, %v1717_v18  ;;  %v1702_v15 = vmul.f32 %v2231_v26, %v1694_v10 }
 0x2aa   :  { %v1638_v46 = vpop.f32.mrf.mxu1 }
 0x2ab   :  { %v1701_v33 = vmul.f32 %v1693_v39, %v1638_v46  ;;  %v1721_v35 = vadd.f32 %v1720_v38, %v1719_v44  ;;  %v1724_v40 = vsel %vm1493_vm2, %v1702_v15, 0.0 }
 0x2ac   :  { %v2234_v48 = vpop.f32.mrf.mxu1 }
 0x2ad   :  { %v1722_v11 = vsel %vm1493_vm2, %v1701_v33, 0.0  ;;  %v1704_v45 = vmul.f32 %v2234_v48, %v1688_v59 }
 0x2ae   :  { %v1723_v57 = vadd.f32 %v1722_v11, %v1721_v35  ;;  %v1648_v9 = vpop.f32.mrf.mxu1 }
 0x2af   :  { %v1703_v28 = vmul.f32 %v1687_v17, %v1648_v9  ;;  %v1733_v0 = vsel %vm1493_vm2, %v1704_v45, 0.0 }
 0x2b0   :  { %v1725_v29 = vadd.f32 %v1724_v40, %v1723_v57  ;;  %v2237_v60 = vpop.f32.mrf.mxu1 }
 0x2b1   :  { %v1732_v41 = vsel %vm1493_vm2, %v1703_v28, 0.0  ;;  %v1706_v27 = vmul.f32 %v2237_v60, %v1690_v63 }
 0x2b2   :  { %v1726_v47 = vrot.slane %v1725_v29, 4  ;;  %v1658_v49 = vpop.f32.mrf.mxu1  ;;  %v1734_v51 = vadd.f32 %v1733_v0, %v1732_v41 }
 0x2b3   :  { %v1705_v62 = vmul.f32 %v1689_v6, %v1658_v49  ;;  %v1737_v52 = vsel %vm1493_vm2, %v1706_v27, 0.0 }
 0x2b4   :  { %v1727_v43 = vadd.f32 %v1726_v47, %v1725_v29  ;;  %v2240_v20 = vpop.f32.mrf.mxu1 }
 0x2b5   :  { %v1735_v12 = vsel %vm1493_vm2, %v1705_v62, 0.0  ;;  %v1708_v3 = vmul.f32 %v2240_v20, %v1692_v16  ;;  %v1941_v16 = vmul.f32 -1.442695, %v1428_v25 }
 0x2b6   :  { %v1736_v7 = vadd.f32 %v1735_v12, %v1734_v51  ;;  %v1668_v31 = vpop.f32.mrf.mxu1  ;;  %v1728_v19 = vrot.slane %v1727_v43, 2 }
 0x2b7   :  { %v1707_v36 = vmul.f32 %v1691_v23, %v1668_v31  ;;  %v1741_v17 = vsel %vm1493_vm2, %v1708_v3, 0.0  ;;  %2425 = vpow2.f32 %v1941_v16 }
 0x2b8   :  { %v1738_v54 = vadd.f32 %v1737_v52, %v1736_v7  ;;  %v2243_v24 = vpop.f32.mrf.mxu1  ;;  %v1729_v61 = vadd.f32 %v1728_v19, %v1727_v43 }
 0x2b9   :  { %v1739_v55 = vsel %vm1493_vm2, %v1707_v36, 0.0  ;;  %v1710_v59 = vmul.f32 %v2243_v24, %v1694_v10 }
 0x2ba   :  { %v1740_v56 = vadd.f32 %v1739_v55, %v1738_v54  ;;  %v1678_v58 = vpop.f32.mrf.mxu1  ;;  %v1730_v1 = vrot.slane %v1729_v61, 1 }
 0x2bb   :  { %v1709_v50 = vmul.f32 %v1693_v39, %v1678_v58  ;;  %v1745_v63 = vsel %vm1493_vm2, %v1710_v59, 0.0 }
 0x2bc   :  { %v1742_v30 = vadd.f32 %v1741_v17, %v1740_v56  ;;  %v1731_v14 = vadd.f32 %v1730_v1, %v1729_v61 }
 0x2bd   :  { %v1743_v6 = vsel %vm1493_vm2, %v1709_v50, 0.0 }
 0x2be   :  { %v1744_v21 = vadd.f32 %v1743_v6, %v1742_v30  ;;  %v1958_v23 = vmul.f32 -1.442695, %v1731_v14 }
 0x2c0   :  { %v1746_v5 = vadd.f32 %v1745_v63, %v1744_v21  ;;  %2427 = vpow2.f32 %v1958_v23 }
 0x2c2   :  { %v1747_v13 = vrot.slane %v1746_v5, 4 }
 0x2c4   :  { %v1748_v34 = vadd.f32 %v1747_v13, %v1746_v5  ;;  %v2426_v42 = vpop.eup %2425 }
 0x2c5   :  { %v1434_v26 = vadd.f32 1.0, %v2426_v42 }
 0x2c6   :  { %v1749_v32 = vrot.slane %v1748_v34, 2 }
 0x2c8   :  { %v1750_v4 = vadd.f32 %v1749_v32, %v1748_v34 }
 0x2ca   :  { %v1751_v37 = vrot.slane %v1750_v4, 1 }
 0x2cc   :  { %v1752_v18 = vadd.f32 %v1751_v37, %v1750_v4 }
 0x2cd   :  { %v2428_v2 = vpop.eup %2427 }
 0x2ce   :  { %v1959_v22 = vmul.f32 -1.442695, %v1752_v18  ;;  %v1759_v10 = vadd.f32 1.0, %v2428_v2 }
 0x2d0   :  { %2429 = vpow2.f32 %v1959_v22 }
 0x2d1   :  { %2431 = vrcp.f32 %v1434_v26 }
 0x2d2   :  { %2433 = vrcp.f32 %v1759_v10 }
 0x2dd   :  { %v2430_v39 = vpop.eup %2429 }
 0x2de   :  { %v1760_v44 = vadd.f32 1.0, %v2430_v39  ;;  %v2432_v53 = vpop.eup %2431 }
 0x2df   :  { %v2434_v38 = vpop.eup %2433 }
 0x2e0   :  { %2435 = vrcp.f32 %v1760_v44 }
 0x2ed   :  { %v2436_v46 = vpop.eup %2435 }
 0x2ee   :  { %v1768_v15 = vsel %vm1767_vm3, %v2436_v46, %v2434_v38 }
 0x2ef   :  { %v1770_v33 = vmul.f32 %v2432_v53, %v1768_v15 }
 0x2f1   :  { %1772 = vst.msk [vmem:[#allocation25] sm:$0x3] %vm1771_vm4, %v1770_v33 }
 0x2f2   :  { %2748 = shalt.err (!%p2745_p9)
}
 0x2f3   :  { %1798 = dma.vmem_to_hbm [thread:$0]  %s1796_s25, 32, %s3439_s15, [#allocation4]  }
 0x2f4   :  { %2773 = dma.done.wait [#allocation4], 32  }
 0x2f5   :  { %2774 = vsyncadd [#allocation4], 4294967264 }
 0x2f6   :  { %2775 = dma.done.wait [#allocation27], 2048  }
 0x2f7   :  { %2776 = vsyncadd [#allocation27], 4294965248 }
 0x2f8   :  { %1817 = vsyncpa [#allocation3], 1 }
 0x2f9   :  { %1818 = vsyncpa [#allocation6], 1 }
 0x2fa   :  { %1819 = vsyncpa [#allocation9], 1 }
 0x2fb   :  { %1820 = vsyncpa [#allocation12], 1 }
 0x2fc   :  { %1821 = vsyncpa [#allocation15], 1 }
 0x2fd   :  { %1822 = vsyncpa [#allocation18], 1 }
 0x2fe   :  { %1823 = vsyncpa [#allocation21], 1 }
 0x2ff   :  { %1824 = vsyncpa [#allocation24], 1 }
 0x300   :  { %1825 = vsyncpa [#allocation4], 1 }
 0x301   :  { %1826 = vsyncpa [#allocation27], 1 }

// kernel: tpu_custom_call.1
= control target key start
LH: loop header
LB: loop body
LE: loop exit
PB: predicated region body
PF: predicated region fallthrough
CT: control target
= control target key end

     0   :  { %s3424_s0 = inlined_call_operand.hbm [shape: f32[2,68], index: 0, kind: input, shape index: {}]   ;;  %s3425_s1 = inlined_call_operand.hbm [shape: f32[2,64,64], index: 1, kind: input, shape index: {}]   ;;  %s3426_s2 = inlined_call_operand.hbm [shape: f32[64,68], index: 2, kind: input, shape index: {}]   ;;  %s3427_s3 = inlined_call_operand.hbm [shape: f32[64,68], index: 3, kind: input, shape index: {}]   ;;  %s3428_s4 = inlined_call_operand.hbm [shape: f32[64,64], index: 4, kind: input, shape index: {}]   ;;  %s3429_s5 = inlined_call_operand.hbm [shape: f32[64,68], index: 5, kind: input, shape index: {}]   ;;  %s3430_s6 = inlined_call_operand.hbm [shape: f32[64,68], index: 6, kind: input, shape index: {}]   ;;  %s3431_s7 = inlined_call_operand.hbm [shape: f32[64,64], index: 7, kind: input, shape index: {}]   ;;  %s3432_s8 = inlined_call_operand.hbm [shape: f32[64,68], index: 8, kind: input, shape index: {}]   ;;  %s3433_s9 = inlined_call_operand.hbm [shape: f32[64,68], index: 9, kind: input, shape index: {}]   ;;  %s3434_s10 = inlined_call_operand.hbm [shape: f32[64,64], index: 10, kind: input, shape index: {}]   ;;  %s3435_s11 = inlined_call_operand.hbm [shape: f32[64,68], index: 11, kind: input, shape index: {}]   ;;  %s3436_s12 = inlined_call_operand.vmem [shape: f32[1,64], index: 12, kind: input, shape index: {}]   ;;  %s3437_s13 = inlined_call_operand.hbm [shape: f32[64,64], index: 13, kind: input, shape index: {}]   ;;  %s3438_s14 = inlined_call_operand.hbm [shape: f32[64,64], index: 14, kind: input, shape index: {}]   ;;  %s3439_s15 = inlined_call_operand.hbm [shape: f32[2,64], index: 15, kind: output, shape index: {0}]   ;;  %s3440_s16 = inlined_call_operand.hbm [shape: f32[2,64,64], index: 16, kind: output, shape index: {1}]  }
   0x1   :  { %3441 = sst [smem:[#allocation38_spill]] %s3424_s0 }
   0x2   :  { %22 = vsyncpa [#allocation3], 0 }
   0x3   :  { %23 = vsyncpa [#allocation6], 0 }
   0x4   :  { %24 = vsyncpa [#allocation9], 0 }
   0x5   :  { %25 = vsyncpa [#allocation12], 0 }
   0x6   :  { %26 = vsyncpa [#allocation15], 0 }
   0x7   :  { %27 = vsyncpa [#allocation18], 0 }
   0x8   :  { %28 = vsyncpa [#allocation21], 0 }
   0x9   :  { %29 = vsyncpa [#allocation24], 0 }
   0xa   :  { %30 = vsyncpa [#allocation4], 0 }
   0xb   :  { %31 = vsyncpa [#allocation27], 0  ;;  %s2777_s21 = smov [#allocation5]  }
   0xc   :  { %s47_s22 = sshll.u32 %s2777_s21, 4  ;;  %s48_s22 = int_to_ptr.vmem [resolvable:$true] %s47_s22 }
   0xd   :  { %s2445_s23 = scalar_lea.vmem %s48_s22, 2048  ;;  %p2450_p1 = scmp.lt.s32.totalorder %s48_s22, %s48_s22 }
   0xe   :  { %p2446_p0 = scmp.ne.s32.totalorder %s48_s22, %s2445_s23  ;;  %p2451_p2 = scmp.lt.s32.totalorder %s2445_s23, %s2445_s23 }
  0x10   :  { %p2452_p3 = por %p2451_p2, %p2450_p1 }
  0x12   :  { %p2453_p4 = pnand %p2452_p3, %p2446_p0 }
  0x14   :  { %2456 = shalt.err (!%p2453_p4)
}
  0x15   :  { %s2778_s24 = smov 128   ;;  %s2779_s25 = smov 8  }
  0x16   :  { %53 = dma.hbm_to_vmem [thread:$0]  %s3425_s1, 2048, %s48_s22, [#allocation6], %s2778_s24, %s2778_s24, %s2779_s25  }
  0x17   :  { %s2780_s28 = smov [#allocation8]   ;;  %s2781_s30 = smov [#allocation11]  }
  0x18   :  { %s71_s29 = sshll.u32 %s2780_s28, 4  ;;  %s95_s0 = sshll.u32 %s2781_s30, 4  ;;  %s72_s29 = int_to_ptr.vmem [resolvable:$true] %s71_s29  ;;  %s96_s0 = int_to_ptr.vmem [resolvable:$true] %s95_s0 }
  0x19   :  { %s2465_s17 = scalar_lea.vmem %s72_s29, 1024  ;;  %p2470_p6 = scmp.lt.s32.totalorder %s72_s29, %s72_s29 }
  0x1a   :  { %p2466_p5 = scmp.ne.s32.totalorder %s72_s29, %s2465_s17  ;;  %p2471_p7 = scmp.lt.s32.totalorder %s2465_s17, %s2465_s17 }
  0x1c   :  { %p2472_p8 = por %p2471_p7, %p2470_p6 }
  0x1e   :  { %p2473_p9 = pnand %p2472_p8, %p2466_p5 }
  0x20   :  { %2476 = shalt.err (!%p2473_p9)
}
  0x21   :  { %77 = dma.hbm_to_vmem [thread:$0]  %s3427_s3, 1024, %s72_s29, [#allocation9], %s2778_s24, %s2778_s24, %s2779_s25  }
  0x22   :  { %s2485_s1 = scalar_lea.vmem %s96_s0, 1024  ;;  %p2490_p11 = scmp.lt.s32.totalorder %s96_s0, %s96_s0 }
  0x23   :  { %p2486_p10 = scmp.ne.s32.totalorder %s96_s0, %s2485_s1  ;;  %p2491_p12 = scmp.lt.s32.totalorder %s2485_s1, %s2485_s1 }
  0x25   :  { %p2492_p13 = por %p2491_p12, %p2490_p11 }
  0x27   :  { %p2493_p0 = pnand %p2492_p13, %p2486_p10 }
  0x29   :  { %2496 = shalt.err (!%p2493_p0)
}
  0x2a   :  { %101 = dma.hbm_to_vmem [thread:$0]  %s3429_s5, 1024, %s96_s0, [#allocation12], %s2778_s24, %s2778_s24, %s2779_s25  }
  0x2b   :  { %s2782_s22 = smov [#allocation14]   ;;  %s2783_s26 = smov [#allocation17]  }
  0x2c   :  { %s119_s23 = sshll.u32 %s2782_s22, 4  ;;  %s143_s3 = sshll.u32 %s2783_s26, 4  ;;  %s120_s23 = int_to_ptr.vmem [resolvable:$true] %s119_s23  ;;  %s144_s3 = int_to_ptr.vmem [resolvable:$true] %s143_s3 }
  0x2d   :  { %s2505_s27 = scalar_lea.vmem %s120_s23, 1024  ;;  %p2510_p2 = scmp.lt.s32.totalorder %s120_s23, %s120_s23 }
  0x2e   :  { %p2506_p1 = scmp.ne.s32.totalorder %s120_s23, %s2505_s27  ;;  %p2511_p3 = scmp.lt.s32.totalorder %s2505_s27, %s2505_s27 }
  0x30   :  { %p2512_p4 = por %p2511_p3, %p2510_p2 }
  0x32   :  { %p2513_p5 = pnand %p2512_p4, %p2506_p1 }
  0x34   :  { %2516 = shalt.err (!%p2513_p5)
}
  0x35   :  { %125 = dma.hbm_to_vmem [thread:$0]  %s3431_s7, 1024, %s120_s23, [#allocation15], %s2778_s24, %s2778_s24, %s2779_s25  }
  0x36   :  { %s2525_s5 = scalar_lea.vmem %s144_s3, 1024  ;;  %p2530_p7 = scmp.lt.s32.totalorder %s144_s3, %s144_s3 }
  0x37   :  { %p2526_p6 = scmp.ne.s32.totalorder %s144_s3, %s2525_s5  ;;  %p2531_p8 = scmp.lt.s32.totalorder %s2525_s5, %s2525_s5 }
  0x39   :  { %p2532_p9 = por %p2531_p8, %p2530_p7 }
  0x3b   :  { %p2533_p10 = pnand %p2532_p9, %p2526_p6 }
  0x3d   :  { %2536 = shalt.err (!%p2533_p10)
}
  0x3e   :  { %149 = dma.hbm_to_vmem [thread:$0]  %s3433_s9, 1024, %s144_s3, [#allocation18], %s2778_s24, %s2778_s24, %s2779_s25  }
  0x3f   :  { %s2784_s17 = smov [#allocation20]   ;;  %s2785_s19 = smov [#allocation2]  }
  0x40   :  { %s167_s18 = sshll.u32 %s2784_s17, 4  ;;  %s38_s7 = sshll.u32 %s2785_s19, 4  ;;  %s168_s18 = int_to_ptr.vmem [resolvable:$true] %s167_s18  ;;  %s39_s7 = int_to_ptr.vmem [resolvable:$true] %s38_s7 }
  0x41   :  { %s2545_s1 = scalar_lea.vmem %s168_s18, 1024  ;;  %p2550_p12 = scmp.lt.s32.totalorder %s168_s18, %s168_s18 }
  0x42   :  { %p2546_p11 = scmp.ne.s32.totalorder %s168_s18, %s2545_s1  ;;  %p2551_p13 = scmp.lt.s32.totalorder %s2545_s1, %s2545_s1 }
  0x44   :  { %p2552_p0 = por %p2551_p13, %p2550_p12 }
  0x46   :  { %p2553_p1 = pnand %p2552_p0, %p2546_p11 }
  0x48   :  { %2556 = shalt.err (!%p2553_p1)
}
  0x49   :  { %173 = dma.hbm_to_vmem [thread:$0]  %s3435_s11, 1024, %s168_s18, [#allocation21], %s2778_s24, %s2778_s24, %s2779_s25  }
  0x4a   :  { %s2565_s9 = scalar_lea.vmem %s39_s7, 32  ;;  %p2570_p3 = scmp.lt.s32.totalorder %s39_s7, %s39_s7 }
  0x4b   :  { %p2566_p2 = scmp.ne.s32.totalorder %s39_s7, %s2565_s9  ;;  %p2571_p4 = scmp.lt.s32.totalorder %s2565_s9, %s2565_s9 }
  0x4d   :  { %p2572_p5 = por %p2571_p4, %p2570_p3 }
  0x4f   :  { %p2573_p6 = pnand %p2572_p5, %p2566_p2 }
  0x51   :  { %2576 = shalt.err (!%p2573_p6)
}
  0x52   :  { %s3442_s26 = sld [smem:[#allocation38_spill]]  ;;  %s2786_s3 = smov [#allocation7]  }
  0x53   :  { %s59_s27 = sshll.u32 %s2786_s3, 4  ;;  %s2787_s28 = smov [#allocation10]   ;;  %s60_s27 = int_to_ptr.vmem [resolvable:$true] %s59_s27 }
  0x54   :  { %s83_s29 = sshll.u32 %s2787_s28, 4  ;;  %s2585_s5 = scalar_lea.vmem %s60_s27, 1024  ;;  %s84_s29 = int_to_ptr.vmem [resolvable:$true] %s83_s29 }
  0x55   :  { %p2586_p7 = scmp.ne.s32.totalorder %s60_s27, %s2585_s5  ;;  %p2590_p8 = scmp.lt.s32.totalorder %s60_s27, %s60_s27 }
  0x56   :  { %p2591_p9 = scmp.lt.s32.totalorder %s2585_s5, %s2585_s5 }
  0x58   :  { %41 = dma.hbm_to_vmem [thread:$0]  %s3442_s26, 32, %s39_s7, [#allocation3]  }
  0x59   :  { %p2592_p10 = por %p2591_p9, %p2590_p8 }
  0x5b   :  { %p2593_p11 = pnand %p2592_p10, %p2586_p7 }
  0x5d   :  { %2596 = shalt.err (!%p2593_p11)
}
  0x5e   :  { %65 = dma.hbm_to_vmem [thread:$0]  %s3426_s2, 1024, %s60_s27, [#allocation6], %s2778_s24, %s2778_s24, %s2779_s25  }
  0x5f   :  { %s2605_s0 = scalar_lea.vmem %s84_s29, 1024  ;;  %p2610_p13 = scmp.lt.s32.totalorder %s84_s29, %s84_s29 }
  0x60   :  { %p2606_p12 = scmp.ne.s32.totalorder %s84_s29, %s2605_s0  ;;  %p2611_p0 = scmp.lt.s32.totalorder %s2605_s0, %s2605_s0 }
  0x62   :  { %p2612_p1 = por %p2611_p0, %p2610_p13 }
  0x64   :  { %p2613_p2 = pnand %p2612_p1, %p2606_p12 }
  0x66   :  { %2616 = shalt.err (!%p2613_p2)
}
  0x67   :  { %89 = dma.hbm_to_vmem [thread:$0]  %s3428_s4, 1024, %s84_s29, [#allocation9], %s2778_s24, %s2778_s24, %s2779_s25  }
  0x68   :  { %s2788_s19 = smov [#allocation13]   ;;  %s2789_s1 = smov [#allocation16]  }
  0x69   :  { %s107_s7 = sshll.u32 %s2788_s19, 4  ;;  %s131_s2 = sshll.u32 %s2789_s1, 4  ;;  %s108_s7 = int_to_ptr.vmem [resolvable:$true] %s107_s7  ;;  %s132_s2 = int_to_ptr.vmem [resolvable:$true] %s131_s2 }
  0x6a   :  { %s2625_s20 = scalar_lea.vmem %s108_s7, 1024  ;;  %p2630_p4 = scmp.lt.s32.totalorder %s108_s7, %s108_s7 }
  0x6b   :  { %p2626_p3 = scmp.ne.s32.totalorder %s108_s7, %s2625_s20  ;;  %p2631_p5 = scmp.lt.s32.totalorder %s2625_s20, %s2625_s20 }
  0x6d   :  { %p2632_p6 = por %p2631_p5, %p2630_p4 }
  0x6f   :  { %p2633_p7 = pnand %p2632_p6, %p2626_p3 }
  0x71   :  { %2636 = shalt.err (!%p2633_p7)
}
  0x72   :  { %113 = dma.hbm_to_vmem [thread:$0]  %s3430_s6, 1024, %s108_s7, [#allocation12], %s2778_s24, %s2778_s24, %s2779_s25  }
  0x73   :  { %s2645_s4 = scalar_lea.vmem %s132_s2, 1024  ;;  %p2650_p9 = scmp.lt.s32.totalorder %s132_s2, %s132_s2 }
  0x74   :  { %p2646_p8 = scmp.ne.s32.totalorder %s132_s2, %s2645_s4  ;;  %p2651_p10 = scmp.lt.s32.totalorder %s2645_s4, %s2645_s4 }
  0x76   :  { %p2652_p11 = por %p2651_p10, %p2650_p9 }
  0x78   :  { %p2653_p12 = pnand %p2652_p11, %p2646_p8 }
  0x7a   :  { %2656 = shalt.err (!%p2653_p12)
}
  0x7b   :  { %137 = dma.hbm_to_vmem [thread:$0]  %s3432_s8, 1024, %s132_s2, [#allocation15], %s2778_s24, %s2778_s24, %s2779_s25  }
  0x7c   :  { %s2790_s26 = smov [#allocation19]   ;;  %s2791_s27 = smov [#allocation22]  }
  0x7d   :  { %s155_s3 = sshll.u32 %s2790_s26, 4  ;;  %s181_s6 = sshll.u32 %s2791_s27, 4  ;;  %s156_s3 = int_to_ptr.vmem [resolvable:$true] %s155_s3  ;;  %s182_s6 = int_to_ptr.vmem [resolvable:$true] %s181_s6 }
  0x7e   :  { %s2665_s28 = scalar_lea.vmem %s156_s3, 1024  ;;  %p2670_p0 = scmp.lt.s32.totalorder %s156_s3, %s156_s3 }
  0x7f   :  { %p2666_p13 = scmp.ne.s32.totalorder %s156_s3, %s2665_s28  ;;  %p2671_p1 = scmp.lt.s32.totalorder %s2665_s28, %s2665_s28 }
  0x81   :  { %p2672_p2 = por %p2671_p1, %p2670_p0 }
  0x83   :  { %p2673_p3 = pnand %p2672_p2, %p2666_p13 }
  0x85   :  { %2676 = shalt.err (!%p2673_p3)
}
  0x86   :  { %161 = dma.hbm_to_vmem [thread:$0]  %s3434_s10, 1024, %s156_s3, [#allocation18], %s2778_s24, %s2778_s24, %s2779_s25  }
  0x87   :  { %s2685_s8 = scalar_lea.vmem %s182_s6, 1024  ;;  %p2690_p5 = scmp.lt.s32.totalorder %s182_s6, %s182_s6 }
  0x88   :  { %p2686_p4 = scmp.ne.s32.totalorder %s182_s6, %s2685_s8  ;;  %p2691_p6 = scmp.lt.s32.totalorder %s2685_s8, %s2685_s8 }
  0x8a   :  { %p2692_p7 = por %p2691_p6, %p2690_p5 }
  0x8c   :  { %p2693_p8 = pnand %p2692_p7, %p2686_p4 }
  0x8e   :  { %2696 = shalt.err (!%p2693_p8)
}
  0x8f   :  { %187 = dma.hbm_to_vmem [thread:$0]  %s3437_s13, 1024, %s182_s6, [#allocation21], %s2778_s24, %s2778_s24, %s2779_s25  }
  0x90   :  { %s2792_s0 = smov [#allocation23]  }
  0x91   :  { %s193_s17 = sshll.u32 %s2792_s0, 4  ;;  %s194_s17 = int_to_ptr.vmem [resolvable:$true] %s193_s17 }
  0x92   :  { %s2705_s18 = scalar_lea.vmem %s194_s17, 1024  ;;  %p2710_p10 = scmp.lt.s32.totalorder %s194_s17, %s194_s17 }
  0x93   :  { %p2706_p9 = scmp.ne.s32.totalorder %s194_s17, %s2705_s18  ;;  %p2711_p11 = scmp.lt.s32.totalorder %s2705_s18, %s2705_s18 }
  0x95   :  { %p2712_p12 = por %p2711_p11, %p2710_p10 }
  0x97   :  { %p2713_p13 = pnand %p2712_p12, %p2706_p9 }
  0x99   :  { %2716 = shalt.err (!%p2713_p13)
}
  0x9a   :  { %199 = dma.hbm_to_vmem [thread:$0]  %s3438_s14, 1024, %s194_s17, [#allocation24], %s2778_s24, %s2778_s24, %s2779_s25  }
  0x9b   :  { %2757 = dma.done.wait [#allocation3], 32  }
  0x9c   :  { %2758 = vsyncadd [#allocation3], 4294967264 }
  0x9d   :  { %2759 = dma.done.wait [#allocation6], 3072  }
  0x9e   :  { %2760 = vsyncadd [#allocation6], 4294964224 }
  0x9f   :  { %2761 = dma.done.wait [#allocation9], 2048  }
  0xa0   :  { %2762 = vsyncadd [#allocation9], 4294965248 }
  0xa1   :  { %2763 = dma.done.wait [#allocation12], 2048  }
  0xa2   :  { %2764 = vsyncadd [#allocation12], 4294965248 }
  0xa3   :  { %2765 = dma.done.wait [#allocation15], 2048  }
  0xa4   :  { %2766 = vsyncadd [#allocation15], 4294965248 }
  0xa5   :  { %2767 = dma.done.wait [#allocation18], 2048  }
  0xa6   :  { %2768 = vsyncadd [#allocation18], 4294965248 }
  0xa7   :  { %2769 = dma.done.wait [#allocation21], 2048  }
  0xa8   :  { %2770 = vsyncadd [#allocation21], 4294965248 }
  0xa9   :  { %2771 = dma.done.wait [#allocation24], 1024  }
  0xaa   :  { %2772 = vsyncadd [#allocation24], 4294966272  ;;  %v287_v0 = vlaneseq  ;;  %v2793_v1 = vmov 1966171168   ;;  %vm332_vm0 = vcmask 556032   ;;  %v274_v5 = vld [vmem:[#allocation8 + $0x38] sm:$0xff] }
  0xab   :  { %v285_v2 = vunpack.c.l.s4 %v2793_v1  ;;  %v273_v6 = vld [vmem:[#allocation8 + $0x30] sm:$0xff]  ;;  %2065 = vmatprep.subr.msk.mxu0 %vm332_vm0, %v274_v5  ;;  %v677_v7 = vld [vmem:[#allocation13 + $0x38] sm:$0xff]  ;;  %v272_v10 = vld [vmem:[#allocation8 + $0x28] sm:$0xff]  ;;  %vm2795_vm1 = vmmov 0   ;;  %vm1493_vm2 = vcmask 523264   ;;  %s2796_s13 = smov [#allocation26]  }
  0xac   :  { %v2964_v4 = vshrl.u32 %v287_v0, 7  ;;  %2066 = vmatpush3.xpose.msk.msra.mxu0 %vm332_vm0, %v274_v5  ;;  %2105 = vmatprep.subr.msk.mxu1 %vm332_vm0, %v677_v7  ;;  %v676_v9 = vld [vmem:[#allocation13 + $0x30] sm:$0xff]  ;;  %v2975_v11 = vld [vmem:[#allocation2] sm:$0x3]  ;;  %v675_v12 = vld [vmem:[#allocation13 + $0x28] sm:$0xff]  ;;  %s1804_s14 = sshll.u32 %s2796_s13, 4  ;;  %s1805_s14 = int_to_ptr.vmem [resolvable:$true] %s1804_s14 }
  0xad   :  { %v286_v3 = vunpack.c.0.s8 %v285_v2  ;;  %2067 = vmatprep.subr.msk.mxu0 %vm332_vm0, %v273_v6  ;;  %2106 = vmatpush3.xpose.msk.msra.mxu1 %vm332_vm0, %v677_v7  ;;  %v271_v16 = vld [vmem:[#allocation8 + $0x20] sm:$0xff]  ;;  %v270_v22 = vld [vmem:[#allocation8 + $0x18] sm:$0xff]  ;;  %v269_v25 = vld [vmem:[#allocation8 + $0x10] sm:$0xff]  ;;  %s2717_s7 = scalar_lea.vmem %s1805_s14, 2048  ;;  %p2722_p1 = scmp.lt.s32.totalorder %s1805_s14, %s1805_s14 }
  0xae   :  { %2107 = vmatprep.subr.msk.mxu1 %vm332_vm0, %v676_v9  ;;  %v308_v14 = vsub.s32 0, %v2964_v4  ;;  %v2988_v17 = vld [vmem:[#allocation7] sm:$0xff]  ;;  %v673_v23 = vld [vmem:[#allocation13 + $0x18] sm:$0xff]  ;;  %v672_v26 = vld [vmem:[#allocation13 + $0x10] sm:$0xff]  ;;  %p2718_p0 = scmp.ne.s32.totalorder %s1805_s14, %s2717_s7  ;;  %p2723_p2 = scmp.lt.s32.totalorder %s2717_s7, %s2717_s7 }
  0xaf   :  { %v2968_v8 = vsub.s32 %v286_v3, %v2964_v4  ;;  %v674_v18 = vld [vmem:[#allocation13 + $0x20] sm:$0xff]  ;;  %v268_v27 = vld [vmem:[#allocation8 + $0x8] sm:$0xff]  ;;  %v3022_v32 = vld [vmem:[#allocation7 + $0x10] sm:$0xff] }
  0xb0   :  { %2068 = vmatpush3.xpose.msk.msra.mxu0 %vm332_vm0, %v273_v6  ;;  %v2995_v20 = vld [vmem:[#allocation11] sm:$0xff]  ;;  %v671_v28 = vld [vmem:[#allocation13 + $0x8] sm:$0xff]  ;;  %v1046_v33 = vld [vmem:[#allocation17 + $0x38] sm:$0xff]  ;;  %p2724_p3 = por %p2723_p2, %p2722_p1 }
  0xb1   :  { %v2979_v13 = vrot.slane %v2975_v11, %v2968_v8  ;;  %2069 = vmatprep.subr.msk.mxu0 %vm332_vm0, %v272_v10  ;;  %2108 = vmatpush3.xpose.msk.msra.mxu1 %vm332_vm0, %v676_v9  ;;  %v267_v29 = vld [vmem:[#allocation8] sm:$0xff]  ;;  %v3019_v31 = vld [vmem:[#allocation7 + $0x8] sm:$0xff]  ;;  %v3030_v36 = vld [vmem:[#allocation11 + $0x10] sm:$0xff] }
  0xb2   :  { %2109 = vmatprep.subr.msk.mxu1 %vm332_vm0, %v675_v12  ;;  %v670_v30 = vld [vmem:[#allocation13] sm:$0xff]  ;;  %v3026_v34 = vld [vmem:[#allocation11 + $0x8] sm:$0xff]  ;;  %v262_v39 = vld [vmem:[#allocation7 + $0x18] sm:$0xff]  ;;  %p2725_p4 = pnand %p2724_p3, %p2718_p0 }
  0xb3   :  { %v298_v15 = vrot.slane %v2979_v13, %v2968_v8  ;;  %v291_v37 = vcombine.high %v2979_v13, %v2979_v13  ;;  %v3038_v40 = vld [vmem:[#allocation7 + $0x20] sm:$0xff]  ;;  %v1045_v42 = vld [vmem:[#allocation17 + $0x30] sm:$0xff]  ;;  %v665_v44 = vld [vmem:[#allocation11 + $0x18] sm:$0xff] }
  0xb4   :  { %2070 = vmatpush3.xpose.msk.msra.mxu0 %vm332_vm0, %v272_v10  ;;  %v666_v46 = vld [vmem:[#allocation11 + $0x20] sm:$0xff]  ;;  %v264_v49 = vld [vmem:[#allocation7 + $0x28] sm:$0xff]  ;;  %v265_v50 = vld [vmem:[#allocation7 + $0x30] sm:$0xff] }
  0xb5   :  { %v2992_v19 = vrot.slane %v298_v15, %v308_v14  ;;  %2071 = vmatprep.subr.msk.mxu0 %vm332_vm0, %v271_v16  ;;  %2110 = vmatpush3.xpose.msk.msra.mxu1 %vm332_vm0, %v675_v12  ;;  %v305_v47 = vrot.slane %v291_v37, %v2968_v8  ;;  %v1044_v52 = vld [vmem:[#allocation17 + $0x28] sm:$0xff]  ;;  %v668_v56 = vld [vmem:[#allocation11 + $0x30] sm:$0xff]  ;;  %v266_v59 = vld [vmem:[#allocation7 + $0x38] sm:$0xff] }
  0xb6   :  { %2111 = vmatprep.subr.msk.mxu1 %vm332_vm0, %v674_v18  ;;  %v667_v54 = vld [vmem:[#allocation11 + $0x28] sm:$0xff]  ;;  %v1043_v61 = vld [vmem:[#allocation17 + $0x20] sm:$0xff]  ;;  %v669_v63 = vld [vmem:[#allocation11 + $0x38] sm:$0xff] }
  0xb7   :  { %v316_v21 = vmul.f32 %v2992_v19, %v2988_v17  ;;  %v686_v24 = vmul.f32 %v2995_v20, %v2992_v19  ;;  %v317_v35 = vmul.f32 %v2992_v19, %v3019_v31  ;;  %v318_v38 = vmul.f32 %v2992_v19, %v3022_v32  ;;  %v1042_v4 = vld [vmem:[#allocation17 + $0x18] sm:$0xff]  ;;  %v1041_v8 = vld [vmem:[#allocation17 + $0x10] sm:$0xff] }
  0xb8   :  { %2072 = vmatpush3.xpose.msk.msra.mxu0 %vm332_vm0, %v271_v16  ;;  %v687_v41 = vmul.f32 %v3026_v34, %v2992_v19  ;;  %v688_v43 = vmul.f32 %v3030_v36, %v2992_v19  ;;  %v319_v45 = vmul.f32 %v2992_v19, %v262_v39  ;;  %v320_v48 = vmul.f32 %v2992_v19, %v3038_v40 }
  0xb9   :  { %2081 = vmatprep.mubr.msk.f32.mxu0 %vm332_vm0, %v316_v21  ;;  %2073 = vmatprep.subr.msk.mxu0 %vm332_vm0, %v270_v22  ;;  %v689_v51 = vmul.f32 %v665_v44, %v2992_v19  ;;  %v690_v53 = vmul.f32 %v666_v46, %v2992_v19  ;;  %v321_v55 = vmul.f32 %v2992_v19, %v264_v49  ;;  %v1039_v21 = vld [vmem:[#allocation17] sm:$0xff] }
  0xba   :  { %2112 = vmatpush3.xpose.msk.msra.mxu1 %vm332_vm0, %v674_v18  ;;  %2121 = vmatprep.mubr.msk.f32.mxu1 %vm332_vm0, %v686_v24  ;;  %v3061_v57 = vrot.slane %v305_v47, %v308_v14  ;;  %v322_v58 = vmul.f32 %v2992_v19, %v265_v50  ;;  %v691_v60 = vmul.f32 %v667_v54, %v2992_v19  ;;  %v1040_v14 = vld [vmem:[#allocation17 + $0x8] sm:$0xff]  ;;  %v1031_v18 = vld [vmem:[#allocation16] sm:$0xff]  ;;  %v1492_v47 = vld [vmem:[#allocation22 + $0x38] sm:$0xff] }
  0xbb   :  { %2113 = vmatprep.subr.msk.mxu1 %vm332_vm0, %v673_v23  ;;  %v692_v62 = vmul.f32 %v668_v56, %v2992_v19  ;;  %v323_v0 = vmul.f32 %v2992_v19, %v266_v59  ;;  %v693_v2 = vmul.f32 %v669_v63, %v2992_v19  ;;  %v1055_v24 = vmul.f32 %v1031_v18, %v2992_v19 }
  0xbc   :  { %2074 = vmatpush3.xpose.msk.msra.mxu0 %vm332_vm0, %v270_v22  ;;  %v324_v1 = vmul.f32 %v3061_v57, %v2988_v17  ;;  %v694_v3 = vmul.f32 %v2995_v20, %v3061_v57  ;;  %v325_v5 = vmul.f32 %v3061_v57, %v3019_v31  ;;  %v326_v6 = vmul.f32 %v3061_v57, %v3022_v32  ;;  %v1035_v31 = vld [vmem:[#allocation16 + $0x20] sm:$0xff] }
  0xbd   :  { %2075 = vmatprep.subr.msk.mxu0 %vm332_vm0, %v269_v25  ;;  %v695_v7 = vmul.f32 %v3026_v34, %v3061_v57  ;;  %v696_v9 = vmul.f32 %v3030_v36, %v3061_v57  ;;  %v327_v10 = vmul.f32 %v3061_v57, %v262_v39  ;;  %v328_v12 = vmul.f32 %v3061_v57, %v3038_v40  ;;  %v1036_v34 = vld [vmem:[#allocation16 + $0x28] sm:$0xff] }
  0xbe   :  { %2114 = vmatpush3.xpose.msk.msra.mxu1 %vm332_vm0, %v673_v23  ;;  %v697_v13 = vmul.f32 %v665_v44, %v3061_v57  ;;  %v698_v15 = vmul.f32 %v666_v46, %v3061_v57  ;;  %v329_v16 = vmul.f32 %v3061_v57, %v264_v49  ;;  %v330_v17 = vmul.f32 %v3061_v57, %v265_v50  ;;  %v1490_v49 = vld [vmem:[#allocation22 + $0x28] sm:$0xff]  ;;  %v1489_v50 = vld [vmem:[#allocation22 + $0x20] sm:$0xff] }
  0xbf   :  { %2115 = vmatprep.subr.msk.mxu1 %vm332_vm0, %v672_v26  ;;  %v699_v20 = vmul.f32 %v667_v54, %v3061_v57  ;;  %v700_v22 = vmul.f32 %v668_v56, %v3061_v57  ;;  %v331_v23 = vmul.f32 %v3061_v57, %v266_v59  ;;  %v1060_v36 = vmul.f32 %v1036_v34, %v2992_v19  ;;  %v1485_v54 = vld [vmem:[#allocation22] sm:$0xff]  ;;  %v1327_v56 = vld [vmem:[#allocation20 + $0x38] sm:$0xff] }
  0xc0   :  { %2076 = vmatpush3.xpose.msk.msra.mxu0 %vm332_vm0, %v269_v25  ;;  %v1032_v25 = vld [vmem:[#allocation16 + $0x8] sm:$0xff]  ;;  %v1063_v40 = vmul.f32 %v1031_v18, %v3061_v57  ;;  %v1068_v44 = vmul.f32 %v1036_v34, %v3061_v57  ;;  %v1324_v59 = vld [vmem:[#allocation20 + $0x20] sm:$0xff] }
  0xc1   :  { %2077 = vmatprep.subr.msk.mxu0 %vm332_vm0, %v268_v27 }
  0xc2   :  { %2116 = vmatpush3.xpose.msk.msra.mxu1 %vm332_vm0, %v672_v26  ;;  %v1033_v26 = vld [vmem:[#allocation16 + $0x10] sm:$0xff] }
  0xc3   :  { %2117 = vmatprep.subr.msk.mxu1 %vm332_vm0, %v671_v28 }
  0xc4   :  { %2078 = vmatpush3.xpose.msk.msra.mxu0 %vm332_vm0, %v268_v27  ;;  %v701_v27 = vmul.f32 %v669_v63, %v3061_v57  ;;  %v1320_v63 = vld [vmem:[#allocation20] sm:$0xff] }
  0xc5   :  { %2079 = vmatprep.subr.msk.mxu0 %vm332_vm0, %v267_v29 }
  0xc6   :  { %2118 = vmatpush3.xpose.msk.msra.mxu1 %vm332_vm0, %v671_v28  ;;  %v1056_v28 = vmul.f32 %v1032_v25, %v2992_v19 }
  0xc7   :  { %2119 = vmatprep.subr.msk.mxu1 %vm332_vm0, %v670_v30 }
  0xc8   :  { %2080 = vmatpush3.xpose.msk.msra.mxu0 %vm332_vm0, %v267_v29  ;;  %v1057_v29 = vmul.f32 %v1033_v26, %v2992_v19 }
  0xc9   :  { %2145 = vmatprep.subr.msk.mxu0 %vm332_vm0, %v1046_v33 }
  0xca   :  { %2120 = vmatpush3.xpose.msk.msra.mxu1 %vm332_vm0, %v670_v30  ;;  %v1034_v30 = vld [vmem:[#allocation16 + $0x18] sm:$0xff] }
  0xcb   :  { %2082 = vmatmul.mubr.msk.f32.vlgmr.msra.gmra.mxu0 %vm332_vm0, %v317_v35  ;;  %v1058_v32 = vmul.f32 %v1034_v30, %v2992_v19  ;;  %v1037_v35 = vld [vmem:[#allocation16 + $0x30] sm:$0xff]  ;;  %2204 = vmatprep.subr.mxu1 %v1492_v47 }
  0xcc   :  { %2146 = vmatpush3.xpose.msk.msra.mxu0 %vm332_vm0, %v1046_v33  ;;  %2084 = vmatprep.mubr.msk.f32.mxu0 %vm332_vm0, %v318_v38  ;;  %v1059_v33 = vmul.f32 %v1035_v31, %v2992_v19  ;;  %v1061_v37 = vmul.f32 %v1037_v35, %v2992_v19  ;;  %v1038_v38 = vld [vmem:[#allocation16 + $0x38] sm:$0xff] }
  0xcd   :  { %2147 = vmatprep.subr.msk.mxu0 %vm332_vm0, %v1045_v42  ;;  %2122 = vmatmul.mubr.msk.f32.vlgmr.msra.gmra.mxu1 %vm332_vm0, %v687_v41  ;;  %v1062_v39 = vmul.f32 %v1038_v38, %v2992_v19  ;;  %v1064_v41 = vmul.f32 %v1032_v25, %v3061_v57  ;;  %v1067_v19 = vmul.f32 %v1035_v31, %v3061_v57 }
  0xce   :  { %2124 = vmatprep.mubr.msk.f32.mxu1 %vm332_vm0, %v688_v43  ;;  %v1066_v43 = vmul.f32 %v1034_v30, %v3061_v57  ;;  %v1070_v46 = vmul.f32 %v1038_v38, %v3061_v57  ;;  %2205 = vmatpush3.msra.mxu1 %v1492_v47  ;;  %v3210_v47 = vld [vmem:[#allocation14 + $0x38] sm:$0xff] }
  0xcf   :  { %2085 = vmatmul.mubr.msk.f32.gmra.mxu0 %vm332_vm0, %v319_v45  ;;  %v1069_v45 = vmul.f32 %v1037_v35, %v3061_v57 }
  0xd0   :  { %2148 = vmatpush3.xpose.msk.msra.mxu0 %vm332_vm0, %v1045_v42  ;;  %2087 = vmatprep.mubr.msk.f32.mxu0 %vm332_vm0, %v320_v48  ;;  %v1065_v42 = vmul.f32 %v1033_v26, %v3061_v57  ;;  %v1491_v48 = vld [vmem:[#allocation22 + $0x30] sm:$0xff] }
  0xd1   :  { %2149 = vmatprep.subr.msk.mxu0 %vm332_vm0, %v1044_v52  ;;  %2125 = vmatmul.mubr.msk.f32.gmra.mxu1 %vm332_vm0, %v689_v51  ;;  %v1488_v51 = vld [vmem:[#allocation22 + $0x18] sm:$0xff]  ;;  %v1326_v57 = vld [vmem:[#allocation20 + $0x30] sm:$0xff] }
  0xd2   :  { %2127 = vmatprep.mubr.msk.f32.mxu1 %vm332_vm0, %v690_v53  ;;  %2206 = vmatprep.subr.mxu1 %v1491_v48  ;;  %v1486_v53 = vld [vmem:[#allocation22 + $0x8] sm:$0xff] }
  0xd3   :  { %2088 = vmatmul.mubr.msk.f32.gmra.mxu0 %vm332_vm0, %v321_v55  ;;  %2207 = vmatpush3.msra.mxu1 %v1491_v48  ;;  %v2794_v55 = vmov 0.0  }
  0xd4   :  { %2150 = vmatpush3.xpose.msk.msra.mxu0 %vm332_vm0, %v1044_v52  ;;  %2090 = vmatprep.mubr.msk.f32.mxu0 %vm332_vm0, %v322_v58  ;;  %v1487_v52 = vld [vmem:[#allocation22 + $0x10] sm:$0xff]  ;;  %v1325_v58 = vld [vmem:[#allocation20 + $0x28] sm:$0xff] }
  0xd5   :  { %2151 = vmatprep.subr.msk.mxu0 %vm332_vm0, %v1043_v61  ;;  %2128 = vmatmul.mubr.msk.f32.gmra.mxu1 %vm332_vm0, %v691_v60  ;;  %v1323_v60 = vld [vmem:[#allocation20 + $0x18] sm:$0xff] }
  0xd6   :  { %2130 = vmatprep.mubr.msk.f32.mxu1 %vm332_vm0, %v692_v62  ;;  %2208 = vmatprep.subr.mxu1 %v1490_v49  ;;  %v1321_v62 = vld [vmem:[#allocation20 + $0x8] sm:$0xff] }
  0xd7   :  { %2091 = vmatmul.mubr.msk.f32.gmra.mxu0 %vm332_vm0, %v323_v0  ;;  %2209 = vmatpush3.msra.mxu1 %v1490_v49  ;;  %v3169_v0 = vld [vmem:[#allocation10 + $0x8] sm:$0xff] }
  0xd8   :  { %2152 = vmatpush3.xpose.msk.msra.mxu0 %vm332_vm0, %v1043_v61  ;;  %2093 = vmatprep.mubr.msk.f32.mxu0 %vm332_vm0, %v324_v1  ;;  %v1322_v61 = vld [vmem:[#allocation20 + $0x10] sm:$0xff] }
  0xd9   :  { %2153 = vmatprep.subr.msk.mxu0 %vm332_vm0, %v1042_v4  ;;  %2131 = vmatmul.mubr.msk.f32.gmra.mxu1 %vm332_vm0, %v693_v2  ;;  %v3173_v2 = vld [vmem:[#allocation10] sm:$0xff] }
  0xda   :  { %2133 = vmatprep.mubr.msk.f32.mxu1 %vm332_vm0, %v694_v3  ;;  %2210 = vmatprep.subr.mxu1 %v1489_v50  ;;  %v3175_v3 = vld [vmem:[#allocation14 + $0x8] sm:$0xff] }
  0xdb   :  { %2094 = vmatmul.mubr.msk.f32.gmra.mxu0 %vm332_vm0, %v325_v5  ;;  %2211 = vmatpush3.msra.mxu1 %v1489_v50 }
  0xdc   :  { %2154 = vmatpush3.xpose.msk.msra.mxu0 %vm332_vm0, %v1042_v4  ;;  %2096 = vmatprep.mubr.msk.f32.mxu0 %vm332_vm0, %v326_v6  ;;  %v3178_v6 = vld [vmem:[#allocation10 + $0x18] sm:$0xff] }
  0xdd   :  { %2155 = vmatprep.subr.msk.mxu0 %vm332_vm0, %v1041_v8  ;;  %2134 = vmatmul.mubr.msk.f32.gmra.mxu1 %vm332_vm0, %v695_v7 }
  0xde   :  { %2136 = vmatprep.mubr.msk.f32.mxu1 %vm332_vm0, %v696_v9  ;;  %2212 = vmatprep.subr.mxu1 %v1488_v51 }
  0xdf   :  { %2097 = vmatmul.mubr.msk.f32.gmra.mxu0 %vm332_vm0, %v327_v10  ;;  %2213 = vmatpush3.msra.mxu1 %v1488_v51 }
  0xe0   :  { %2156 = vmatpush3.xpose.msk.msra.mxu0 %vm332_vm0, %v1041_v8  ;;  %2099 = vmatprep.mubr.msk.f32.mxu0 %vm332_vm0, %v328_v12  ;;  %v3182_v12 = vld [vmem:[#allocation14] sm:$0xff] }
  0xe1   :  { %2157 = vmatprep.subr.msk.mxu0 %vm332_vm0, %v1040_v14  ;;  %2137 = vmatmul.mubr.msk.f32.gmra.mxu1 %vm332_vm0, %v697_v13 }
  0xe2   :  { %2139 = vmatprep.mubr.msk.f32.mxu1 %vm332_vm0, %v698_v15  ;;  %2214 = vmatprep.subr.mxu1 %v1487_v52  ;;  %v3186_v15 = vld [vmem:[#allocation14 + $0x18] sm:$0xff] }
  0xe3   :  { %2100 = vmatmul.mubr.msk.f32.gmra.mxu0 %vm332_vm0, %v329_v16  ;;  %2215 = vmatpush3.msra.mxu1 %v1487_v52 }
  0xe4   :  { %2158 = vmatpush3.xpose.msk.msra.mxu0 %vm332_vm0, %v1040_v14  ;;  %2102 = vmatprep.mubr.msk.f32.mxu0 %vm332_vm0, %v330_v17 }
  0xe5   :  { %2159 = vmatprep.subr.msk.mxu0 %vm332_vm0, %v1039_v21  ;;  %2140 = vmatmul.mubr.msk.f32.gmra.mxu1 %vm332_vm0, %v699_v20 }
  0xe6   :  { %2142 = vmatprep.mubr.msk.f32.mxu1 %vm332_vm0, %v700_v22  ;;  %2216 = vmatprep.subr.mxu1 %v1486_v53 }
  0xe7   :  { %2103 = vmatmul.mubr.msk.f32.gmra.mxu0 %vm332_vm0, %v331_v23  ;;  %2217 = vmatpush3.msra.mxu1 %v1486_v53 }
  0xe8   :  { %2160 = vmatpush3.xpose.msk.msra.mxu0 %vm332_vm0, %v1039_v21  ;;  %2161 = vmatprep.mubr.msk.f32.mxu0 %vm332_vm0, %v1055_v24  ;;  %v3189_v21 = vld [vmem:[#allocation10 + $0x28] sm:$0xff] }
  0xe9   :  { %2143 = vmatmul.mubr.msk.f32.gmra.mxu1 %vm332_vm0, %v701_v27  ;;  %2218 = vmatprep.subr.mxu1 %v1485_v54  ;;  %v3194_v27 = vld [vmem:[#allocation14 + $0x10] sm:$0xff] }
  0xea   :  { %2219 = vmatpush3.msra.mxu1 %v1485_v54  ;;  %2185 = vmatprep.subr.mxu0 %v2794_v55 }
  0xeb   :  { %2162 = vmatmul.mubr.msk.f32.vlgmr.msra.gmra.mxu0 %vm332_vm0, %v1056_v28 }
  0xec   :  { %2164 = vmatprep.mubr.msk.f32.mxu0 %vm332_vm0, %v1057_v29  ;;  %2186 = vmatpush3.xpose.msk.msra.mxu0 %vm332_vm0, %v1327_v56  ;;  %v3196_v29 = vld [vmem:[#allocation10 + $0x20] sm:$0xff] }
  0xed   :  { %2187 = vmatprep.subr.mxu0 %v2794_v55 }
  0xef   :  { %2165 = vmatmul.mubr.msk.f32.gmra.mxu0 %vm332_vm0, %v1058_v32  ;;  %v3198_v32 = vld [vmem:[#allocation14 + $0x28] sm:$0xff] }
  0xf0   :  { %2167 = vmatprep.mubr.msk.f32.mxu0 %vm332_vm0, %v1059_v33  ;;  %2188 = vmatpush3.xpose.msk.msra.mxu0 %vm332_vm0, %v1326_v57 }
  0xf1   :  { %2189 = vmatprep.subr.mxu0 %v2794_v55 }
  0xf3   :  { %2168 = vmatmul.mubr.msk.f32.gmra.mxu0 %vm332_vm0, %v1060_v36 }
  0xf4   :  { %2170 = vmatprep.mubr.msk.f32.mxu0 %vm332_vm0, %v1061_v37  ;;  %2190 = vmatpush3.xpose.msk.msra.mxu0 %vm332_vm0, %v1325_v58  ;;  %v3201_v37 = vld [vmem:[#allocation10 + $0x38] sm:$0xff] }
  0xf5   :  { %2191 = vmatprep.subr.mxu0 %v2794_v55 }
  0xf7   :  { %2171 = vmatmul.mubr.msk.f32.gmra.mxu0 %vm332_vm0, %v1062_v39 }
  0xf8   :  { %2173 = vmatprep.mubr.msk.f32.mxu0 %vm332_vm0, %v1063_v40  ;;  %2192 = vmatpush3.xpose.msk.msra.mxu0 %vm332_vm0, %v1324_v59 }
  0xf9   :  { %2193 = vmatprep.subr.mxu0 %v2794_v55 }
  0xfb   :  { %2174 = vmatmul.mubr.msk.f32.gmra.mxu0 %vm332_vm0, %v1064_v41 }
  0xfc   :  { %2176 = vmatprep.mubr.msk.f32.mxu0 %vm332_vm0, %v1065_v42  ;;  %2194 = vmatpush3.xpose.msk.msra.mxu0 %vm332_vm0, %v1323_v60 }
  0xfd   :  { %2195 = vmatprep.subr.mxu0 %v2794_v55 }
  0xff   :  { %2177 = vmatmul.mubr.msk.f32.gmra.mxu0 %vm332_vm0, %v1066_v43  ;;  %v3206_v43 = vld [vmem:[#allocation14 + $0x20] sm:$0xff] }
 0x100   :  { %2179 = vmatprep.mubr.msk.f32.mxu0 %vm332_vm0, %v1067_v19  ;;  %2196 = vmatpush3.xpose.msk.msra.mxu0 %vm332_vm0, %v1322_v61 }
 0x101   :  { %2197 = vmatprep.subr.mxu0 %v2794_v55 }
 0x103   :  { %2180 = vmatmul.mubr.msk.f32.gmra.mxu0 %vm332_vm0, %v1068_v44  ;;  %v3208_v44 = vld [vmem:[#allocation10 + $0x30] sm:$0xff] }
 0x104   :  { %2182 = vmatprep.mubr.msk.f32.mxu0 %vm332_vm0, %v1069_v45  ;;  %2198 = vmatpush3.xpose.msk.msra.mxu0 %vm332_vm0, %v1321_v62 }
 0x105   :  { %2199 = vmatprep.subr.mxu0 %v2794_v55 }
 0x107   :  { %2183 = vmatmul.mubr.msk.f32.gmra.mxu0 %vm332_vm0, %v1070_v46 }
 0x108   :  { %2201 = vmatprep.mubr.msk.f32.mxu0 %vm2795_vm1, %v2794_v55  ;;  %2200 = vmatpush3.xpose.msk.msra.mxu0 %vm332_vm0, %v1320_v63 }
 0x10b   :  { %2202 = vmatmul.mubr.msk.f32.vlgmr.msra.gmra.mxu0 %vm332_vm0, %v2975_v11  ;;  %v3184_v11 = vld [vmem:[#allocation10 + $0x10] sm:$0xff] }
 0x18b   :  { %v2083_v1 = vpop.f32.mrf.mxu0 }
 0x18c   :  { %v551_v4 = vadd.f32 %v2083_v1, %v3169_v0 }
 0x18d   :  { %v471_v5 = vpop.f32.mrf.mxu0  ;;  %v2123_v7 = vpop.f32.mrf.mxu1 }
 0x18e   :  { %v1852_v8 = vmul.f32 -1.442695, %v551_v4  ;;  %v550_v9 = vadd.f32 %v471_v5, %v3173_v2  ;;  %v920_v10 = vadd.f32 %v2123_v7, %v3175_v3 }
 0x18f   :  { %v2086_v13 = vpop.f32.mrf.mxu0  ;;  %v840_v14 = vpop.f32.mrf.mxu1 }
 0x190   :  { %2265 = vpow2.f32 %v1852_v8  ;;  %v1851_v16 = vmul.f32 -1.442695, %v550_v9  ;;  %v553_v17 = vadd.f32 %v2086_v13, %v3178_v6  ;;  %v1892_v18 = vmul.f32 -1.442695, %v920_v10 }
 0x191   :  { %v481_v20 = vpop.f32.mrf.mxu0  ;;  %v919_v22 = vadd.f32 %v840_v14, %v3182_v12  ;;  %v2126_v23 = vpop.f32.mrf.mxu1 }
 0x192   :  { %2267 = vpow2.f32 %v1851_v16  ;;  %v1854_v24 = vmul.f32 -1.442695, %v553_v17  ;;  %v552_v25 = vadd.f32 %v481_v20, %v3184_v11  ;;  %v922_v26 = vadd.f32 %v2126_v23, %v3186_v15 }
 0x193   :  { %v2089_v28 = vpop.f32.mrf.mxu0  ;;  %2269 = vpow2.f32 %v1892_v18  ;;  %v1891_v30 = vmul.f32 -1.442695, %v919_v22  ;;  %v850_v31 = vpop.f32.mrf.mxu1 }
 0x194   :  { %2271 = vpow2.f32 %v1854_v24  ;;  %v1853_v33 = vmul.f32 -1.442695, %v552_v25  ;;  %v555_v34 = vadd.f32 %v2089_v28, %v3189_v21  ;;  %v1894_v35 = vmul.f32 -1.442695, %v922_v26 }
 0x195   :  { %v491_v36 = vpop.f32.mrf.mxu0  ;;  %2273 = vpow2.f32 %v1891_v30  ;;  %v921_v38 = vadd.f32 %v850_v31, %v3194_v27  ;;  %v2129_v39 = vpop.f32.mrf.mxu1 }
 0x196   :  { %2275 = vpow2.f32 %v1853_v33  ;;  %v1856_v40 = vmul.f32 -1.442695, %v555_v34  ;;  %v554_v41 = vadd.f32 %v491_v36, %v3196_v29  ;;  %v924_v42 = vadd.f32 %v2129_v39, %v3198_v32 }
 0x197   :  { %v2092_v19 = vpop.f32.mrf.mxu0  ;;  %2277 = vpow2.f32 %v1894_v35  ;;  %v1893_v45 = vmul.f32 -1.442695, %v921_v38  ;;  %v860_v46 = vpop.f32.mrf.mxu1 }
 0x198   :  { %2279 = vpow2.f32 %v1856_v40  ;;  %v1855_v48 = vmul.f32 -1.442695, %v554_v41  ;;  %v557_v49 = vadd.f32 %v2092_v19, %v3201_v37  ;;  %v1896_v51 = vmul.f32 -1.442695, %v924_v42 }
 0x199   :  { %v501_v50 = vpop.f32.mrf.mxu0  ;;  %2281 = vpow2.f32 %v1893_v45  ;;  %v923_v52 = vadd.f32 %v860_v46, %v3206_v43  ;;  %v2132_v53 = vpop.f32.mrf.mxu1 }
 0x19a   :  { %2283 = vpow2.f32 %v1855_v48  ;;  %v1858_v54 = vmul.f32 -1.442695, %v557_v49  ;;  %v556_v55 = vadd.f32 %v501_v50, %v3208_v44  ;;  %v926_v56 = vadd.f32 %v2132_v53, %v3210_v47  ;;  %v3221_v50 = vld [vmem:[#allocation14 + $0x30] sm:$0xff] }
 0x19b   :  { %v2095_v57 = vpop.f32.mrf.mxu0  ;;  %v1895_v58 = vmul.f32 -1.442695, %v923_v52  ;;  %v870_v34 = vpop.f32.mrf.mxu1 }
 0x19c   :  { %2285 = vpow2.f32 %v1858_v54  ;;  %v1857_v59 = vmul.f32 -1.442695, %v556_v55  ;;  %v559_v60 = vadd.f32 %v2095_v57, %v3169_v0  ;;  %v1898_v61 = vmul.f32 -1.442695, %v926_v56 }
 0x19d   :  { %v2266_v62 = vpop.eup %2265  ;;  %v511_v63 = vpop.f32.mrf.mxu0  ;;  %2287 = vpow2.f32 %v1896_v51 }
 0x19e   :  { %v615_v1 = vadd.f32 1.0, %v2266_v62  ;;  %2289 = vpow2.f32 %v1857_v59  ;;  %v1860_v4 = vmul.f32 -1.442695, %v559_v60  ;;  %v558_v14 = vadd.f32 %v511_v63, %v3173_v2  ;;  %v2135_v46 = vpop.f32.mrf.mxu1 }
 0x19f   :  { %v2268_v5 = vpop.eup %2267  ;;  %v2098_v7 = vpop.f32.mrf.mxu0  ;;  %2291 = vpow2.f32 %v1895_v58  ;;  %v925_v59 = vadd.f32 %v870_v34, %v3221_v50 }
 0x1a0   :  { %v2270_v8 = vpop.eup %2269  ;;  %v614_v9 = vadd.f32 1.0, %v2268_v5  ;;  %2293 = vpow2.f32 %v1898_v61  ;;  %v1859_v28 = vmul.f32 -1.442695, %v558_v14  ;;  %v561_v30 = vadd.f32 %v2098_v7, %v3178_v6  ;;  %v880_v60 = vpop.f32.mrf.mxu1 }
 0x1a1   :  { %v2272_v10 = vpop.eup %2271  ;;  %v984_v13 = vadd.f32 1.0, %v2270_v8  ;;  %2295 = vpow2.f32 %v1860_v4  ;;  %v521_v16 = vpop.f32.mrf.mxu0 }
 0x1a2   :  { %v2274_v0 = vpop.eup %2273  ;;  %2297 = vrcp.f32 %v615_v1  ;;  %v617_v17 = vadd.f32 1.0, %v2272_v10  ;;  %v560_v40 = vadd.f32 %v521_v16, %v3184_v11  ;;  %v1862_v42 = vmul.f32 -1.442695, %v561_v30  ;;  %v2138_v14 = vpop.f32.mrf.mxu1 }
 0x1a3   :  { %v2276_v18 = vpop.eup %2275  ;;  %2299 = vrcp.f32 %v614_v9  ;;  %v983_v20 = vadd.f32 1.0, %v2274_v0  ;;  %v2101_v22 = vpop.f32.mrf.mxu0  ;;  %v927_v0 = vadd.f32 %v880_v60, %v3182_v12  ;;  %v930_v12 = vadd.f32 %v2138_v14, %v3186_v15 }
 0x1a4   :  { %v2278_v23 = vpop.eup %2277  ;;  %v616_v24 = vadd.f32 1.0, %v2276_v18  ;;  %2301 = vrcp.f32 %v984_v13  ;;  %v563_v49 = vadd.f32 %v2101_v22, %v3189_v21  ;;  %v1861_v54 = vmul.f32 -1.442695, %v560_v40 }
 0x1a5   :  { %v2280_v25 = vpop.eup %2279  ;;  %2303 = vrcp.f32 %v617_v17  ;;  %v986_v26 = vadd.f32 1.0, %v2278_v23  ;;  %v531_v31 = vpop.f32.mrf.mxu0  ;;  %v1897_v13 = vmul.f32 -1.442695, %v925_v59 }
 0x1a6   :  { %v2282_v33 = vpop.eup %2281  ;;  %v619_v2 = vadd.f32 1.0, %v2280_v25  ;;  %2305 = vrcp.f32 %v983_v20  ;;  %v562_v56 = vadd.f32 %v531_v31, %v3196_v29  ;;  %v1864_v62 = vmul.f32 -1.442695, %v563_v49 }
 0x1a7   :  { %v2284_v35 = vpop.eup %2283  ;;  %2307 = vrcp.f32 %v616_v24  ;;  %v2104_v36 = vpop.f32.mrf.mxu0  ;;  %v985_v39 = vadd.f32 1.0, %v2282_v33  ;;  %v928_v29 = vadd.f32 %v2135_v46, %v3175_v3  ;;  %v3249_v24 = vld [vmem:[#allocation19 + $0x8] sm:$0xff]  ;;  %v1899_v33 = vmul.f32 -1.442695, %v927_v0 }
 0x1a8   :  { %v618_v38 = vadd.f32 1.0, %v2284_v35  ;;  %2309 = vrcp.f32 %v986_v26  ;;  %v565_v63 = vadd.f32 %v2104_v36, %v3201_v37  ;;  %v1863_v8 = vmul.f32 -1.442695, %v562_v56  ;;  %v3261_v35 = vld [vmem:[#allocation19] sm:$0xff] }
 0x1a9   :  { %v2286_v41 = vpop.eup %2285  ;;  %2311 = vpow2.f32 %v1859_v28  ;;  %v541_v19 = vpop.f32.mrf.mxu0  ;;  %v1900_v18 = vmul.f32 -1.442695, %v928_v29 }
 0x1aa   :  { %v2288_v45 = vpop.eup %2287  ;;  %2313 = vrcp.f32 %v619_v2  ;;  %v621_v6 = vadd.f32 1.0, %v2286_v41  ;;  %v1866_v16 = vmul.f32 -1.442695, %v565_v63  ;;  %v564_v23 = vadd.f32 %v541_v19, %v3208_v44  ;;  %v890_v28 = vpop.f32.mrf.mxu1 }
 0x1ab   :  { %v2290_v48 = vpop.eup %2289  ;;  %2315 = vrcp.f32 %v618_v38  ;;  %v2163_v51 = vpop.f32.mrf.mxu0  ;;  %v988_v55 = vadd.f32 1.0, %v2288_v45  ;;  %v929_v15 = vadd.f32 %v890_v28, %v3194_v27  ;;  %v1902_v41 = vmul.f32 -1.442695, %v930_v12  ;;  %v3271_v45 = vld [vmem:[#allocation19 + $0x18] sm:$0xff]  ;;  %v3297_v12 = vld [vmem:[#allocation19 + $0x28] sm:$0xff] }
 0x1ac   :  { %v2292_v52 = vpop.eup %2291  ;;  %v620_v53 = vadd.f32 1.0, %v2290_v48  ;;  %2317 = vrcp.f32 %v985_v39  ;;  %v1289_v44 = vadd.f32 %v2163_v51, %v3249_v24  ;;  %v1865_v38 = vmul.f32 -1.442695, %v564_v23 }
 0x1ad   :  { %v2294_v11 = vpop.eup %2293  ;;  %2319 = vpow2.f32 %v1862_v42  ;;  %v1209_v57 = vpop.f32.mrf.mxu0  ;;  %v987_v5 = vadd.f32 1.0, %v2292_v52  ;;  %v1901_v52 = vmul.f32 -1.442695, %v929_v15 }
 0x1ae   :  { %v2296_v58 = vpop.eup %2295  ;;  %2321 = vrcp.f32 %v621_v6  ;;  %v990_v22 = vadd.f32 1.0, %v2294_v11  ;;  %v1288_v19 = vadd.f32 %v1209_v57, %v3261_v35  ;;  %v2141_v6 = vpop.f32.mrf.mxu1 }
 0x1af   :  { %v3225_v61 = vpop.eup %2297  ;;  %2323 = vrcp.f32 %v620_v53  ;;  %v623_v21 = vadd.f32 1.0, %v2296_v58  ;;  %v3228_v1 = vpop.f32.mrf.mxu0  ;;  %v932_v27 = vadd.f32 %v2141_v6, %v3198_v32 }
 0x1b0   :  { %v3230_v4 = vpop.eup %2299  ;;  %2325 = vpow2.f32 %v1861_v54  ;;  %v1291_v54 = vadd.f32 %v3228_v1, %v3271_v45  ;;  %v900_v56 = vpop.f32.mrf.mxu1 }
 0x1b1   :  { %v3233_v7 = vpop.eup %2301  ;;  %2327 = vrcp.f32 %v988_v55  ;;  %v3235_v9 = vpop.f32.mrf.mxu0  ;;  %v1904_v59 = vmul.f32 -1.442695, %v932_v27  ;;  %v931_v14 = vadd.f32 %v900_v56, %v3206_v43  ;;  %v243_v27 = vld [vmem:[#allocation5] sm:$0xff] }
 0x1b2   :  { %v3237_v10 = vpop.eup %2303  ;;  %2329 = vrcp.f32 %v623_v21 }
 0x1b3   :  { %v3239_v37 = vpop.eup %2305  ;;  %2331 = vpow2.f32 %v1864_v62  ;;  %v3242_v17 = vpop.f32.mrf.mxu0  ;;  %v3288_v62 = vld [vmem:[#allocation19 + $0x10] sm:$0xff]  ;;  %v1903_v15 = vmul.f32 -1.442695, %v931_v14 }
 0x1b4   :  { %v3244_v3 = vpop.eup %2307  ;;  %2333 = vrcp.f32 %v987_v5  ;;  %v2144_v5 = vpop.f32.mrf.mxu1 }
 0x1b5   :  { %v3246_v20 = vpop.eup %2309  ;;  %2335 = vpow2.f32 %v1863_v8  ;;  %v3251_v25 = vpop.f32.mrf.mxu0 }
 0x1b6   :  { %v2312_v26 = vpop.eup %2311  ;;  %2337 = vpow2.f32 %v1897_v13 }
 0x1b7   :  { %v3254_v30 = vpop.eup %2313  ;;  %v622_v31 = vadd.f32 1.0, %v2312_v26  ;;  %2339 = vpow2.f32 %v1866_v16  ;;  %v3256_v2 = vpop.f32.mrf.mxu0 }
 0x1b8   :  { %v3258_v34 = vpop.eup %2315  ;;  %2341 = vpow2.f32 %v1900_v18  ;;  %v244_v18 = vld [vmem:[#allocation5 + $0x8] sm:$0xff] }
 0x1b9   :  { %v3263_v36 = vpop.eup %2317  ;;  %2343 = vrcp.f32 %v990_v22  ;;  %v3266_v39 = vpop.f32.mrf.mxu0  ;;  %v1290_v22 = vadd.f32 %v3235_v9, %v3288_v62 }
 0x1ba   :  { %v2320_v40 = vpop.eup %2319  ;;  %2345 = vrcp.f32 %v622_v31  ;;  %v934_v31 = vadd.f32 %v2144_v5, %v3210_v47 }
 0x1bb   :  { %v3268_v42 = vpop.eup %2321  ;;  %2347 = vpow2.f32 %v1899_v33  ;;  %v3273_v46 = vpop.f32.mrf.mxu0  ;;  %v625_v49 = vadd.f32 1.0, %v2320_v40 }
 0x1bc   :  { %v3275_v48 = vpop.eup %2323  ;;  %2349 = vtanh.f32 %v1289_v44  ;;  %v910_v33 = vpop.f32.mrf.mxu1 }
 0x1bd   :  { %v2326_v51 = vpop.eup %2325  ;;  %2351 = vpow2.f32 %v1865_v38  ;;  %v3284_v57 = vpop.f32.mrf.mxu0  ;;  %v1438_v38 = vmul.f32 %v3233_v7, %v244_v18  ;;  %v1906_v7 = vmul.f32 -1.442695, %v934_v31 }
 0x1be   :  { %v3278_v53 = vpop.eup %2327  ;;  %2353 = vpow2.f32 %v1902_v41  ;;  %v624_v55 = vadd.f32 1.0, %v2326_v51  ;;  %v1293_v41 = vadd.f32 %v3242_v17, %v3297_v12 }
 0x1bf   :  { %v3282_v11 = vpop.eup %2329  ;;  %2355 = vtanh.f32 %v1288_v19  ;;  %v3290_v29 = vpop.f32.mrf.mxu0  ;;  %v3307_v19 = vld [vmem:[#allocation19 + $0x20] sm:$0xff] }
 0x1c0   :  { %v2332_v58 = vpop.eup %2331  ;;  %2357 = vrcp.f32 %v625_v49  ;;  %v933_v49 = vadd.f32 %v910_v33, %v3221_v50  ;;  %v1292_v17 = vadd.f32 %v3251_v25, %v3307_v19  ;;  %v1437_v50 = vmul.f32 %v3239_v37, %v243_v27 }
 0x1c1   :  { %v3286_v32 = vpop.eup %2333  ;;  %v627_v60 = vadd.f32 1.0, %v2332_v58  ;;  %2359 = vpow2.f32 %v1901_v52  ;;  %v3302_v43 = vpop.f32.mrf.mxu0 }
 0x1c2   :  { %v2336_v21 = vpop.eup %2335  ;;  %2361 = vtanh.f32 %v1291_v54  ;;  %v246_v54 = vld [vmem:[#allocation5 + $0x18] sm:$0xff] }
 0x1c3   :  { %v2338_v63 = vpop.eup %2337  ;;  %2363 = vrcp.f32 %v624_v55  ;;  %v626_v1 = vadd.f32 1.0, %v2336_v21  ;;  %v2181_v52 = vpop.f32.mrf.mxu0  ;;  %v1440_v5 = vmul.f32 %v3246_v20, %v246_v54 }
 0x1c4   :  { %v2340_v8 = vpop.eup %2339  ;;  %v989_v13 = vadd.f32 1.0, %v2338_v63  ;;  %2365 = vpow2.f32 %v1904_v59  ;;  %v1054_v59 = vld [vmem:[#allocation19 + $0x38] sm:$0xff]  ;;  %v1905_v63 = vmul.f32 -1.442695, %v933_v49 }
 0x1c5   :  { %v2342_v16 = vpop.eup %2341  ;;  %2367 = vrcp.f32 %v627_v60  ;;  %v629_v0 = vadd.f32 1.0, %v2340_v8  ;;  %v1295_v25 = vadd.f32 %v3256_v2, %v1054_v59  ;;  %v1297_v2 = vadd.f32 %v3273_v46, %v3249_v24 }
 0x1c6   :  { %v3295_v23 = vpop.eup %2343  ;;  %2369 = vrcp.f32 %v626_v1  ;;  %v992_v26 = vadd.f32 1.0, %v2342_v16  ;;  %v1053_v1 = vld [vmem:[#allocation19 + $0x30] sm:$0xff]  ;;  %v1269_v16 = vpop.f32.mrf.mxu0  ;;  %v1298_v46 = vadd.f32 %v3302_v43, %v3288_v62 }
 0x1c7   :  { %v3299_v28 = vpop.eup %2345  ;;  %2371 = vrcp.f32 %v989_v13  ;;  %v1294_v18 = vadd.f32 %v3266_v39, %v1053_v1 }
 0x1c8   :  { %v2348_v44 = vpop.eup %2347  ;;  %2373 = vrcp.f32 %v629_v0  ;;  %v2184_v39 = vpop.f32.mrf.mxu0 }
 0x1c9   :  { %v2350_v9 = vpop.eup %2349  ;;  %v991_v40 = vadd.f32 1.0, %v2348_v44  ;;  %2375 = vtanh.f32 %v1290_v22  ;;  %v1299_v44 = vadd.f32 %v3290_v29, %v3271_v45  ;;  %v1303_v62 = vadd.f32 %v2184_v39, %v1054_v59 }
 0x1ca   :  { %v3309_v6 = vpop.eup %2351  ;;  %2377 = vrcp.f32 %v992_v26  ;;  %v1454_v47 = vmul.f32 %v2350_v9, %v3225_v61 }
 0x1cb   :  { %v2354_v51 = vpop.eup %2353  ;;  %2379 = vrcp.f32 %v991_v40  ;;  %v1300_v40 = vadd.f32 %v1269_v16, %v3307_v19  ;;  %v628_v54 = vadd.f32 1.0, %v3309_v6  ;;  %v252_v6 = vld [vmem:[#allocation5 + $0x48] sm:$0xff] }
 0x1cc   :  { %v2356_v55 = vpop.eup %2355  ;;  %v1470_v56 = vadd.f32 %v1454_v47, %v1438_v38  ;;  %v994_v58 = vadd.f32 1.0, %v2354_v51  ;;  %2381 = vpow2.f32 %v1903_v15  ;;  %v245_v38 = vld [vmem:[#allocation5 + $0x10] sm:$0xff] }
 0x1cd   :  { %v3315_v60 = vpop.eup %2357  ;;  %2383 = vtanh.f32 %v1293_v41  ;;  %v1453_v61 = vmul.f32 %v2356_v55, %v3230_v4  ;;  %v1439_v45 = vmul.f32 %v3263_v36, %v245_v38  ;;  %v1279_v41 = vpop.f32.mrf.mxu0 }
 0x1ce   :  { %v2360_v21 = vpop.eup %2359  ;;  %1774 = vst.msk [vmem:[#allocation26 + $0x8] sm:$0xff] %vm1493_vm2, %v1470_v56  ;;  %2385 = vrcp.f32 %v994_v58 }
 0x1cf   :  { %v2362_v8 = vpop.eup %2361  ;;  %v993_v13 = vadd.f32 1.0, %v2360_v21  ;;  %2387 = vpow2.f32 %v1906_v7  ;;  %v1469_v14 = vadd.f32 %v1453_v61, %v1437_v50  ;;  %v1302_v7 = vadd.f32 %v1279_v41, %v1053_v1 }
 0x1d0   :  { %v3322_v0 = vpop.eup %2363  ;;  %2389 = vtanh.f32 %v1292_v17  ;;  %v1456_v4 = vmul.f32 %v2362_v8, %v3237_v10  ;;  %v1296_v10 = vadd.f32 %v3284_v57, %v3261_v35  ;;  %v1301_v35 = vadd.f32 %v2181_v52, %v3297_v12  ;;  %v248_v57 = vld [vmem:[#allocation5 + $0x28] sm:$0xff] }
 0x1d1   :  { %v2366_v37 = vpop.eup %2365  ;;  %2391 = vrcp.f32 %v993_v13  ;;  %2220 = vmatprep.mubr.msk.f32.mxu1 %vm1493_vm2, %v1469_v14  ;;  %1773 = vst.msk [vmem:[#allocation26] sm:$0xff] %vm1493_vm2, %v1469_v14  ;;  %v1442_v43 = vmul.f32 %v3278_v53, %v248_v57  ;;  %v250_v53 = vld [vmem:[#allocation5 + $0x38] sm:$0xff] }
 0x1d2   :  { %v3328_v20 = vpop.eup %2367  ;;  %v996_v22 = vadd.f32 1.0, %v2366_v37  ;;  %2393 = vpow2.f32 %v1905_v63  ;;  %2221 = vmatmul.mubr.msk.f32.vlgmr.msra.gmra.mxu1 %vm1493_vm2, %v1470_v56  ;;  %v1472_v26 = vadd.f32 %v1456_v4, %v1440_v5  ;;  %v249_v5 = vld [vmem:[#allocation5 + $0x30] sm:$0xff] }
 0x1d3   :  { %v3333_v31 = vpop.eup %2369  ;;  %2395 = vtanh.f32 %v1295_v25  ;;  %v254_v25 = vld [vmem:[#allocation5 + $0x58] sm:$0xff] }
 0x1d4   :  { %v3337_v33 = vpop.eup %2371  ;;  %2397 = vrcp.f32 %v996_v22  ;;  %1776 = vst.msk [vmem:[#allocation26 + $0x18] sm:$0xff] %vm1493_vm2, %v1472_v26 }
 0x1d5   :  { %v3342_v24 = vpop.eup %2373  ;;  %2399 = vtanh.f32 %v1294_v18  ;;  %v256_v18 = vld [vmem:[#allocation5 + $0x68] sm:$0xff] }
 0x1d6   :  { %v2376_v15 = vpop.eup %2375  ;;  %2401 = vtanh.f32 %v1297_v2  ;;  %v253_v2 = vld [vmem:[#allocation5 + $0x50] sm:$0xff] }
 0x1d7   :  { %v2378_v9 = vpop.eup %2377  ;;  %2403 = vtanh.f32 %v1296_v10  ;;  %v1455_v29 = vmul.f32 %v2376_v15, %v3244_v3  ;;  %v247_v3 = vld [vmem:[#allocation5 + $0x20] sm:$0xff] }
 0x1d8   :  { %v2380_v47 = vpop.eup %2379  ;;  %2405 = vtanh.f32 %v1299_v44  ;;  %v1441_v59 = vmul.f32 %v3286_v32, %v247_v3  ;;  %v1446_v32 = vmul.f32 %v2378_v9, %v252_v6 }
 0x1d9   :  { %v2382_v49 = vpop.eup %2381  ;;  %2407 = vtanh.f32 %v1298_v46  ;;  %v1471_v27 = vadd.f32 %v1455_v29, %v1439_v45 }
 0x1da   :  { %v2384_v51 = vpop.eup %2383  ;;  %v995_v12 = vadd.f32 1.0, %v2382_v49  ;;  %2409 = vtanh.f32 %v1301_v35 }
 0x1db   :  { %v2386_v52 = vpop.eup %2385  ;;  %2411 = vtanh.f32 %v1300_v40  ;;  %2223 = vmatprep.mubr.msk.f32.mxu1 %vm1493_vm2, %v1471_v27  ;;  %1775 = vst.msk [vmem:[#allocation26 + $0x10] sm:$0xff] %vm1493_vm2, %v1471_v27  ;;  %v1458_v36 = vmul.f32 %v2384_v51, %v3254_v30  ;;  %v1444_v30 = vmul.f32 %v3295_v23, %v250_v53  ;;  %v1443_v23 = vmul.f32 %v3337_v33, %v249_v5  ;;  %v255_v40 = vld [vmem:[#allocation5 + $0x60] sm:$0xff]  ;;  %v3393_v53 = vpop.f32.mrf.mxu0 }
 0x1dc   :  { %v2388_v19 = vpop.eup %2387  ;;  %2413 = vrcp.f32 %v995_v12  ;;  %2224 = vmatmul.mubr.msk.f32.gmra.mxu1 %vm1493_vm2, %v1472_v26  ;;  %v1448_v26 = vmul.f32 %v2386_v52, %v254_v25 }
 0x1dd   :  { %v2390_v55 = vpop.eup %2389  ;;  %v998_v56 = vadd.f32 1.0, %v2388_v19  ;;  %2415 = vtanh.f32 %v1303_v62  ;;  %v1474_v58 = vadd.f32 %v1458_v36, %v1442_v43  ;;  %v258_v62 = vld [vmem:[#allocation5 + $0x78] sm:$0xff] }
 0x1de   :  { %v2392_v17 = vpop.eup %2391  ;;  %2417 = vtanh.f32 %v1302_v7  ;;  %v1457_v50 = vmul.f32 %v2390_v55, %v3258_v34  ;;  %v251_v34 = vld [vmem:[#allocation5 + $0x40] sm:$0xff]  ;;  %v2203_v55 = vpop.f32.mrf.mxu0 }
 0x1df   :  { %v2394_v61 = vpop.eup %2393  ;;  %2419 = vrcp.f32 %v998_v56  ;;  %1778 = vst.msk [vmem:[#allocation26 + $0x28] sm:$0xff] %vm1493_vm2, %v1474_v58  ;;  %v1445_v44 = vmul.f32 %v2380_v47, %v251_v34  ;;  %v1447_v57 = vmul.f32 %v2392_v17, %v253_v2 }
 0x1e0   :  { %v2396_v21 = vpop.eup %2395  ;;  %2421 = vrcp.f32 %v628_v54  ;;  %v997_v63 = vadd.f32 1.0, %v2394_v61  ;;  %v1473_v1 = vadd.f32 %v1457_v50, %v1441_v59 }
 0x1e1   :  { %v2398_v8 = vpop.eup %2397  ;;  %v1460_v13 = vmul.f32 %v2396_v21, %v3268_v42 }
 0x1e2   :  { %v2400_v14 = vpop.eup %2399  ;;  %2423 = vrcp.f32 %v997_v63  ;;  %2226 = vmatprep.mubr.msk.f32.mxu1 %vm1493_vm2, %v1473_v1  ;;  %1777 = vst.msk [vmem:[#allocation26 + $0x20] sm:$0xff] %vm1493_vm2, %v1473_v1  ;;  %v1450_v35 = vmul.f32 %v2398_v8, %v256_v18 }
 0x1e3   :  { %v2402_v16 = vpop.eup %2401  ;;  %2227 = vmatmul.mubr.msk.f32.gmra.mxu1 %vm1493_vm2, %v1474_v58  ;;  %v1459_v4 = vmul.f32 %v2400_v14, %v3275_v48  ;;  %v1476_v37 = vadd.f32 %v1460_v13, %v1444_v30 }
 0x1e4   :  { %v2404_v22 = vpop.eup %2403  ;;  %v1462_v42 = vmul.f32 %v2402_v16, %v3282_v11 }
 0x1e5   :  { %v2406_v10 = vpop.eup %2405  ;;  %v1475_v39 = vadd.f32 %v1459_v4, %v1443_v23  ;;  %1780 = vst.msk [vmem:[#allocation26 + $0x38] sm:$0xff] %vm1493_vm2, %v1476_v37  ;;  %v1461_v38 = vmul.f32 %v2404_v22, %v3299_v28 }
 0x1e6   :  { %v2408_v46 = vpop.eup %2407  ;;  %v1478_v15 = vadd.f32 %v1462_v42, %v1446_v32  ;;  %v1464_v33 = vmul.f32 %v2406_v10, %v3315_v60 }
 0x1e7   :  { %v2410_v48 = vpop.eup %2409  ;;  %2229 = vmatprep.mubr.msk.f32.mxu1 %vm1493_vm2, %v1475_v39  ;;  %1779 = vst.msk [vmem:[#allocation26 + $0x30] sm:$0xff] %vm1493_vm2, %v1475_v39  ;;  %v1477_v11 = vadd.f32 %v1461_v38, %v1445_v44  ;;  %v1463_v9 = vmul.f32 %v2408_v46, %v3322_v0 }
 0x1e8   :  { %v2412_v45 = vpop.eup %2411  ;;  %2230 = vmatmul.mubr.msk.f32.gmra.mxu1 %vm1493_vm2, %v1476_v37  ;;  %1782 = vst.msk [vmem:[#allocation26 + $0x48] sm:$0xff] %vm1493_vm2, %v1478_v15  ;;  %v1480_v28 = vadd.f32 %v1464_v33, %v1448_v26  ;;  %v1466_v29 = vmul.f32 %v2410_v48, %v3328_v20 }
 0x1e9   :  { %v2414_v60 = vpop.eup %2413  ;;  %2232 = vmatprep.mubr.msk.f32.mxu1 %vm1493_vm2, %v1477_v11  ;;  %1781 = vst.msk [vmem:[#allocation26 + $0x40] sm:$0xff] %vm1493_vm2, %v1477_v11  ;;  %v1479_v41 = vadd.f32 %v1463_v9, %v1447_v57  ;;  %v1465_v47 = vmul.f32 %v2412_v45, %v3333_v31  ;;  %v257_v31 = vld [vmem:[#allocation5 + $0x70] sm:$0xff] }
 0x1ea   :  { %v2416_v49 = vpop.eup %2415  ;;  %1784 = vst.msk [vmem:[#allocation26 + $0x58] sm:$0xff] %vm1493_vm2, %v1480_v28  ;;  %v1449_v0 = vmul.f32 %v2414_v60, %v255_v40  ;;  %v1482_v27 = vadd.f32 %v1466_v29, %v1450_v35 }
 0x1eb   :  { %v2418_v43 = vpop.eup %2417  ;;  %1783 = vst.msk [vmem:[#allocation26 + $0x50] sm:$0xff] %vm1493_vm2, %v1479_v41  ;;  %v1468_v51 = vmul.f32 %v2416_v49, %v3342_v24 }
 0x1ec   :  { %v2420_v20 = vpop.eup %2419  ;;  %2233 = vmatmul.mubr.msk.f32.gmra.mxu1 %vm1493_vm2, %v1478_v15  ;;  %v1481_v12 = vadd.f32 %v1465_v47, %v1449_v0  ;;  %1786 = vst.msk [vmem:[#allocation26 + $0x68] sm:$0xff] %vm1493_vm2, %v1482_v27 }
 0x1ed   :  { %v2422_v7 = vpop.eup %2421  ;;  %2235 = vmatprep.mubr.msk.f32.mxu1 %vm1493_vm2, %v1479_v41  ;;  %v1452_v52 = vmul.f32 %v2420_v20, %v258_v62 }
 0x1ee   :  { %1785 = vst.msk [vmem:[#allocation26 + $0x60] sm:$0xff] %vm1493_vm2, %v1481_v12  ;;  %v1467_v3 = vmul.f32 %v2422_v7, %v2418_v43 }
 0x1ef   :  { %v2424_v36 = vpop.eup %2423  ;;  %v1484_v19 = vadd.f32 %v1468_v51, %v1452_v52 }
 0x1f0   :  { %2236 = vmatmul.mubr.msk.f32.gmra.mxu1 %vm1493_vm2, %v1480_v28  ;;  %v1451_v54 = vmul.f32 %v2424_v36, %v257_v31 }
 0x1f1   :  { %2238 = vmatprep.mubr.msk.f32.mxu1 %vm1493_vm2, %v1481_v12  ;;  %1788 = vst.msk [vmem:[#allocation26 + $0x78] sm:$0xff] %vm1493_vm2, %v1484_v19 }
 0x1f2   :  { %v1483_v24 = vadd.f32 %v1467_v3, %v1451_v54 }
 0x1f4   :  { %2239 = vmatmul.mubr.msk.f32.gmra.mxu1 %vm1493_vm2, %v1482_v27  ;;  %1787 = vst.msk [vmem:[#allocation26 + $0x70] sm:$0xff] %vm1493_vm2, %v1483_v24 }
 0x1f5   :  { %2241 = vmatprep.mubr.msk.f32.mxu1 %vm1493_vm2, %v1483_v24 }
 0x1f8   :  { %2242 = vmatmul.mubr.msk.f32.gmra.mxu1 %vm1493_vm2, %v1484_v19 }
 0x1f9   :  { %2728 = shalt.err (!%p2725_p4)
}
 0x1fa   :  { %1810 = dma.vmem_to_hbm [thread:$0]  %s1805_s14, 2048, %s3440_s16, [#allocation27], %s2778_s24, %s2778_s24, %s2779_s25   ;;  %v1687_v17 = vld [vmem:[#allocation23] sm:$0xff]  ;;  %v1688_v59 = vld [vmem:[#allocation23 + $0x8] sm:$0xff]  ;;  %v1689_v6 = vld [vmem:[#allocation23 + $0x10] sm:$0xff]  ;;  %vm1767_vm3 = vcmask 1041409  }
 0x1fb   :  { %v1690_v63 = vld [vmem:[#allocation23 + $0x18] sm:$0xff]  ;;  %v1692_v16 = vld [vmem:[#allocation23 + $0x28] sm:$0xff]  ;;  %v1691_v23 = vld [vmem:[#allocation23 + $0x20] sm:$0xff]  ;;  %vm1771_vm4 = vcmask 517120  }
 0x1fc   :  { %v1694_v10 = vld [vmem:[#allocation23 + $0x38] sm:$0xff]  ;;  %v1693_v39 = vld [vmem:[#allocation23 + $0x30] sm:$0xff] }
 0x292   :  { %v2222_v56 = vpop.f32.mrf.mxu1 }
 0x293   :  { %v1696_v61 = vmul.f32 %v2222_v56, %v1688_v59 }
 0x294   :  { %v1608_v58 = vpop.f32.mrf.mxu1 }
 0x295   :  { %v1695_v50 = vmul.f32 %v1687_v17, %v1608_v58  ;;  %v1712_v5 = vsel %vm1493_vm2, %v1696_v61, 0.0 }
 0x297   :  { %v1711_v21 = vsel %vm1493_vm2, %v1695_v50, 0.0 }
 0x298   :  { %v1713_v13 = vadd.f32 %v1712_v5, %v1711_v21 }
 0x29c   :  { %v2225_v30 = vpop.f32.mrf.mxu1 }
 0x29d   :  { %v1698_v25 = vmul.f32 %v2225_v30, %v1690_v63 }
 0x29e   :  { %v1618_v1 = vpop.f32.mrf.mxu1 }
 0x29f   :  { %v1697_v8 = vmul.f32 %v1689_v6, %v1618_v1  ;;  %v1716_v4 = vsel %vm1493_vm2, %v1698_v25, 0.0 }
 0x2a1   :  { %v1714_v14 = vsel %vm1493_vm2, %v1697_v8, 0.0  ;;  %v1931_v8 = vld [vmem:[%s3436_s12] ss:$0 sm:$0xff]  ;;  %s2797_s12 = smov [#allocation25]  }
 0x2a2   :  { %v1715_v34 = vadd.f32 %v1714_v14, %v1713_v13  ;;  %v1428_v25 = vadd.f32 %v1931_v8, %v3393_v53  ;;  %s1795_s25 = sshll.u32 %s2797_s12, 4  ;;  %s1796_s25 = int_to_ptr.vmem [resolvable:$true] %s1795_s25 }
 0x2a3   :  { %v2228_v32 = vpop.f32.mrf.mxu1  ;;  %s2737_s20 = scalar_lea.vmem %s1796_s25, 32  ;;  %p2742_p6 = scmp.lt.s32.totalorder %s1796_s25, %s1796_s25 }
 0x2a4   :  { %v1717_v18 = vadd.f32 %v1716_v4, %v1715_v34  ;;  %v1700_v22 = vmul.f32 %v2228_v32, %v1692_v16  ;;  %p2738_p5 = scmp.ne.s32.totalorder %s1796_s25, %s2737_s20  ;;  %p2743_p7 = scmp.lt.s32.totalorder %s2737_s20, %s2737_s20 }
 0x2a5   :  { %v1628_v37 = vpop.f32.mrf.mxu1 }
 0x2a6   :  { %v1699_v42 = vmul.f32 %v1691_v23, %v1628_v37  ;;  %v1720_v38 = vsel %vm1493_vm2, %v1700_v22, 0.0  ;;  %p2744_p8 = por %p2743_p7, %p2742_p6 }
 0x2a8   :  { %v1718_v2 = vsel %vm1493_vm2, %v1699_v42, 0.0  ;;  %v2231_v26 = vpop.f32.mrf.mxu1  ;;  %p2745_p9 = pnand %p2744_p8, %p2738_p5 }
 0x2a9   :  { %v1719_v44 = vadd.f32 %v1718_v2, %v1717_v18  ;;  %v1702_v15 = vmul.f32 %v2231_v26, %v1694_v10 }
 0x2aa   :  { %v1638_v46 = vpop.f32.mrf.mxu1 }
 0x2ab   :  { %v1701_v33 = vmul.f32 %v1693_v39, %v1638_v46  ;;  %v1721_v35 = vadd.f32 %v1720_v38, %v1719_v44  ;;  %v1724_v40 = vsel %vm1493_vm2, %v1702_v15, 0.0 }
 0x2ac   :  { %v2234_v48 = vpop.f32.mrf.mxu1 }
 0x2ad   :  { %v1722_v11 = vsel %vm1493_vm2, %v1701_v33, 0.0  ;;  %v1704_v45 = vmul.f32 %v2234_v48, %v1688_v59 }
 0x2ae   :  { %v1723_v57 = vadd.f32 %v1722_v11, %v1721_v35  ;;  %v1648_v9 = vpop.f32.mrf.mxu1 }
 0x2af   :  { %v1703_v28 = vmul.f32 %v1687_v17, %v1648_v9  ;;  %v1733_v0 = vsel %vm1493_vm2, %v1704_v45, 0.0 }
 0x2b0   :  { %v1725_v29 = vadd.f32 %v1724_v40, %v1723_v57  ;;  %v2237_v60 = vpop.f32.mrf.mxu1 }
 0x2b1   :  { %v1732_v41 = vsel %vm1493_vm2, %v1703_v28, 0.0  ;;  %v1706_v27 = vmul.f32 %v2237_v60, %v1690_v63 }
 0x2b2   :  { %v1726_v47 = vrot.slane %v1725_v29, 4  ;;  %v1658_v49 = vpop.f32.mrf.mxu1  ;;  %v1734_v51 = vadd.f32 %v1733_v0, %v1732_v41 }
 0x2b3   :  { %v1705_v62 = vmul.f32 %v1689_v6, %v1658_v49  ;;  %v1737_v52 = vsel %vm1493_vm2, %v1706_v27, 0.0 }
 0x2b4   :  { %v1727_v43 = vadd.f32 %v1726_v47, %v1725_v29  ;;  %v2240_v20 = vpop.f32.mrf.mxu1 }
 0x2b5   :  { %v1735_v12 = vsel %vm1493_vm2, %v1705_v62, 0.0  ;;  %v1708_v3 = vmul.f32 %v2240_v20, %v1692_v16  ;;  %v1941_v16 = vmul.f32 -1.442695, %v1428_v25 }
 0x2b6   :  { %v1736_v7 = vadd.f32 %v1735_v12, %v1734_v51  ;;  %v1668_v31 = vpop.f32.mrf.mxu1  ;;  %v1728_v19 = vrot.slane %v1727_v43, 2 }
 0x2b7   :  { %v1707_v36 = vmul.f32 %v1691_v23, %v1668_v31  ;;  %v1741_v17 = vsel %vm1493_vm2, %v1708_v3, 0.0  ;;  %2425 = vpow2.f32 %v1941_v16 }
 0x2b8   :  { %v1738_v54 = vadd.f32 %v1737_v52, %v1736_v7  ;;  %v2243_v24 = vpop.f32.mrf.mxu1  ;;  %v1729_v61 = vadd.f32 %v1728_v19, %v1727_v43 }
 0x2b9   :  { %v1739_v55 = vsel %vm1493_vm2, %v1707_v36, 0.0  ;;  %v1710_v59 = vmul.f32 %v2243_v24, %v1694_v10 }
 0x2ba   :  { %v1740_v56 = vadd.f32 %v1739_v55, %v1738_v54  ;;  %v1678_v58 = vpop.f32.mrf.mxu1  ;;  %v1730_v1 = vrot.slane %v1729_v61, 1 }
 0x2bb   :  { %v1709_v50 = vmul.f32 %v1693_v39, %v1678_v58  ;;  %v1745_v63 = vsel %vm1493_vm2, %v1710_v59, 0.0 }
 0x2bc   :  { %v1742_v30 = vadd.f32 %v1741_v17, %v1740_v56  ;;  %v1731_v14 = vadd.f32 %v1730_v1, %v1729_v61 }
 0x2bd   :  { %v1743_v6 = vsel %vm1493_vm2, %v1709_v50, 0.0 }
 0x2be   :  { %v1744_v21 = vadd.f32 %v1743_v6, %v1742_v30  ;;  %v1958_v23 = vmul.f32 -1.442695, %v1731_v14 }
 0x2c0   :  { %v1746_v5 = vadd.f32 %v1745_v63, %v1744_v21  ;;  %2427 = vpow2.f32 %v1958_v23 }
 0x2c2   :  { %v1747_v13 = vrot.slane %v1746_v5, 4 }
 0x2c4   :  { %v1748_v34 = vadd.f32 %v1747_v13, %v1746_v5  ;;  %v2426_v42 = vpop.eup %2425 }
 0x2c5   :  { %v1434_v26 = vadd.f32 1.0, %v2426_v42 }
 0x2c6   :  { %v1749_v32 = vrot.slane %v1748_v34, 2 }
 0x2c8   :  { %v1750_v4 = vadd.f32 %v1749_v32, %v1748_v34 }
 0x2ca   :  { %v1751_v37 = vrot.slane %v1750_v4, 1 }
 0x2cc   :  { %v1752_v18 = vadd.f32 %v1751_v37, %v1750_v4 }
 0x2cd   :  { %v2428_v2 = vpop.eup %2427 }
 0x2ce   :  { %v1959_v22 = vmul.f32 -1.442695, %v1752_v18  ;;  %v1759_v10 = vadd.f32 1.0, %v2428_v2 }
 0x2d0   :  { %2429 = vpow2.f32 %v1959_v22 }
 0x2d1   :  { %2431 = vrcp.f32 %v1434_v26 }
 0x2d2   :  { %2433 = vrcp.f32 %v1759_v10 }
 0x2dd   :  { %v2430_v39 = vpop.eup %2429 }
 0x2de   :  { %v1760_v44 = vadd.f32 1.0, %v2430_v39  ;;  %v2432_v53 = vpop.eup %2431 }
 0x2df   :  { %v2434_v38 = vpop.eup %2433 }
 0x2e0   :  { %2435 = vrcp.f32 %v1760_v44 }
 0x2ed   :  { %v2436_v46 = vpop.eup %2435 }
 0x2ee   :  { %v1768_v15 = vsel %vm1767_vm3, %v2436_v46, %v2434_v38 }
 0x2ef   :  { %v1770_v33 = vmul.f32 %v2432_v53, %v1768_v15 }
 0x2f1   :  { %1772 = vst.msk [vmem:[#allocation25] sm:$0x3] %vm1771_vm4, %v1770_v33 }
 0x2f2   :  { %2748 = shalt.err (!%p2745_p9)
}
 0x2f3   :  { %1798 = dma.vmem_to_hbm [thread:$0]  %s1796_s25, 32, %s3439_s15, [#allocation4]  }
 0x2f4   :  { %2773 = dma.done.wait [#allocation4], 32  }
 0x2f5   :  { %2774 = vsyncadd [#allocation4], 4294967264 }
 0x2f6   :  { %2775 = dma.done.wait [#allocation27], 2048  }
 0x2f7   :  { %2776 = vsyncadd [#allocation27], 4294965248 }
 0x2f8   :  { %1817 = vsyncpa [#allocation3], 1 }
 0x2f9   :  { %1818 = vsyncpa [#allocation6], 1 }
 0x2fa   :  { %1819 = vsyncpa [#allocation9], 1 }
 0x2fb   :  { %1820 = vsyncpa [#allocation12], 1 }
 0x2fc   :  { %1821 = vsyncpa [#allocation15], 1 }
 0x2fd   :  { %1822 = vsyncpa [#allocation18], 1 }
 0x2fe   :  { %1823 = vsyncpa [#allocation21], 1 }
 0x2ff   :  { %1824 = vsyncpa [#allocation24], 1 }
 0x300   :  { %1825 = vsyncpa [#allocation4], 1 }
 0x301   :  { %1826 = vsyncpa [#allocation27], 1 }

</bundles_post_ra>
